<compile_context>
chip_gen: v7x
topology: tpu7x:2x2x1
jax: 0.10.0
libtpu: 0.0.40
codegen_flags: <defaults>
</compile_context>

<pallas_src>
import math

import jax
import jax.numpy as jnp
from jax import lax
from jax.experimental import pallas as pl
from jax.experimental.pallas import tpu as pltpu

EPS = 1e-5


# ----------------------------- Pallas kernel ------------------------------- #

def _bottleneck_kernel(x_ref, w1_ref, b1_ref, w2_ref, b2_ref, w3_ref, b3_ref,
                       o_ref, h1pad_ref, patch_ref):
    """Fused Bottleneck block; one grid step == one (image, row-band) tile.

    x_ref    : (1, H, W, Cin)       bf16   full input image (resident per n)
    w1_ref   : (Cin, Cmid)          bf16   1x1 conv1, BN1 scale folded
    b1_ref   : (1, Cmid)            f32
    w2_ref   : (9*Cmid, Cmid)       bf16   3x3 conv2, taps on contraction dim
    b2_ref   : (1, Cmid)            f32
    w3_ref   : (Cmid, Cout)         bf16   1x1 conv3, BN3 scale folded
    b3_ref   : (1, Cout)            f32
    o_ref    : (1, th, W, Cout)            row band of the block output
    h1pad_ref: (th+2, W+2, Cmid)    bf16   scratch: zero-padded h1 band (+halo)
    patch_ref: (th*W, 9*Cmid)       bf16   scratch: im2col patch for conv2
    """
    _, H, W, cin = x_ref.shape
    th = o_ref.shape[1]
    cmid = w1_ref.shape[1]
    cout = w3_ref.shape[1]
    cdt = h1pad_ref.dtype
    rows = th * W

    r = pl.program_id(1)
    nr = pl.num_programs(1)
    row0 = r * th                       # first output row of this band

    w1 = w1_ref[...]
    b1 = b1_ref[...]

    def conv1(x2d):                     # (m, Cin) bf16 -> (m, Cmid) f32, ReLU'd
        a = jnp.dot(x2d, w1, preferred_element_type=jnp.float32)
        return jnp.maximum(a + b1, 0.0)

    # ---- conv1 (1x1) + folded BN1 + ReLU for this band --------------------
    x2d = x_ref[0, pl.ds(row0, th), :, :].reshape(rows, cin)        # bf16
    h1pad_ref[pl.ds(1, th), pl.ds(1, W), :] = (
        conv1(x2d).reshape(th, W, cmid).astype(cdt))

    # Zero-pad the left/right border columns.  Re-zeroed every step (2 thin
    # columns, cheap) so correctness does not depend on a "first step" init
    # when the grid is sharded across cores; all other scratch elements are
    # fully overwritten below every step.
    zcol = jnp.zeros((th + 2, 1, cmid), cdt)
    h1pad_ref[:, pl.ds(0, 1), :] = zcol
    h1pad_ref[:, pl.ds(W + 1, 1), :] = zcol

    # Top halo row of h1: recomputed from x (interior band boundary) or the
    # conv2 zero-padding row (image boundary).
    @pl.when(r > 0)
    def _():
        xr = x_ref[0, pl.ds(row0 - 1, 1), :, :].reshape(W, cin)
        h1pad_ref[pl.ds(0, 1), pl.ds(1, W), :] = (
            conv1(xr).reshape(1, W, cmid).astype(cdt))

    @pl.when(r == 0)
    def _():
        h1pad_ref[pl.ds(0, 1), pl.ds(1, W), :] = jnp.zeros((1, W, cmid), cdt)

    # Bottom halo row.
    @pl.when(r < nr - 1)
    def _():
        xr = x_ref[0, pl.ds(row0 + th, 1), :, :].reshape(W, cin)
        h1pad_ref[pl.ds(th + 1, 1), pl.ds(1, W), :] = (
            conv1(xr).reshape(1, W, cmid).astype(cdt))

    @pl.when(r == nr - 1)
    def _():
        h1pad_ref[pl.ds(th + 1, 1), pl.ds(1, W), :] = jnp.zeros((1, W, cmid), cdt)

    # ---- conv2 (3x3, stride 1, pad 1): taps fused into the K dimension ----
    # TODO(synk): the 9 strided slice+reshape reads still relayout; a roll-based
    # (XLU) shift scheme could build the patch with fewer copies.
    for kh in range(3):
        for kw in range(3):
            t = kh * 3 + kw
            patch_ref[:, pl.ds(t * cmid, cmid)] = (
                h1pad_ref[pl.ds(kh, th), pl.ds(kw, W), :].reshape(rows, cmid))

    a2 = jnp.dot(patch_ref[...], w2_ref[...], preferred_element_type=jnp.float32)
    h2 = jnp.maximum(a2 + b2_ref[...], 0.0).astype(cdt)             # (rows, Cmid)

    # ---- conv3 (1x1) + folded BN3 + identity residual + ReLU (f32 epilogue)
    a3 = jnp.dot(h2, w3_ref[...], preferred_element_type=jnp.float32)
    y = jnp.maximum(a3 + b3_ref[...] + x2d.astype(jnp.float32), 0.0)
    o_ref[0] = y.reshape(th, W, cout).astype(o_ref.dtype)


# ------------------------------ Wrapper ------------------------------------ #

def _nbytes(shape, dtype):
    return int(math.prod(shape)) * jnp.dtype(dtype).itemsize


def _row_tile(h, target=8):
    """Largest divisor of h that is <= target (keeps H % th == 0)."""
    for t in range(min(h, target), 0, -1):
        if h % t == 0:
            return t
    return h


def _vmem_limit_bytes(est):
    """Raise the scoped-VMEM limit only when the working set needs it; never
    request more than 75% of physical VMEM (v7x has only 64 MiB physical)."""
    try:
        phys = int(getattr(pltpu.get_tpu_info(), "vmem_capacity_bytes", 64 << 20))
    except Exception:
        phys = 64 << 20
    cap = (phys * 3) // 4
    if est <= 12 << 20:          # comfortably inside every generation's default
        return None
    want = max(est + (est >> 1), 32 << 20)      # ~1.5x estimate, >= 32 MiB
    return int(min(want, cap))


def _bottleneck_pallas(xq, w1s, b1, w2s, b2, w3s, b3, *, out_dtype=jnp.bfloat16):
    N, H, W, cin = xq.shape
    cmid = w1s.shape[1]
    cout = w3s.shape[1]
    cdt = xq.dtype
    th = _row_tile(H)
    nr = H // th

    def rep(*block):
        # Grid-invariant weight/bias blocks (constant index_map -> resident).
        # TODO(synk): pipeline_mode=pl.Buffered(1) would single-buffer these
        # (saves ~8 MiB at the deepest stage on v7x); left default-buffered.
        nd = len(block)
        return pl.BlockSpec(block, lambda n, r, _nd=nd: (0,) * _nd)

    in_specs = [
        pl.BlockSpec((1, H, W, cin), lambda n, r: (n, 0, 0, 0)),   # x (per image)
        rep(cin, cmid), rep(1, cmid),                              # w1, b1
        rep(9 * cmid, cmid), rep(1, cmid),                         # w2, b2
        rep(cmid, cout), rep(1, cout),                             # w3, b3
    ]
    out_specs = pl.BlockSpec((1, th, W, cout), lambda n, r: (n, r, 0, 0))

    # Rough per-step VMEM working set (double-buffered I/O + weights, scratch,
    # patch and f32 temporaries).
    est = (2 * _nbytes((1, H, W, cin), cdt)
           + 2 * _nbytes((1, th, W, cout), out_dtype)
           + 2 * (_nbytes((cin, cmid), cdt) + _nbytes((9 * cmid, cmid), cdt)
                  + _nbytes((cmid, cout), cdt))
           + _nbytes((th + 2, W + 2, cmid), cdt)
           + _nbytes((th * W, 9 * cmid), cdt)
           + 2 * _nbytes((th * W, cmid), jnp.float32)
           + 2 * _nbytes((th * W, cout), jnp.float32))

    return pl.pallas_call(
        _bottleneck_kernel,
        out_shape=jax.ShapeDtypeStruct((N, H, W, cout), out_dtype),
        grid_spec=pltpu.PrefetchScalarGridSpec(
            num_scalar_prefetch=0,
            grid=(N, nr),
            in_specs=in_specs,
            out_specs=out_specs,
            scratch_shapes=[pltpu.VMEM((th + 2, W + 2, cmid), cdt),
                            pltpu.VMEM((th * W, 9 * cmid), cdt)],
        ),
        compiler_params=pltpu.CompilerParams(
            dimension_semantics=("parallel", "parallel"),
            vmem_limit_bytes=_vmem_limit_bytes(est),
        ),
    )(xq, w1s, b1, w2s, b2, w3s, b3)


# ------------------------------ Parameters --------------------------------- #

def init_params(key, in_channels, out_channels):
    """Deterministic synthetic parameters (eval-mode BatchNorm statistics)."""
    cmid = out_channels
    cout = out_channels * 4
    ks = jax.random.split(key, 18)

    def normal(k, shape, s=0.1):
        return s * jax.random.normal(k, shape, jnp.float32)

    def positive(k, shape):
        return jax.random.uniform(k, shape, jnp.float32, 0.5, 1.5)

    return {
        "w1": normal(ks[0], (in_channels, cmid)), "b1": normal(ks[1], (cmid,)),
        "g1": positive(ks[2], (cmid,)), "beta1": normal(ks[3], (cmid,)),
        "m1": normal(ks[4], (cmid,)), "v1": positive(ks[5], (cmid,)),
        "w2": normal(ks[6], (3, 3, cmid, cmid)), "b2": normal(ks[7], (cmid,)),
        "g2": positive(ks[8], (cmid,)), "beta2": normal(ks[9], (cmid,)),
        "m2": normal(ks[10], (cmid,)), "v2": positive(ks[11], (cmid,)),
        "w3": normal(ks[12], (cmid, cout)), "b3": normal(ks[13], (cout,)),
        "g3": positive(ks[14], (cout,)), "beta3": normal(ks[15], (cout,)),
        "m3": normal(ks[16], (cout,)), "v3": positive(ks[17], (cout,)),
    }


def _fold_bn(gamma, beta, mean, var, conv_bias):
    scale = gamma / jnp.sqrt(var + EPS)
    bias = beta + scale * (conv_bias - mean)
    return scale, bias


def prepare_fused_params(p, compute_dtype):
    """Fold BN scale into the conv weights; keep biases in f32."""
    s1, b1 = _fold_bn(p["g1"], p["beta1"], p["m1"], p["v1"], p["b1"])
    s2, b2 = _fold_bn(p["g2"], p["beta2"], p["m2"], p["v2"], p["b2"])
    s3, b3 = _fold_bn(p["g3"], p["beta3"], p["m3"], p["v3"], p["b3"])
    cmid = p["w1"].shape[1]
    cout = p["w3"].shape[1]
    w1s = (p["w1"] * s1[None, :]).astype(compute_dtype)
    w2s = (p["w2"] * s2[None, None, None, :]).reshape(9 * cmid, cmid).astype(compute_dtype)
    w3s = (p["w3"] * s3[None, :]).astype(compute_dtype)
    return (w1s, b1.reshape(1, cmid).astype(jnp.float32),
            w2s, b2.reshape(1, cmid).astype(jnp.float32),
            w3s, b3.reshape(1, cout).astype(jnp.float32))


# ------------------------------ Forward pass -------------------------------- #

def bottleneck_forward(x, p, *, compute_dtype=jnp.bfloat16,
                       out_dtype=jnp.bfloat16, data_format="NCHW"):
    """Bottleneck forward (i_downsample=None, stride=1), eval-mode BatchNorm."""
    if data_format == "NCHW":
        xh = jnp.transpose(x, (0, 2, 3, 1))
    elif data_format == "NHWC":
        xh = x    # chain blocks in NHWC to skip the boundary transposes
    else:
        raise ValueError(data_format)

    cin = xh.shape[-1]
    cout = p["w3"].shape[1]
    # TODO(synk): projection shortcut (i_downsample) and stride>1 not implemented.
    assert cin == cout, "identity residual requires in_channels == out_channels*4"

    prep = prepare_fused_params(p, compute_dtype)
    out = _bottleneck_pallas(xh.astype(compute_dtype), *prep, out_dtype=out_dtype)
    if data_format == "NCHW":
        out = jnp.transpose(out, (0, 3, 1, 2))
    return out


# ------------------------------ References ---------------------------------- #

def reference_forward_quantized(x_nchw, p, compute_dtype):
    """Pure-JAX forward with the SAME operand quantization as the kernel
    (operands cast to compute_dtype before each matmul, f32 accumulation)."""
    w1s, b1, w2s, b2, w3s, b3 = prepare_fused_params(p, compute_dtype)
    f32 = lambda a: a.astype(jnp.float32)
    x = f32(jnp.transpose(x_nchw, (0, 2, 3, 1)).astype(compute_dtype))
    h1 = jax.nn.relu(jnp.einsum("nhwc,cd->nhwd", x, f32(w1s)) + b1[0])
    h1q = f32(h1.astype(compute_dtype))
    cmid = w1s.shape[1]
    w2hwio = f32(w2s).reshape(3, 3, cmid, cmid)
    h2 = jax.nn.relu(lax.conv_general_dilated(
        h1q, w2hwio, window_strides=(1, 1), padding=((1, 1), (1, 1)),
        dimension_numbers=("NHWC", "HWIO", "NHWC")) + b2[0])
    h2q = f32(h2.astype(compute_dtype))
    y = jax.nn.relu(jnp.einsum("nhwc,cd->nhwd", h2q, f32(w3s)) + b3[0] + x)
    return jnp.transpose(y, (0, 3, 1, 2))


def reference_forward_f32(x_nchw, p):
    """Independent full-f32 reference (unfolded BatchNorm)."""
    x = jnp.transpose(x_nchw, (0, 2, 3, 1))

    def bn(y, g, b, m, v):
        return (y - m) / jnp.sqrt(v + EPS) * g + b

    h = jnp.einsum("nhwc,cd->nhwd", x, p["w1"]) + p["b1"]
    h = jax.nn.relu(bn(h, p["g1"], p["beta1"], p["m1"], p["v1"]))
    h = lax.conv_general_dilated(
        h, p["w2"], window_strides=(1, 1), padding=((1, 1), (1, 1)),
        dimension_numbers=("NHWC", "HWIO", "NHWC")) + p["b2"]
    h = jax.nn.relu(bn(h, p["g2"], p["beta2"], p["m2"], p["v2"]))
    h = jnp.einsum("nhwc,cd->nhwd", h, p["w3"]) + p["b3"]
    h = bn(h, p["g3"], p["beta3"], p["m3"], p["v3"])
    return jnp.transpose(jax.nn.relu(h + x), (0, 3, 1, 2))


# ---------------------------------- Main ------------------------------------ #

if __name__ == "__main__":
    key = jax.random.PRNGKey(0)
    k_x, k_p = jax.random.split(key)

    # Bottleneck(in_channels=256, out_channels=64), expansion 4: the identity
    # residual path requires Cin == 4*64 == 256.  H=16 with row tile th=8 gives
    # a 2-band grid, exercising both the recomputed and the zero-padded halos.
    N, Cin, H, W = 2, 256, 16, 16
    out_channels = 64

    x = jax.random.normal(k_x, (N, Cin, H, W), jnp.float32)
    params = init_params(k_p, Cin, out_channels)

    out = jax.block_until_ready(bottleneck_forward(x, params))
    assert out.shape == (N, out_channels * 4, H, W)
    out_f = out.astype(jnp.float32)

    # Primary check: pure-JAX forward with identical bf16 operand quantization
    # and f32 accumulation, rounded to the same bf16 output dtype (tolerance
    # covers accumulation-order / bf16-ulp re-rounding effects only).
    ref_q = reference_forward_quantized(x, params, jnp.bfloat16)
    ref_qb = ref_q.astype(jnp.bfloat16).astype(jnp.float32)
    rel_q = float(jnp.max(jnp.abs(out_f - ref_qb) / (jnp.abs(ref_qb) + 1.0)))
    assert rel_q < 3e-2, f"mismatch vs quantized reference: rel={rel_q}"

    # Sanity check vs the independent full-f32 reference (loose: bf16 operands).
    ref_f = reference_forward_f32(x, params)
    rel_f = float(jnp.max(jnp.abs(out_f - ref_f) / (jnp.abs(ref_f) + 1.0)))
    assert rel_f < 2e-1, f"mismatch vs f32 reference: rel={rel_f}"

    print("KERNEL_OK")
</pallas_src>

<mosaic_0001>
module attributes {stable_mosaic.version = 11 : i64} {
  func.func @_bottleneck_kernel(%arg0: i32, %arg1: i32, %arg2: memref<1x16x16x256xbf16, #tpu.memory_space<vmem>>, %arg3: memref<256x64xbf16, #tpu.memory_space<vmem>>, %arg4: memref<1x64xf32, #tpu.memory_space<vmem>>, %arg5: memref<576x64xbf16, #tpu.memory_space<vmem>>, %arg6: memref<1x64xf32, #tpu.memory_space<vmem>>, %arg7: memref<64x256xbf16, #tpu.memory_space<vmem>>, %arg8: memref<1x256xf32, #tpu.memory_space<vmem>>, %arg9: memref<1x8x16x256xbf16, #tpu.memory_space<vmem>>, %arg10: memref<10x18x64xbf16, #tpu.memory_space<vmem>>, %arg11: memref<128x576xbf16, #tpu.memory_space<vmem>>) attributes {dimension_semantics = [#tpu.dimension_semantics<parallel>, #tpu.dimension_semantics<parallel>], iteration_bounds = array<i64: 2, 2>, scalar_prefetch = 0 : i64, scratch_operands = 2 : i64, tpu.core_type = #tpu.core_type<tc>, window_params = [{transform_indices = @transform_0, window_bounds = array<i64: 1, 16, 16, 256>}, {pipeline_mode = #tpu.pipeline_mode<synchronous>, transform_indices = @transform_1, window_bounds = array<i64: 256, 64>}, {pipeline_mode = #tpu.pipeline_mode<synchronous>, transform_indices = @transform_2, window_bounds = array<i64: 1, 64>}, {pipeline_mode = #tpu.pipeline_mode<synchronous>, transform_indices = @transform_3, window_bounds = array<i64: 576, 64>}, {pipeline_mode = #tpu.pipeline_mode<synchronous>, transform_indices = @transform_4, window_bounds = array<i64: 1, 64>}, {pipeline_mode = #tpu.pipeline_mode<synchronous>, transform_indices = @transform_5, window_bounds = array<i64: 64, 256>}, {pipeline_mode = #tpu.pipeline_mode<synchronous>, transform_indices = @transform_6, window_bounds = array<i64: 1, 256>}, {transform_indices = @transform_7, window_bounds = array<i64: 1, 8, 16, 256>}]} {
    %c8_i32 = arith.constant 8 : i32
    %0 = arith.muli %arg1, %c8_i32 : i32
    %c0 = arith.constant 0 : index
    %c0_0 = arith.constant 0 : index
    %1 = vector.load %arg3[%c0, %c0_0] : memref<256x64xbf16, #tpu.memory_space<vmem>>, vector<256x64xbf16>
    %c0_1 = arith.constant 0 : index
    %c0_2 = arith.constant 0 : index
    %2 = vector.load %arg4[%c0_1, %c0_2] : memref<1x64xf32, #tpu.memory_space<vmem>>, vector<1x64xf32>
    %c0_3 = arith.constant 0 : index
    %3 = arith.index_cast %0 : i32 to index
    %c0_4 = arith.constant 0 : index
    %c0_5 = arith.constant 0 : index
    %4 = vector.load %arg2[%c0_3, %3, %c0_4, %c0_5] : memref<1x16x16x256xbf16, #tpu.memory_space<vmem>>, vector<1x8x16x256xbf16>
    %5 = vector.shape_cast %4 : vector<1x8x16x256xbf16> to vector<8x16x256xbf16>
    %6 = vector.shape_cast %5 : vector<8x16x256xbf16> to vector<128x256xbf16>
    %cst = arith.constant dense<0.000000e+00> : vector<128x64xf32>
    %7 = tpu.matmul %6, %1, %cst {dimension_numbers = #tpu.dot_dimension_numbers<[1], [0], [0], [1], [0, 0, 1, 1], [], []>} : vector<128x256xbf16>, vector<256x64xbf16>, vector<128x64xf32> -> vector<128x64xf32>
    %8 = vector.broadcast %2 : vector<1x64xf32> to vector<128x64xf32>
    %9 = arith.addf %7, %8 : vector<128x64xf32>
    %cst_6 = arith.constant 0.000000e+00 : f32
    %10 = vector.broadcast %cst_6 : f32 to vector<128x64xf32>
    %11 = arith.maximumf %9, %10 : vector<128x64xf32>
    %12 = vector.shape_cast %11 : vector<128x64xf32> to vector<8x16x64xf32>
    %13 = arith.truncf %12 : vector<8x16x64xf32> to vector<8x16x64xbf16>
    %c1 = arith.constant 1 : index
    %c1_7 = arith.constant 1 : index
    %c0_8 = arith.constant 0 : index
    %14 = vector.load %arg10[%c1, %c1_7, %c0_8] : memref<10x18x64xbf16, #tpu.memory_space<vmem>>, vector<8x16x64xbf16>
    tpu.vector_store %arg10[%c1, %c1_7, %c0_8], %13 {strides = array<i32>} : memref<10x18x64xbf16, #tpu.memory_space<vmem>>, vector<8x16x64xbf16>,
    %cst_9 = arith.constant 0.000000e+00 : bf16
    %15 = vector.broadcast %cst_9 : bf16 to vector<10x1x64xbf16>
    %c0_10 = arith.constant 0 : index
    %c0_11 = arith.constant 0 : index
    %c0_12 = arith.constant 0 : index
    %16 = vector.load %arg10[%c0_10, %c0_11, %c0_12] : memref<10x18x64xbf16, #tpu.memory_space<vmem>>, vector<10x1x64xbf16>
    tpu.vector_store %arg10[%c0_10, %c0_11, %c0_12], %15 {strides = array<i32>} : memref<10x18x64xbf16, #tpu.memory_space<vmem>>, vector<10x1x64xbf16>,
    %c0_13 = arith.constant 0 : index
    %c17 = arith.constant 17 : index
    %c0_14 = arith.constant 0 : index
    %17 = vector.load %arg10[%c0_13, %c17, %c0_14] : memref<10x18x64xbf16, #tpu.memory_space<vmem>>, vector<10x1x64xbf16>
    tpu.vector_store %arg10[%c0_13, %c17, %c0_14], %15 {strides = array<i32>} : memref<10x18x64xbf16, #tpu.memory_space<vmem>>, vector<10x1x64xbf16>,
    %c0_i32 = arith.constant 0 : i32
    %18 = arith.cmpi sgt, %arg1, %c0_i32 : i32
    %19 = arith.extui %18 : i1 to i32
    %c0_i32_15 = arith.constant 0 : i32
    %20 = arith.cmpi ne, %19, %c0_i32_15 : i32
    scf.if %20 {
      %c1_i32_75 = arith.constant 1 : i32
      %80 = arith.subi %0, %c1_i32_75 : i32
      %c0_76 = arith.constant 0 : index
      %81 = arith.index_cast %80 : i32 to index
      %c0_77 = arith.constant 0 : index
      %c0_78 = arith.constant 0 : index
      %82 = vector.load %arg2[%c0_76, %81, %c0_77, %c0_78] : memref<1x16x16x256xbf16, #tpu.memory_space<vmem>>, vector<1x1x16x256xbf16>
      %83 = vector.shape_cast %82 : vector<1x1x16x256xbf16> to vector<1x16x256xbf16>
      %84 = vector.shape_cast %83 : vector<1x16x256xbf16> to vector<16x256xbf16>
      %cst_79 = arith.constant dense<0.000000e+00> : vector<16x64xf32>
      %85 = tpu.matmul %84, %1, %cst_79 {dimension_numbers = #tpu.dot_dimension_numbers<[1], [0], [0], [1], [0, 0, 1, 1], [], []>} : vector<16x256xbf16>, vector<256x64xbf16>, vector<16x64xf32> -> vector<16x64xf32>
      %86 = vector.broadcast %2 : vector<1x64xf32> to vector<16x64xf32>
      %87 = arith.addf %85, %86 : vector<16x64xf32>
      %cst_80 = arith.constant 0.000000e+00 : f32
      %88 = vector.broadcast %cst_80 : f32 to vector<16x64xf32>
      %89 = arith.maximumf %87, %88 : vector<16x64xf32>
      %90 = vector.shape_cast %89 : vector<16x64xf32> to vector<1x16x64xf32>
      %91 = arith.truncf %90 : vector<1x16x64xf32> to vector<1x16x64xbf16>
      %c0_81 = arith.constant 0 : index
      %c1_82 = arith.constant 1 : index
      %c0_83 = arith.constant 0 : index
      %92 = vector.load %arg10[%c0_81, %c1_82, %c0_83] : memref<10x18x64xbf16, #tpu.memory_space<vmem>>, vector<1x16x64xbf16>
      tpu.vector_store %arg10[%c0_81, %c1_82, %c0_83], %91 {strides = array<i32>} : memref<10x18x64xbf16, #tpu.memory_space<vmem>>, vector<1x16x64xbf16>,
    } else {
    }
    %c0_i32_16 = arith.constant 0 : i32
    %21 = arith.cmpi eq, %arg1, %c0_i32_16 : i32
    %22 = arith.extui %21 : i1 to i32
    %c0_i32_17 = arith.constant 0 : i32
    %23 = arith.cmpi ne, %22, %c0_i32_17 : i32
    scf.if %23 {
      %cst_75 = arith.constant 0.000000e+00 : bf16
      %80 = vector.broadcast %cst_75 : bf16 to vector<1x16x64xbf16>
      %c0_76 = arith.constant 0 : index
      %c1_77 = arith.constant 1 : index
      %c0_78 = arith.constant 0 : index
      %81 = vector.load %arg10[%c0_76, %c1_77, %c0_78] : memref<10x18x64xbf16, #tpu.memory_space<vmem>>, vector<1x16x64xbf16>
      tpu.vector_store %arg10[%c0_76, %c1_77, %c0_78], %80 {strides = array<i32>} : memref<10x18x64xbf16, #tpu.memory_space<vmem>>, vector<1x16x64xbf16>,
    } else {
    }
    %c1_i32 = arith.constant 1 : i32
    %24 = arith.cmpi slt, %arg1, %c1_i32 : i32
    %25 = arith.extui %24 : i1 to i32
    %c0_i32_18 = arith.constant 0 : i32
    %26 = arith.cmpi ne, %25, %c0_i32_18 : i32
    scf.if %26 {
      %c8_i32_75 = arith.constant 8 : i32
      %80 = arith.addi %0, %c8_i32_75 : i32
      %c0_76 = arith.constant 0 : index
      %81 = arith.index_cast %80 : i32 to index
      %c0_77 = arith.constant 0 : index
      %c0_78 = arith.constant 0 : index
      %82 = vector.load %arg2[%c0_76, %81, %c0_77, %c0_78] : memref<1x16x16x256xbf16, #tpu.memory_space<vmem>>, vector<1x1x16x256xbf16>
      %83 = vector.shape_cast %82 : vector<1x1x16x256xbf16> to vector<1x16x256xbf16>
      %84 = vector.shape_cast %83 : vector<1x16x256xbf16> to vector<16x256xbf16>
      %cst_79 = arith.constant dense<0.000000e+00> : vector<16x64xf32>
      %85 = tpu.matmul %84, %1, %cst_79 {dimension_numbers = #tpu.dot_dimension_numbers<[1], [0], [0], [1], [0, 0, 1, 1], [], []>} : vector<16x256xbf16>, vector<256x64xbf16>, vector<16x64xf32> -> vector<16x64xf32>
      %86 = vector.broadcast %2 : vector<1x64xf32> to vector<16x64xf32>
      %87 = arith.addf %85, %86 : vector<16x64xf32>
      %cst_80 = arith.constant 0.000000e+00 : f32
      %88 = vector.broadcast %cst_80 : f32 to vector<16x64xf32>
      %89 = arith.maximumf %87, %88 : vector<16x64xf32>
      %90 = vector.shape_cast %89 : vector<16x64xf32> to vector<1x16x64xf32>
      %91 = arith.truncf %90 : vector<1x16x64xf32> to vector<1x16x64xbf16>
      %c9 = arith.constant 9 : index
      %c1_81 = arith.constant 1 : index
      %c0_82 = arith.constant 0 : index
      %92 = vector.load %arg10[%c9, %c1_81, %c0_82] : memref<10x18x64xbf16, #tpu.memory_space<vmem>>, vector<1x16x64xbf16>
      tpu.vector_store %arg10[%c9, %c1_81, %c0_82], %91 {strides = array<i32>} : memref<10x18x64xbf16, #tpu.memory_space<vmem>>, vector<1x16x64xbf16>,
    } else {
    }
    %c1_i32_19 = arith.constant 1 : i32
    %27 = arith.cmpi eq, %arg1, %c1_i32_19 : i32
    %28 = arith.extui %27 : i1 to i32
    %c0_i32_20 = arith.constant 0 : i32
    %29 = arith.cmpi ne, %28, %c0_i32_20 : i32
    scf.if %29 {
      %cst_75 = arith.constant 0.000000e+00 : bf16
      %80 = vector.broadcast %cst_75 : bf16 to vector<1x16x64xbf16>
      %c9 = arith.constant 9 : index
      %c1_76 = arith.constant 1 : index
      %c0_77 = arith.constant 0 : index
      %81 = vector.load %arg10[%c9, %c1_76, %c0_77] : memref<10x18x64xbf16, #tpu.memory_space<vmem>>, vector<1x16x64xbf16>
      tpu.vector_store %arg10[%c9, %c1_76, %c0_77], %80 {strides = array<i32>} : memref<10x18x64xbf16, #tpu.memory_space<vmem>>, vector<1x16x64xbf16>,
    } else {
    }
    %c0_21 = arith.constant 0 : index
    %c0_22 = arith.constant 0 : index
    %c0_23 = arith.constant 0 : index
    %30 = vector.load %arg10[%c0_21, %c0_22, %c0_23] : memref<10x18x64xbf16, #tpu.memory_space<vmem>>, vector<8x16x64xbf16>
    %31 = vector.shape_cast %30 : vector<8x16x64xbf16> to vector<128x64xbf16>
    %c0_24 = arith.constant 0 : index
    %c0_25 = arith.constant 0 : index
    %32 = vector.load %arg11[%c0_24, %c0_25] : memref<128x576xbf16, #tpu.memory_space<vmem>>, vector<128x64xbf16>
    tpu.vector_store %arg11[%c0_24, %c0_25], %31 {strides = array<i32>} : memref<128x576xbf16, #tpu.memory_space<vmem>>, vector<128x64xbf16>,
    %c0_26 = arith.constant 0 : index
    %c1_27 = arith.constant 1 : index
    %c0_28 = arith.constant 0 : index
    %33 = vector.load %arg10[%c0_26, %c1_27, %c0_28] : memref<10x18x64xbf16, #tpu.memory_space<vmem>>, vector<8x16x64xbf16>
    %34 = vector.shape_cast %33 : vector<8x16x64xbf16> to vector<128x64xbf16>
    %c0_29 = arith.constant 0 : index
    %c64 = arith.constant 64 : index
    %35 = vector.load %arg11[%c0_29, %c64] : memref<128x576xbf16, #tpu.memory_space<vmem>>, vector<128x64xbf16>
    tpu.vector_store %arg11[%c0_29, %c64], %34 {strides = array<i32>} : memref<128x576xbf16, #tpu.memory_space<vmem>>, vector<128x64xbf16>,
    %c0_30 = arith.constant 0 : index
    %c2 = arith.constant 2 : index
    %c0_31 = arith.constant 0 : index
    %36 = vector.load %arg10[%c0_30, %c2, %c0_31] : memref<10x18x64xbf16, #tpu.memory_space<vmem>>, vector<8x16x64xbf16>
    %37 = vector.shape_cast %36 : vector<8x16x64xbf16> to vector<128x64xbf16>
    %c0_32 = arith.constant 0 : index
    %c128 = arith.constant 128 : index
    %38 = vector.load %arg11[%c0_32, %c128] : memref<128x576xbf16, #tpu.memory_space<vmem>>, vector<128x64xbf16>
    tpu.vector_store %arg11[%c0_32, %c128], %37 {strides = array<i32>} : memref<128x576xbf16, #tpu.memory_space<vmem>>, vector<128x64xbf16>,
    %c1_33 = arith.constant 1 : index
    %c0_34 = arith.constant 0 : index
    %c0_35 = arith.constant 0 : index
    %39 = vector.load %arg10[%c1_33, %c0_34, %c0_35] : memref<10x18x64xbf16, #tpu.memory_space<vmem>>, vector<8x16x64xbf16>
    %40 = vector.shape_cast %39 : vector<8x16x64xbf16> to vector<128x64xbf16>
    %c0_36 = arith.constant 0 : index
    %c192 = arith.constant 192 : index
    %41 = vector.load %arg11[%c0_36, %c192] : memref<128x576xbf16, #tpu.memory_space<vmem>>, vector<128x64xbf16>
    tpu.vector_store %arg11[%c0_36, %c192], %40 {strides = array<i32>} : memref<128x576xbf16, #tpu.memory_space<vmem>>, vector<128x64xbf16>,
    %c1_37 = arith.constant 1 : index
    %c1_38 = arith.constant 1 : index
    %c0_39 = arith.constant 0 : index
    %42 = vector.load %arg10[%c1_37, %c1_38, %c0_39] : memref<10x18x64xbf16, #tpu.memory_space<vmem>>, vector<8x16x64xbf16>
    %43 = vector.shape_cast %42 : vector<8x16x64xbf16> to vector<128x64xbf16>
    %c0_40 = arith.constant 0 : index
    %c256 = arith.constant 256 : index
    %44 = vector.load %arg11[%c0_40, %c256] : memref<128x576xbf16, #tpu.memory_space<vmem>>, vector<128x64xbf16>
    tpu.vector_store %arg11[%c0_40, %c256], %43 {strides = array<i32>} : memref<128x576xbf16, #tpu.memory_space<vmem>>, vector<128x64xbf16>,
    %c1_41 = arith.constant 1 : index
    %c2_42 = arith.constant 2 : index
    %c0_43 = arith.constant 0 : index
    %45 = vector.load %arg10[%c1_41, %c2_42, %c0_43] : memref<10x18x64xbf16, #tpu.memory_space<vmem>>, vector<8x16x64xbf16>
    %46 = vector.shape_cast %45 : vector<8x16x64xbf16> to vector<128x64xbf16>
    %c0_44 = arith.constant 0 : index
    %c320 = arith.constant 320 : index
    %47 = vector.load %arg11[%c0_44, %c320] : memref<128x576xbf16, #tpu.memory_space<vmem>>, vector<128x64xbf16>
    tpu.vector_store %arg11[%c0_44, %c320], %46 {strides = array<i32>} : memref<128x576xbf16, #tpu.memory_space<vmem>>, vector<128x64xbf16>,
    %c2_45 = arith.constant 2 : index
    %c0_46 = arith.constant 0 : index
    %c0_47 = arith.constant 0 : index
    %48 = vector.load %arg10[%c2_45, %c0_46, %c0_47] : memref<10x18x64xbf16, #tpu.memory_space<vmem>>, vector<8x16x64xbf16>
    %49 = vector.shape_cast %48 : vector<8x16x64xbf16> to vector<128x64xbf16>
    %c0_48 = arith.constant 0 : index
    %c384 = arith.constant 384 : index
    %50 = vector.load %arg11[%c0_48, %c384] : memref<128x576xbf16, #tpu.memory_space<vmem>>, vector<128x64xbf16>
    tpu.vector_store %arg11[%c0_48, %c384], %49 {strides = array<i32>} : memref<128x576xbf16, #tpu.memory_space<vmem>>, vector<128x64xbf16>,
    %c2_49 = arith.constant 2 : index
    %c1_50 = arith.constant 1 : index
    %c0_51 = arith.constant 0 : index
    %51 = vector.load %arg10[%c2_49, %c1_50, %c0_51] : memref<10x18x64xbf16, #tpu.memory_space<vmem>>, vector<8x16x64xbf16>
    %52 = vector.shape_cast %51 : vector<8x16x64xbf16> to vector<128x64xbf16>
    %c0_52 = arith.constant 0 : index
    %c448 = arith.constant 448 : index
    %53 = vector.load %arg11[%c0_52, %c448] : memref<128x576xbf16, #tpu.memory_space<vmem>>, vector<128x64xbf16>
    tpu.vector_store %arg11[%c0_52, %c448], %52 {strides = array<i32>} : memref<128x576xbf16, #tpu.memory_space<vmem>>, vector<128x64xbf16>,
    %c2_53 = arith.constant 2 : index
    %c2_54 = arith.constant 2 : index
    %c0_55 = arith.constant 0 : index
    %54 = vector.load %arg10[%c2_53, %c2_54, %c0_55] : memref<10x18x64xbf16, #tpu.memory_space<vmem>>, vector<8x16x64xbf16>
    %55 = vector.shape_cast %54 : vector<8x16x64xbf16> to vector<128x64xbf16>
    %c0_56 = arith.constant 0 : index
    %c512 = arith.constant 512 : index
    %56 = vector.load %arg11[%c0_56, %c512] : memref<128x576xbf16, #tpu.memory_space<vmem>>, vector<128x64xbf16>
    tpu.vector_store %arg11[%c0_56, %c512], %55 {strides = array<i32>} : memref<128x576xbf16, #tpu.memory_space<vmem>>, vector<128x64xbf16>,
    %c0_57 = arith.constant 0 : index
    %c0_58 = arith.constant 0 : index
    %57 = vector.load %arg11[%c0_57, %c0_58] : memref<128x576xbf16, #tpu.memory_space<vmem>>, vector<128x576xbf16>
    %c0_59 = arith.constant 0 : index
    %c0_60 = arith.constant 0 : index
    %58 = vector.load %arg5[%c0_59, %c0_60] : memref<576x64xbf16, #tpu.memory_space<vmem>>, vector<576x64xbf16>
    %cst_61 = arith.constant dense<0.000000e+00> : vector<128x64xf32>
    %59 = tpu.matmul %57, %58, %cst_61 {dimension_numbers = #tpu.dot_dimension_numbers<[1], [0], [0], [1], [0, 0, 1, 1], [], []>} : vector<128x576xbf16>, vector<576x64xbf16>, vector<128x64xf32> -> vector<128x64xf32>
    %c0_62 = arith.constant 0 : index
    %c0_63 = arith.constant 0 : index
    %60 = vector.load %arg6[%c0_62, %c0_63] : memref<1x64xf32, #tpu.memory_space<vmem>>, vector<1x64xf32>
    %61 = vector.broadcast %60 : vector<1x64xf32> to vector<128x64xf32>
    %62 = arith.addf %59, %61 : vector<128x64xf32>
    %cst_64 = arith.constant 0.000000e+00 : f32
    %63 = vector.broadcast %cst_64 : f32 to vector<128x64xf32>
    %64 = arith.maximumf %62, %63 : vector<128x64xf32>
    %65 = arith.truncf %64 : vector<128x64xf32> to vector<128x64xbf16>
    %c0_65 = arith.constant 0 : index
    %c0_66 = arith.constant 0 : index
    %66 = vector.load %arg7[%c0_65, %c0_66] : memref<64x256xbf16, #tpu.memory_space<vmem>>, vector<64x256xbf16>
    %cst_67 = arith.constant dense<0.000000e+00> : vector<128x256xf32>
    %67 = tpu.matmul %65, %66, %cst_67 {dimension_numbers = #tpu.dot_dimension_numbers<[1], [0], [0], [1], [0, 0, 1, 1], [], []>} : vector<128x64xbf16>, vector<64x256xbf16>, vector<128x256xf32> -> vector<128x256xf32>
    %c0_68 = arith.constant 0 : index
    %c0_69 = arith.constant 0 : index
    %68 = vector.load %arg8[%c0_68, %c0_69] : memref<1x256xf32, #tpu.memory_space<vmem>>, vector<1x256xf32>
    %69 = vector.broadcast %68 : vector<1x256xf32> to vector<128x256xf32>
    %70 = arith.addf %67, %69 : vector<128x256xf32>
    %71 = arith.extf %6 : vector<128x256xbf16> to vector<128x256xf32>
    %72 = arith.addf %70, %71 : vector<128x256xf32>
    %cst_70 = arith.constant 0.000000e+00 : f32
    %73 = vector.broadcast %cst_70 : f32 to vector<128x256xf32>
    %74 = arith.maximumf %72, %73 : vector<128x256xf32>
    %75 = vector.shape_cast %74 : vector<128x256xf32> to vector<8x16x256xf32>
    %76 = arith.truncf %75 : vector<8x16x256xf32> to vector<8x16x256xbf16>
    %c0_71 = arith.constant 0 : index
    %c0_72 = arith.constant 0 : index
    %c0_73 = arith.constant 0 : index
    %c0_74 = arith.constant 0 : index
    %77 = vector.load %arg9[%c0_71, %c0_72, %c0_73, %c0_74] : memref<1x8x16x256xbf16, #tpu.memory_space<vmem>>, vector<1x8x16x256xbf16>
    %78 = vector.shape_cast %77 : vector<1x8x16x256xbf16> to vector<8x16x256xbf16>
    %79 = vector.shape_cast %76 : vector<8x16x256xbf16> to vector<1x8x16x256xbf16>
    tpu.vector_store %arg9[%c0_71, %c0_72, %c0_73, %c0_74], %79 {strides = array<i32>} : memref<1x8x16x256xbf16, #tpu.memory_space<vmem>>, vector<1x8x16x256xbf16>,
    return
  }
  func.func @transform_0(%arg0: i32, %arg1: i32) -> (i32, i32, i32, i32) {
    %c0_i32 = arith.constant 0 : i32
    %c0_i32_0 = arith.constant 0 : i32
    %c0_i32_1 = arith.constant 0 : i32
    %c0_i32_2 = arith.constant 0 : i32
    return %arg0, %c0_i32, %c0_i32_0, %c0_i32_1 : i32, i32, i32, i32
  }
  func.func @transform_1(%arg0: i32, %arg1: i32) -> (i32, i32) {
    %c0_i32 = arith.constant 0 : i32
    %c0_i32_0 = arith.constant 0 : i32
    %c0_i32_1 = arith.constant 0 : i32
    return %c0_i32, %c0_i32_0 : i32, i32
  }
  func.func @transform_2(%arg0: i32, %arg1: i32) -> (i32, i32) {
    %c0_i32 = arith.constant 0 : i32
    %c0_i32_0 = arith.constant 0 : i32
    %c0_i32_1 = arith.constant 0 : i32
    return %c0_i32, %c0_i32_0 : i32, i32
  }
  func.func @transform_3(%arg0: i32, %arg1: i32) -> (i32, i32) {
    %c0_i32 = arith.constant 0 : i32
    %c0_i32_0 = arith.constant 0 : i32
    %c0_i32_1 = arith.constant 0 : i32
    return %c0_i32, %c0_i32_0 : i32, i32
  }
  func.func @transform_4(%arg0: i32, %arg1: i32) -> (i32, i32) {
    %c0_i32 = arith.constant 0 : i32
    %c0_i32_0 = arith.constant 0 : i32
    %c0_i32_1 = arith.constant 0 : i32
    return %c0_i32, %c0_i32_0 : i32, i32
  }
  func.func @transform_5(%arg0: i32, %arg1: i32) -> (i32, i32) {
    %c0_i32 = arith.constant 0 : i32
    %c0_i32_0 = arith.constant 0 : i32
    %c0_i32_1 = arith.constant 0 : i32
    return %c0_i32, %c0_i32_0 : i32, i32
  }
  func.func @transform_6(%arg0: i32, %arg1: i32) -> (i32, i32) {
    %c0_i32 = arith.constant 0 : i32
    %c0_i32_0 = arith.constant 0 : i32
    %c0_i32_1 = arith.constant 0 : i32
    return %c0_i32, %c0_i32_0 : i32, i32
  }
  func.func @transform_7(%arg0: i32, %arg1: i32) -> (i32, i32, i32, i32) {
    %c0_i32 = arith.constant 0 : i32
    %c0_i32_0 = arith.constant 0 : i32
    %c0_i32_1 = arith.constant 0 : i32
    return %arg0, %arg1, %c0_i32, %c0_i32_0 : i32, i32, i32, i32
  }
}

</mosaic_0001>

<bundles_post_ra>
// kernel: tpu_custom_call.1
= control target key start
LH: loop header
LB: loop body
LE: loop exit
PB: predicated region body
PF: predicated region fallthrough
CT: control target
= control target key end

     0   :  { %s6035_s0 = inlined_call_operand.vmem [shape: bf16[2,16,16,256], index: 0, kind: input, shape index: {}]   ;;  %s6036_s1 = inlined_call_operand.vmem [shape: bf16[256,64], index: 1, kind: input, shape index: {}]   ;;  %s6037_s2 = inlined_call_operand.vmem [shape: f32[1,64], index: 2, kind: input, shape index: {}]   ;;  %s6038_s3 = inlined_call_operand.vmem [shape: bf16[576,64], index: 3, kind: input, shape index: {}]   ;;  %s6039_s4 = inlined_call_operand.vmem [shape: f32[1,64], index: 4, kind: input, shape index: {}]   ;;  %s6040_s5 = inlined_call_operand.vmem [shape: bf16[64,256], index: 5, kind: input, shape index: {}]   ;;  %s6041_s6 = inlined_call_operand.vmem [shape: f32[1,256], index: 6, kind: input, shape index: {}]   ;;  %s6042_s7 = inlined_call_operand.hbm [shape: bf16[2,16,16,256], index: 7, kind: output, shape index: {}]  }
   0x1   :  { %6060 = sst [smem:[#allocation15_spill]] %s6035_s0 }
   0x2   :  { %12 = vsyncpa [#allocation5], 0 }
   0x3   :  { %14 = vsyncpa [#allocation5 + $0x1], 0  ;;  %s4807_s24 = smov 0   ;;  %s4809_s25 = smov 0  }
   0x4   :  { %s4811_s26 = smov 0   ;;  %s4813_s27 = smov 0  }
   0x5   :  { %s4815_s28 = smov 0   ;;  %s4817_s29 = smov 0  }
   0x6   :  { %s4819_s30 = smov 0   ;;  %s4821_s8 = smov 0  }
   0x7 LB: > { %s3861_s9 = sadd.s32 4294967295, %s4758_s8   ;;  %s3862_s10 = sadd.s32 4294967294, %s4758_s8   ;;  %s4758_s8 = sphi %s4821_s8, %s20_s8   ;;  %s4754_s30 = sphi %s4819_s30, %s6100_s30   ;;  %s4750_s29 = sphi %s4817_s29, %s6099_s29   ;;  %s4746_s28 = sphi %s4815_s28, %s6098_s28   ;;  %s4742_s27 = sphi %s4813_s27, %s6097_s27   ;;  %s4738_s26 = sphi %s4811_s26, %s6096_s26   ;;  %s4734_s25 = sphi %s4809_s25, %s6095_s25   ;;  %s4730_s24 = sphi %s4807_s24, %s6094_s24  }
   0x8   : > { %s29_s11 = sadd.s32 1, %s4750_s29  ;;  %s32_s12 = sadd.s32 1, %s4754_s30 }
   0x9   : > { %p30_p0 = scmp.ge.s32.totalorder %s29_s11, 2  ;;  %p203_p1 = scmp.ne.s32.totalorder %s4738_s26, %s4734_s25 }
   0xa   : > { %p204_p2 = scmp.eq.s32.totalorder %s3861_s9, 3  ;;  %p209_p5 = scmp.ne.s32.totalorder %s4734_s25, %s4730_s24 }
   0xb   : > { %s6102_s11 = smov (%p30_p0, %s29_s11), 0  ;;  %s6104_s12 = smov (!%p30_p0, %s32_s12), %s4754_s30 }
   0xc   : > { %s189_s13 = ssub.s32 %s4750_s29, %s6102_s11  ;;  %p4858_p3 = por %p204_p2, %p203_p1 }
   0xd   : > { %p34_p4 = scmp.ge.s32.totalorder %s6104_s12, 2  ;;  %p210_p6 = scmp.eq.s32.totalorder %s3862_s10, 3 }
   0xe   : > { %p3865_p7 = scmp.ge.s32.totalorder %s4758_s8, 1  ;;  %p254_p9 = scmp.lt.s32.totalorder %s4758_s8, 5 }
   0xf   : > { %s6106_s12 = smov (%p34_p4, %s6104_s12), 0  ;;  %p4867_p8 = por %p210_p6, %p209_p5 }
  0x10   : > { %s188_s16 = ssub.s32 %s4754_s30, %s6106_s12  ;;  %s193_s17 = sadd.s32 1, %s4738_s26 }
  0x11   : > { %s190_s18 = sor.u32 %s189_s13, %s188_s16  ;;  %p255_p10 = pnand %p3865_p7, %p254_p9 }
  0x12   : > { %p191_p11 = scmp.eq.s32.totalorder %s190_s18, 0 }
  0x13   : > { %258 = sbr.rel (%p255_p10) target bundleno = 1569 (0x621), region = 48 }
  0x14   : > { %s4876_s19 = scalar_select %p191_p11, %s4738_s26, %s193_s17  }
  0x1a   : > { %s6043_s20 = sand.u32 1, %s4734_s25   ;;  %v4887_v0 = vld [vmem:[%s6036_s1 + $0x40] sm:$0xff]   ;;  %v4899_v2 = vld [vmem:[%s6036_s1 + $0x48] sm:$0xff]   ;;  %p286_p12 = scmp.lt.s32.totalorder %s4746_s28, 1  ;;  %v4914_v4 = vld [vmem:[%s6036_s1 + $0x50] sm:$0xff]   ;;  %vm861_vm1 = vcmask 516096  }
  0x1b   : > { %s4882_s22 = sshll.u32 %s6043_s20, 7  ;;  %v4892_v1 = vld [vmem:[%s6036_s1] sm:$0xff]   ;;  %4162 = vmatprep.subr.bf16.mxu0 %v4887_v0  ;;  %4434 = vmatprep.subr.bf16.mxu1 %v4887_v0  ;;  %v4907_v3 = vld [vmem:[%s6036_s1 + $0x8] sm:$0xff]   ;;  %v4922_v5 = vld [vmem:[%s6036_s1 + $0x10] sm:$0xff]   ;;  %s6063_s0 = sld [smem:[#allocation15_spill]]  ;;  %vm853_vm5 = vcmask 519168  }
  0x1c   : > { %4163 = vmatpush3.bf16.msra.mxu0 %v4892_v1  ;;  %4442 = vmatpush3.bf16.msra.mxu1 %v4892_v1  ;;  %s287_s13 = scalar_select %p286_p12, %s4746_s28, 1  ;;  %v4929_v6 = vld [vmem:[%s6036_s1 + $0x58] sm:$0xff]   ;;  %v4949_v8 = vld [vmem:[%s6036_s1 + $0x60] sm:$0xff]   ;;  %v4972_v12 = vld [vmem:[%s6036_s1 + $0x68] sm:$0xff]   ;;  %vm689_vm0 = vsmask.f32 256 }
  0x1d   : > { %4164 = vmatprep.subr.bf16.mxu0 %v4899_v2  ;;  %4435 = vmatprep.subr.bf16.mxu1 %v4899_v2  ;;  %s4122_s21 = sshll.u32 %s4742_s27, 7  ;;  %v4942_v7 = vld [vmem:[%s6036_s1 + $0x18] sm:$0xff]   ;;  %v4959_v9 = vld [vmem:[%s6036_s1 + $0x20] sm:$0xff]   ;;  %v4989_v17 = vld [vmem:[%s6036_s1 + $0x28] sm:$0xff]   ;;  %vm854_vm3 = vsmask.f32 7938 }
  0x1e   : > { %s4120_s16 = sshll.u32 %s287_s13, 8  ;;  %v4996_v18 = vld [vmem:[%s6036_s1 + $0x70] sm:$0xff]   ;;  %v5010_v20 = vld [vmem:[%s6036_s1 + $0x78] sm:$0xff]   ;;  %vm5088_vm2 = vmand %vm861_vm1, %vm689_vm0  ;;  %vm690_vm6 = vsmask.f32 4368  ;;  %p3921_p13 = scmp.le.s32.totalorder %s4742_s27, 0 }
  0x1f   : > { %v5003_v19 = vld [vmem:[%s6036_s1 + $0x30] sm:$0xff]   ;;  %v5017_v21 = vld [vmem:[%s6036_s1 + $0x38] sm:$0xff]   ;;  %v915_v49 = vld [vmem:[#allocation2] sm:$0x1]  ;;  %s6080_s20 = sshll.u32 (!%p3921_p13), %s4742_s27, 3 }
  0x20   : > { %4165 = vmatpush3.bf16.msra.mxu0 %v4907_v3  ;;  %4443 = vmatpush3.bf16.msra.mxu1 %v4907_v3  ;;  %v916_v50 = vsel %vm5088_vm2, 0, %v915_v49  ;;  %v942_v51 = vld [vmem:[#allocation2 + $0x6c] sm:$0x1]  ;;  %vm5095_vm4 = vmand %vm861_vm1, %vm854_vm3  ;;  %v946_v53 = vld [vmem:[#allocation2 + $0x8] sm:$0x1]  ;;  %s3922_s17 = sadd.s32 (!%p3921_p13), 4294967295, %s6080_s20 }
  0x21   : > { %4166 = vmatprep.subr.bf16.mxu0 %v4914_v4  ;;  %4436 = vmatprep.subr.bf16.mxu1 %v4914_v4  ;;  %s4934_s13 = scalar_lea.vmem %s6063_s0, %s4120_s16  ;;  %917 = vst [vmem:[#allocation2] sm:$0x1] %v916_v50  ;;  %v943_v54 = vsel %vm5088_vm2, 0, %v942_v51  ;;  %v947_v55 = vsel %vm5095_vm4, 0, %v946_v53  ;;  %v973_v56 = vld [vmem:[#allocation2 + $0x74] sm:$0x1]  ;;  %vm5116_vm7 = vmand %vm853_vm5, %vm854_vm3 }
  0x22   : > { %s4952_s16 = scalar_lea.vmem %s4934_s13, %s4122_s21  ;;  %944 = vst [vmem:[#allocation2 + $0x6c] sm:$0x1] %v943_v54  ;;  %948 = vst [vmem:[#allocation2 + $0x8] sm:$0x1] %v947_v55  ;;  %v974_v57 = vsel %vm5095_vm4, 0, %v973_v56  ;;  %s5227_s21 = scalar_lea.vmem [#allocation4], %s4882_s22 }
  0x23   : > { %v4962_v10 = vld [vmem:[%s4952_s16] sm:$0xff]  ;;  %v4965_v11 = vld [vmem:[%s4952_s16 + $0x8] sm:$0xff]  ;;  %v5020_v22 = vld [vmem:[%s4952_s16 + $0x10] sm:$0xff]  ;;  %975 = vst [vmem:[#allocation2 + $0x74] sm:$0x1] %v974_v57  ;;  %s4139_s18 = sshll.u32 (!%p3921_p13), %s3922_s17, 4 }
  0x24   : > { %4167 = vmatpush3.bf16.msra.mxu0 %v4922_v5  ;;  %4444 = vmatpush3.bf16.msra.mxu1 %v4922_v5  ;;  %v3874_v13 = vcombine.high %v4962_v10, %v4965_v11  ;;  %v4977_v14 = vld [vmem:[%s4952_s16 + $0x40] sm:$0xff]  ;;  %v4980_v15 = vld [vmem:[%s4952_s16 + $0x48] sm:$0xff]  ;;  %v5025_v23 = vld [vmem:[%s4952_s16 + $0x18] sm:$0xff]  ;;  %v3873_v26 = vcombine.low %v4962_v10, %v4965_v11  ;;  %s983_s23 = scalar_lea.vmem (!%p3921_p13), %s4934_s13, %s4139_s18 }
  0x25   : > { %4168 = vmatprep.subr.bf16.mxu0 %v4929_v6  ;;  %4437 = vmatprep.subr.bf16.mxu1 %v4929_v6  ;;  %6064 = vst [vmem:[#allocation7_spill] sm:$0xff] %v4977_v14  ;;  %6065 = vst [vmem:[#allocation8_spill] sm:$0xff] %v4980_v15  ;;  %v3882_v16 = vcombine.high %v4977_v14, %v4980_v15  ;;  %v5028_v24 = vld [vmem:[%s4952_s16 + $0x50] sm:$0xff]  ;;  %v5031_v25 = vld [vmem:[%s4952_s16 + $0x58] sm:$0xff]  ;;  %v3881_v27 = vcombine.low %v4977_v14, %v4980_v15 }
  0x26   : > { %560 = vmatprep.mubr.bf16.mxu0 %v3874_v13  ;;  %6066 = vst [vmem:[#allocation9_spill] sm:$0xff] %v5028_v24  ;;  %6067 = vst [vmem:[#allocation10_spill] sm:$0xff] %v5031_v25  ;;  %v3876_v28 = vcombine.high %v5020_v22, %v5025_v23  ;;  %v3884_v29 = vcombine.high %v5028_v24, %v5031_v25  ;;  %v5044_v30 = vld [vmem:[%s4952_s16 + $0x20] sm:$0xff]  ;;  %v5047_v31 = vld [vmem:[%s4952_s16 + $0x28] sm:$0xff]  ;;  %v3875_v34 = vcombine.low %v5020_v22, %v5025_v23 }
  0x27   : > { %592 = vmatprep.mubr.bf16.mxu1 %v3882_v16  ;;  %v5050_v32 = vld [vmem:[%s4952_s16 + $0x60] sm:$0xff]  ;;  %v5053_v33 = vld [vmem:[%s4952_s16 + $0x68] sm:$0xff]  ;;  %v3883_v35 = vcombine.low %v5028_v24, %v5031_v25  ;;  %v3878_v36 = vcombine.high %v5044_v30, %v5047_v31  ;;  %v5064_v38 = vld [vmem:[%s4952_s16 + $0x30] sm:$0xff]  ;;  %v3877_v42 = vcombine.low %v5044_v30, %v5047_v31 }
  0x28   : > { %4169 = vmatpush3.bf16.msra.mxu0 %v4942_v7  ;;  %4445 = vmatpush3.bf16.msra.mxu1 %v4942_v7  ;;  %6068 = vst [vmem:[#allocation11_spill] sm:$0xff] %v5050_v32  ;;  %6069 = vst [vmem:[#allocation12_spill] sm:$0xff] %v5053_v33  ;;  %v3886_v37 = vcombine.high %v5050_v32, %v5053_v33  ;;  %v5067_v39 = vld [vmem:[%s4952_s16 + $0x38] sm:$0xff]  ;;  %v5070_v40 = vld [vmem:[%s4952_s16 + $0x70] sm:$0xff]  ;;  %v3885_v43 = vcombine.low %v5050_v32, %v5053_v33 }
  0x29   : > { %4170 = vmatprep.subr.bf16.mxu0 %v4949_v8  ;;  %4438 = vmatprep.subr.bf16.mxu1 %v4949_v8  ;;  %6070 = vst [vmem:[#allocation13_spill] sm:$0xff] %v5070_v40  ;;  %v5073_v41 = vld [vmem:[%s4952_s16 + $0x78] sm:$0xff]  ;;  %v3880_v44 = vcombine.high %v5064_v38, %v5067_v39  ;;  %v3879_v46 = vcombine.low %v5064_v38, %v5067_v39  ;;  %v5108_v60 = vld [vmem:[%s6037_s2] ss:$0 sm:$0xff]  ;;  %vm5128_vm8 = vmor %vm689_vm0, %vm690_vm6 }
  0x2a   : > { %6071 = vst [vmem:[#allocation14_spill] sm:$0xff] %v5073_v41  ;;  %v3888_v45 = vcombine.high %v5070_v40, %v5073_v41  ;;  %v3887_v47 = vcombine.low %v5070_v40, %v5073_v41  ;;  %v4577_v52 = vld [vmem:[%s983_s23 + $0x4] ss:$8 sps:$4 sm:$0xff] (!%p3921_p13)  }
  0x2c   : > { %4171 = vmatpush3.bf16.msra.mxu0 %v4959_v9  ;;  %4446 = vmatpush3.bf16.msra.mxu1 %v4959_v9 }
  0x2d   : > { %4172 = vmatprep.subr.bf16.mxu0 %v4972_v12  ;;  %4439 = vmatprep.subr.bf16.mxu1 %v4972_v12 }
  0x30   : > { %4173 = vmatpush3.bf16.msra.mxu0 %v4989_v17  ;;  %4447 = vmatpush3.bf16.msra.mxu1 %v4989_v17 }
  0x31   : > { %4174 = vmatprep.subr.bf16.mxu0 %v4996_v18  ;;  %4440 = vmatprep.subr.bf16.mxu1 %v4996_v18 }
  0x34   : > { %4175 = vmatpush3.bf16.msra.mxu0 %v5003_v19  ;;  %4448 = vmatpush3.bf16.msra.mxu1 %v5003_v19 }
  0x35   : > { %4176 = vmatprep.subr.bf16.mxu0 %v5010_v20  ;;  %4441 = vmatprep.subr.bf16.mxu1 %v5010_v20 }
  0x38   : > { %4177 = vmatpush3.bf16.msra.mxu0 %v5017_v21  ;;  %4449 = vmatpush3.bf16.msra.mxu1 %v5017_v21 }
  0x39   : > { %4226 = vmatprep.subr.bf16.mxu0 (!%p3921_p13), %v4887_v0 }
  0x3b   : > { %561 = vmatmul.mubr.bf16.vlgmr.msra.gmra.mrb[0].mxu0 %v3873_v26  ;;  %593 = vmatmul.mubr.bf16.vlgmr.msra.gmra.mrb[0].mxu1 %v3881_v27 }
  0x3c   : > { %568 = vmatprep.mubr.bf16.mxu0 %v3876_v28  ;;  %600 = vmatprep.mubr.bf16.mxu1 %v3884_v29 }
  0x3d   : > { %4227 = vmatpush3.bf16.msra.mxu0 (!%p3921_p13), %v4892_v1 }
  0x3e   : > { %4228 = vmatprep.subr.bf16.mxu0 (!%p3921_p13), %v4899_v2 }
  0x41   : > { %4229 = vmatpush3.bf16.msra.mxu0 (!%p3921_p13), %v4907_v3 }
  0x42   : > { %4230 = vmatprep.subr.bf16.mxu0 (!%p3921_p13), %v4914_v4 }
  0x43   : > { %569 = vmatmul.mubr.bf16.gmra.mrb[4].mxu0 %v3875_v34  ;;  %601 = vmatmul.mubr.bf16.gmra.mrb[4].mxu1 %v3883_v35 }
  0x44   : > { %576 = vmatprep.mubr.bf16.mxu0 %v3878_v36  ;;  %608 = vmatprep.mubr.bf16.mxu1 %v3886_v37 }
  0x45   : > { %4231 = vmatpush3.bf16.msra.mxu0 (!%p3921_p13), %v4922_v5 }
  0x46   : > { %4232 = vmatprep.subr.bf16.mxu0 (!%p3921_p13), %v4929_v6 }
  0x49   : > { %4233 = vmatpush3.bf16.msra.mxu0 (!%p3921_p13), %v4942_v7 }
  0x4a   : > { %4234 = vmatprep.subr.bf16.mxu0 (!%p3921_p13), %v4949_v8 }
  0x4b   : > { %577 = vmatmul.mubr.bf16.gmra.mrb[8].mxu0 %v3877_v42  ;;  %609 = vmatmul.mubr.bf16.gmra.mrb[8].mxu1 %v3885_v43 }
  0x4c   : > { %584 = vmatprep.mubr.bf16.mxu0 %v3880_v44  ;;  %616 = vmatprep.mubr.bf16.mxu1 %v3888_v45 }
  0x4d   : > { %4235 = vmatpush3.bf16.msra.mxu0 (!%p3921_p13), %v4959_v9 }
  0x4e   : > { %4236 = vmatprep.subr.bf16.mxu0 (!%p3921_p13), %v4972_v12 }
  0x51   : > { %4237 = vmatpush3.bf16.msra.mxu0 (!%p3921_p13), %v4989_v17 }
  0x52   : > { %4238 = vmatprep.subr.bf16.mxu0 (!%p3921_p13), %v4996_v18 }
  0x53   : > { %585 = vmatmul.mubr.bf16.gmra.mrb[12].mxu0 %v3879_v46  ;;  %617 = vmatmul.mubr.bf16.gmra.mrb[12].mxu1 %v3887_v47 }
  0x54   : > { %1028 = vmatprep.mubr.bf16.mxu0 (!%p3921_p13), %v4577_v52 }
  0x55   : > { %4239 = vmatpush3.bf16.msra.mxu0 (!%p3921_p13), %v5003_v19 }
  0x56   : > { %4240 = vmatprep.subr.bf16.mxu0 (!%p3921_p13), %v5010_v20 }
  0x59   : > { %4241 = vmatpush3.bf16.msra.mxu0 (!%p3921_p13), %v5017_v21 }
 0x10e   : > { %v4178_v58 = vpop.f32.mrb[0].mxu0  ;;  %v4202_v59 = vpop.f32.mrb[0].mxu1 }
 0x10f   : > { %v4179_v61 = vpop.f32.mrb[1].mxu0  ;;  %v4203_v62 = vpop.f32.mrb[1].mxu1 }
 0x110   : > { %v4180_v63 = vadd.f32 %v4179_v61, %v4178_v58  ;;  %v4204_v13 = vadd.f32 %v4203_v62, %v4202_v59  ;;  %v4181_v16 = vpop.f32.mrb[2].mxu0  ;;  %v4205_v26 = vpop.f32.mrb[2].mxu1 }
 0x111   : > { %v4182_v27 = vpop.f32.mrb[3].mxu0  ;;  %v4206_v28 = vpop.f32.mrb[3].mxu1 }
 0x112   : > { %v563_v29 = vadd.f32 %v4180_v63, %v5108_v60  ;;  %v595_v34 = vadd.f32 %v4204_v13, %v5108_v60  ;;  %v4183_v35 = vadd.f32 %v4182_v27, %v4181_v16  ;;  %v4207_v36 = vadd.f32 %v4206_v28, %v4205_v26 }
 0x114   : > { %v625_v37 = vmax.f32 %v563_v29, 0.0  ;;  %v633_v42 = vmax.f32 %v595_v34, 0.0  ;;  %v566_v43 = vadd.f32 %v4183_v35, %v5108_v60  ;;  %v598_v44 = vadd.f32 %v4207_v36, %v5108_v60  ;;  %v856_v29 = vld [vmem:[#allocation2 + $0xc] sm:$0xf] }
 0x116   : > { %v4123_v45 = vpack.c.bf16 %v625_v37, %v625_v37  ;;  %v4131_v46 = vpack.c.bf16 %v633_v42, %v633_v42  ;;  %v626_v47 = vmax.f32 %v566_v43, 0.0  ;;  %v634_v49 = vmax.f32 %v598_v44, 0.0  ;;  %v4184_v50 = vpop.f32.mrb[4].mxu0  ;;  %v4208_v51 = vpop.f32.mrb[4].mxu1  ;;  %v887_v42 = vld [vmem:[#allocation2 + $0x3c] sm:$0xf] }
 0x117   : > { %v4185_v53 = vpop.f32.mrb[5].mxu0  ;;  %v4209_v54 = vpop.f32.mrb[5].mxu1 }
 0x118   : > { %v693_v55 = vshrl.u32 %v4123_v45, 16  ;;  %v696_v56 = vshll.u32 %v4123_v45, 16  ;;  %v761_v57 = vshrl.u32 %v4131_v46, 16  ;;  %v764_v58 = vshll.u32 %v4131_v46, 16  ;;  %v4187_v59 = vpop.f32.mrb[6].mxu0  ;;  %v4211_v61 = vpop.f32.mrb[6].mxu1 }
 0x119   : > { %v4124_v62 = vpack.c.bf16 %v626_v47, %v626_v47  ;;  %v4132_v63 = vpack.c.bf16 %v634_v49, %v634_v49  ;;  %v4186_v13 = vadd.f32 %v4185_v53, %v4184_v50  ;;  %v4210_v16 = vadd.f32 %v4209_v54, %v4208_v51  ;;  %v4188_v26 = vpop.f32.mrb[7].mxu0  ;;  %v4212_v27 = vpop.f32.mrb[7].mxu1 }
 0x11a   : > { %v695_v28 = vrot.slane %v693_v55, 7  ;;  %v763_v34 = vrot.slane %v761_v57, 7  ;;  %v4189_v35 = vadd.f32 %v4188_v26, %v4187_v59  ;;  %v4213_v36 = vadd.f32 %v4212_v27, %v4211_v61 }
 0x11b   : > { %v701_v43 = vshrl.u32 %v4124_v62, 16  ;;  %v704_v44 = vshll.u32 %v4124_v62, 16  ;;  %v769_v45 = vshrl.u32 %v4132_v63, 16  ;;  %v772_v46 = vshll.u32 %v4132_v63, 16 }
 0x11c   : > { %v698_v47 = vor.u32 %v696_v56, %v695_v28  ;;  %v699_v49 = vrot.slane %v695_v28, 4  ;;  %v766_v50 = vor.u32 %v764_v58, %v763_v34  ;;  %v767_v51 = vrot.slane %v763_v34, 4  ;;  %v863_v56 = vld [vmem:[#allocation2 + $0x14] sm:$0x1]  ;;  %v891_v58 = vld [vmem:[#allocation2 + $0x44] sm:$0x1] }
 0x11d   : > { %v703_v53 = vrot.slane %v701_v43, 7  ;;  %v771_v54 = vrot.slane %v769_v45, 7  ;;  %v571_v55 = vadd.f32 %v4186_v13, %v5108_v60  ;;  %v603_v57 = vadd.f32 %v4210_v16, %v5108_v60 }
 0x11e   : > { %v857_v59 = vsel %vm5116_vm7, %v698_v47, %v856_v29  ;;  %v888_v61 = vsel %vm5116_vm7, %v766_v50, %v887_v42  ;;  %v574_v63 = vadd.f32 %v4189_v35, %v5108_v60  ;;  %v606_v13 = vadd.f32 %v4213_v36, %v5108_v60  ;;  %v4190_v26 = vpop.f32.mrb[8].mxu0  ;;  %v4214_v16 = vpop.f32.mrb[8].mxu1 }
 0x11f   : > { %858 = vst [vmem:[#allocation2 + $0xc] sm:$0xf] %v857_v59  ;;  %889 = vst [vmem:[#allocation2 + $0x3c] sm:$0xf] %v888_v61  ;;  %v706_v27 = vor.u32 %v704_v44, %v703_v53  ;;  %v708_v28 = vrot.slane %v703_v53, 4  ;;  %v774_v29 = vor.u32 %v772_v46, %v771_v54  ;;  %v776_v34 = vrot.slane %v771_v54, 4 }
 0x120   : > { %v4191_v42 = vpop.f32.mrb[9].mxu0  ;;  %v4215_v43 = vpop.f32.mrb[9].mxu1  ;;  %v627_v45 = vmax.f32 %v571_v55, 0.0  ;;  %v635_v47 = vmax.f32 %v603_v57, 0.0  ;;  %v628_v50 = vmax.f32 %v574_v63, 0.0  ;;  %v636_v41 = vmax.f32 %v606_v13, 0.0 }
 0x121   : > { %v4193_v40 = vpop.f32.mrb[10].mxu0  ;;  %v4217_v33 = vpop.f32.mrb[10].mxu1  ;;  %v707_v35 = vsel %vm5128_vm8, %v699_v49, %v706_v27  ;;  %v864_v36 = vsel %vm5088_vm2, %v708_v28, %v863_v56  ;;  %v775_v44 = vsel %vm5128_vm8, %v767_v51, %v774_v29  ;;  %v892_v46 = vsel %vm5088_vm2, %v776_v34, %v891_v58  ;;  %v866_v29 = vld [vmem:[#allocation2 + $0x18] sm:$0xf]  ;;  %v894_v34 = vld [vmem:[#allocation2 + $0x48] sm:$0xf] }
 0x122   : > { %v4194_v53 = vpop.f32.mrb[11].mxu0  ;;  %v4218_v54 = vpop.f32.mrb[11].mxu1  ;;  %860 = vst.msk [vmem:[#allocation2 + $0x10] sm:$0xf] %vm853_vm5, %v707_v35  ;;  %865 = vst [vmem:[#allocation2 + $0x14] sm:$0x1] %v864_v36  ;;  %v4125_v55 = vpack.c.bf16 %v627_v45, %v627_v45  ;;  %v4133_v57 = vpack.c.bf16 %v635_v47, %v635_v47  ;;  %v4126_v49 = vpack.c.bf16 %v628_v50, %v628_v50 }
 0x123   : > { %890 = vst.msk [vmem:[#allocation2 + $0x40] sm:$0xf] %vm853_vm5, %v775_v44  ;;  %893 = vst [vmem:[#allocation2 + $0x44] sm:$0x1] %v892_v46  ;;  %v4134_v59 = vpack.c.bf16 %v636_v41, %v636_v41  ;;  %v4192_v61 = vadd.f32 %v4191_v42, %v4190_v26  ;;  %v4216_v56 = vadd.f32 %v4215_v43, %v4214_v16  ;;  %v870_v50 = vld [vmem:[#allocation2 + $0x20] sm:$0x1] }
 0x124   : > { %v4195_v63 = vadd.f32 %v4194_v53, %v4193_v40  ;;  %v4219_v13 = vadd.f32 %v4218_v54, %v4217_v33  ;;  %v710_v51 = vshrl.u32 %v4125_v55, 16  ;;  %v713_v27 = vshll.u32 %v4125_v55, 16 }
 0x125   : > { %v778_v28 = vshrl.u32 %v4133_v57, 16  ;;  %v781_v58 = vshll.u32 %v4133_v57, 16  ;;  %v718_v32 = vshrl.u32 %v4126_v49, 16  ;;  %v721_v35 = vshll.u32 %v4126_v49, 16 }
 0x126   : > { %v786_v36 = vshrl.u32 %v4134_v59, 16  ;;  %v789_v25 = vshll.u32 %v4134_v59, 16  ;;  %v918_v44 = vld [vmem:[#allocation2 + $0xc] sm:$0x1]  ;;  %v930_v46 = vld [vmem:[#allocation2 + $0x3c] sm:$0x1]  ;;  %v579_v41 = vadd.f32 %v4192_v61, %v5108_v60  ;;  %v611_v40 = vadd.f32 %v4216_v56, %v5108_v60 }
 0x127   : > { %v712_v45 = vrot.slane %v710_v51, 7  ;;  %v780_v47 = vrot.slane %v778_v28, 7  ;;  %v919_v33 = vsel %vm5088_vm2, 0, %v918_v44  ;;  %v931_v26 = vsel %vm5088_vm2, 0, %v930_v46  ;;  %v4196_v43 = vpop.f32.mrb[12].mxu0  ;;  %v4220_v53 = vpop.f32.mrb[12].mxu1 }
 0x128   : > { %v720_v16 = vrot.slane %v718_v32, 7  ;;  %v788_v42 = vrot.slane %v786_v36, 7  ;;  %920 = vst [vmem:[#allocation2 + $0xc] sm:$0x1] %v919_v33  ;;  %932 = vst [vmem:[#allocation2 + $0x3c] sm:$0x1] %v931_v26 }
 0x129   : > { %v715_v54 = vor.u32 %v713_v27, %v712_v45  ;;  %v716_v55 = vrot.slane %v712_v45, 4  ;;  %v783_v57 = vor.u32 %v781_v58, %v780_v47  ;;  %v784_v49 = vrot.slane %v780_v47, 4  ;;  %v898_v59 = vld [vmem:[#allocation2 + $0x50] sm:$0x1]  ;;  %v4197_v61 = vpop.f32.mrb[13].mxu0  ;;  %v4221_v51 = vpop.f32.mrb[13].mxu1 }
 0x12a   : > { %v949_v56 = vld [vmem:[#allocation2 + $0x14] sm:$0x1]  ;;  %v961_v28 = vld [vmem:[#allocation2 + $0x44] sm:$0x1]  ;;  %v723_v24 = vor.u32 %v721_v35, %v720_v16  ;;  %v725_v44 = vrot.slane %v720_v16, 4  ;;  %v791_v15 = vor.u32 %v789_v25, %v788_v42  ;;  %v793_v14 = vrot.slane %v788_v42, 4 }
 0x12b   : > { %v950_v32 = vsel %vm5095_vm4, 0, %v949_v56  ;;  %v962_v36 = vsel %vm5095_vm4, 0, %v961_v28  ;;  %v867_v27 = vsel %vm5116_vm7, %v715_v54, %v866_v29  ;;  %v895_v58 = vsel %vm5116_vm7, %v783_v57, %v894_v34  ;;  %v4199_v46 = vpop.f32.mrb[14].mxu0  ;;  %v4223_v45 = vpop.f32.mrb[14].mxu1 }
 0x12c   : > { %951 = vst [vmem:[#allocation2 + $0x14] sm:$0x1] %v950_v32  ;;  %963 = vst [vmem:[#allocation2 + $0x44] sm:$0x1] %v962_v36  ;;  %v724_v25 = vsel %vm5128_vm8, %v716_v55, %v723_v24  ;;  %v871_v35 = vsel %vm5088_vm2, %v725_v44, %v870_v50  ;;  %v792_v47 = vsel %vm5128_vm8, %v784_v49, %v791_v15  ;;  %v4200_v33 = vpop.f32.mrb[15].mxu0  ;;  %v4224_v34 = vpop.f32.mrb[15].mxu1 }
 0x12d   : > { %868 = vst [vmem:[#allocation2 + $0x18] sm:$0xf] %v867_v27  ;;  %896 = vst [vmem:[#allocation2 + $0x48] sm:$0xf] %v895_v58  ;;  %v899_v29 = vsel %vm5088_vm2, %v793_v14, %v898_v59  ;;  %v629_v26 = vmax.f32 %v579_v41, 0.0  ;;  %v637_v16 = vmax.f32 %v611_v40, 0.0  ;;  %v582_v24 = vadd.f32 %v4195_v63, %v5108_v60 }
 0x12e   : > { %869 = vst.msk [vmem:[#allocation2 + $0x1c] sm:$0xf] %vm853_vm5, %v724_v25  ;;  %872 = vst [vmem:[#allocation2 + $0x20] sm:$0x1] %v871_v35  ;;  %v614_v50 = vadd.f32 %v4219_v13, %v5108_v60  ;;  %v4198_v42 = vadd.f32 %v4197_v61, %v4196_v43  ;;  %v4222_v54 = vadd.f32 %v4221_v51, %v4220_v53  ;;  %v873_v40 = vld [vmem:[#allocation2 + $0x24] sm:$0xf] }
 0x12f   : > { %897 = vst.msk [vmem:[#allocation2 + $0x4c] sm:$0xf] %vm853_vm5, %v792_v47  ;;  %900 = vst [vmem:[#allocation2 + $0x50] sm:$0x1] %v899_v29  ;;  %v4201_v15 = vadd.f32 %v4200_v33, %v4199_v46  ;;  %v4225_v55 = vadd.f32 %v4224_v34, %v4223_v45  ;;  %v4127_v57 = vpack.c.bf16 %v629_v26, %v629_v26  ;;  %v630_v49 = vmax.f32 %v582_v24, 0.0 }
 0x130   : > { %v4135_v14 = vpack.c.bf16 %v637_v16, %v637_v16  ;;  %v638_v59 = vmax.f32 %v614_v50, 0.0  ;;  %v587_v56 = vadd.f32 %v4198_v42, %v5108_v60  ;;  %v619_v28 = vadd.f32 %v4222_v54, %v5108_v60  ;;  %v901_v24 = vld [vmem:[#allocation2 + $0x54] sm:$0xf] }
 0x131   : > { %v727_v44 = vshrl.u32 %v4127_v57, 16  ;;  %v730_v32 = vshll.u32 %v4127_v57, 16  ;;  %v4128_v63 = vpack.c.bf16 %v630_v49, %v630_v49  ;;  %v590_v46 = vadd.f32 %v4201_v15, %v5108_v60 }
 0x132   : > { %v795_v41 = vshrl.u32 %v4135_v14, 16  ;;  %v798_v36 = vshll.u32 %v4135_v14, 16  ;;  %v631_v27 = vmax.f32 %v587_v56, 0.0  ;;  %v639_v13 = vmax.f32 %v619_v28, 0.0 }
 0x133   : > { %v729_v61 = vrot.slane %v727_v44, 7  ;;  %v4136_v58 = vpack.c.bf16 %v638_v59, %v638_v59  ;;  %v622_v50 = vadd.f32 %v4225_v55, %v5108_v60  ;;  %v735_v15 = vshrl.u32 %v4128_v63, 16 }
 0x134   : > { %v921_v43 = vld [vmem:[#allocation2 + $0x18] sm:$0x1]  ;;  %v933_v53 = vld [vmem:[#allocation2 + $0x48] sm:$0x1]  ;;  %v797_v51 = vrot.slane %v795_v41, 7  ;;  %v4129_v29 = vpack.c.bf16 %v631_v27, %v631_v27  ;;  %v4137_v33 = vpack.c.bf16 %v639_v13, %v639_v13  ;;  %v738_v57 = vshll.u32 %v4128_v63, 16 }
 0x135   : > { %v922_v45 = vsel %vm5088_vm2, 0, %v921_v43  ;;  %v934_v25 = vsel %vm5088_vm2, 0, %v933_v53  ;;  %v952_v35 = vld [vmem:[#allocation2 + $0x20] sm:$0x1]  ;;  %v732_v16 = vor.u32 %v730_v32, %v729_v61  ;;  %v733_v42 = vrot.slane %v729_v61, 4 }
 0x136   : > { %v964_v47 = vld [vmem:[#allocation2 + $0x50] sm:$0x1]  ;;  %923 = vst [vmem:[#allocation2 + $0x18] sm:$0x1] %v922_v45  ;;  %935 = vst [vmem:[#allocation2 + $0x48] sm:$0x1] %v934_v25  ;;  %v800_v54 = vor.u32 %v798_v36, %v797_v51 }
 0x137   : > { %v953_v34 = vsel %vm5095_vm4, 0, %v952_v35  ;;  %v965_v26 = vsel %vm5095_vm4, 0, %v964_v47  ;;  %v874_v14 = vsel %vm5116_vm7, %v732_v16, %v873_v40  ;;  %v803_v49 = vshrl.u32 %v4136_v58, 16  ;;  %v877_v32 = vld [vmem:[#allocation2 + $0x2c] sm:$0x1] }
 0x138   : > { %954 = vst [vmem:[#allocation2 + $0x20] sm:$0x1] %v953_v34  ;;  %966 = vst [vmem:[#allocation2 + $0x50] sm:$0x1] %v965_v26  ;;  %v806_v59 = vshll.u32 %v4136_v58, 16  ;;  %v744_v56 = vshrl.u32 %v4129_v29, 16  ;;  %v902_v28 = vsel %vm5116_vm7, %v800_v54, %v901_v24 }
 0x139   : > { %875 = vst [vmem:[#allocation2 + $0x24] sm:$0xf] %v874_v14  ;;  %v737_v44 = vrot.slane %v735_v15, 7  ;;  %v747_v41 = vshll.u32 %v4129_v29, 16  ;;  %v812_v55 = vshrl.u32 %v4137_v33, 16  ;;  %v805_v27 = vrot.slane %v803_v49, 7 }
 0x13a   : > { %903 = vst [vmem:[#allocation2 + $0x54] sm:$0xf] %v902_v28  ;;  %v905_v13 = vld [vmem:[#allocation2 + $0x5c] sm:$0x1]  ;;  %v746_v36 = vrot.slane %v744_v56, 7  ;;  %v815_v43 = vshll.u32 %v4137_v33, 16 }
 0x13b   : > { %v632_v63 = vmax.f32 %v590_v46, 0.0  ;;  %v740_v53 = vor.u32 %v738_v57, %v737_v44  ;;  %v742_v61 = vrot.slane %v737_v44, 4  ;;  %v880_v40 = vld [vmem:[#allocation2 + $0x30] sm:$0xf]  ;;  %v814_v45 = vrot.slane %v812_v55, 7 }
 0x13c   : > { %v640_v58 = vmax.f32 %v622_v50, 0.0  ;;  %v801_v25 = vrot.slane %v797_v51, 4  ;;  %v808_v35 = vor.u32 %v806_v59, %v805_v27  ;;  %v810_v47 = vrot.slane %v805_v27, 4  ;;  %v908_v26 = vld [vmem:[#allocation2 + $0x60] sm:$0xf] }
 0x13d   : > { %v749_v34 = vor.u32 %v747_v41, %v746_v36  ;;  %v741_v29 = vsel %vm5128_vm8, %v733_v42, %v740_v53  ;;  %v878_v16 = vsel %vm5088_vm2, %v742_v61, %v877_v32  ;;  %v817_v24 = vor.u32 %v815_v43, %v814_v45  ;;  %v884_v32 = vld [vmem:[#allocation2 + $0x38] sm:$0x1] }
 0x13e   : > { %876 = vst.msk [vmem:[#allocation2 + $0x28] sm:$0xf] %vm853_vm5, %v741_v29  ;;  %879 = vst [vmem:[#allocation2 + $0x2c] sm:$0x1] %v878_v16  ;;  %v809_v46 = vsel %vm5128_vm8, %v801_v25, %v808_v35  ;;  %v906_v51 = vsel %vm5088_vm2, %v810_v47, %v905_v13  ;;  %v4130_v50 = vpack.c.bf16 %v632_v63, %v632_v63  ;;  %v750_v27 = vrot.slane %v746_v36, 4 }
 0x13f   : > { %v881_v33 = vsel %vm5116_vm7, %v749_v34, %v880_v40  ;;  %904 = vst.msk [vmem:[#allocation2 + $0x58] sm:$0xf] %vm853_vm5, %v809_v46  ;;  %907 = vst [vmem:[#allocation2 + $0x5c] sm:$0x1] %v906_v51  ;;  %v909_v42 = vsel %vm5116_vm7, %v817_v24, %v908_v26  ;;  %v4138_v54 = vpack.c.bf16 %v640_v58, %v640_v58  ;;  %v912_v63 = vld [vmem:[#allocation2 + $0x68] sm:$0x1] }
 0x140   : > { %882 = vst [vmem:[#allocation2 + $0x30] sm:$0xf] %v881_v33  ;;  %v924_v15 = vld [vmem:[#allocation2 + $0x24] sm:$0x1]  ;;  %910 = vst [vmem:[#allocation2 + $0x60] sm:$0xf] %v909_v42 }
 0x141   : > { %v752_v57 = vshrl.u32 %v4130_v50, 16  ;;  %v925_v14 = vsel %vm5088_vm2, 0, %v924_v15  ;;  %v936_v49 = vld [vmem:[#allocation2 + $0x54] sm:$0x1]  ;;  %v820_v59 = vshrl.u32 %v4138_v54, 16  ;;  %v755_v44 = vshll.u32 %v4130_v50, 16 }
 0x142   : > { %926 = vst [vmem:[#allocation2 + $0x24] sm:$0x1] %v925_v14  ;;  %v937_v56 = vsel %vm5088_vm2, 0, %v936_v49  ;;  %v823_v55 = vshll.u32 %v4138_v54, 16  ;;  %v818_v61 = vrot.slane %v814_v45, 4 }
 0x143   : > { %v754_v28 = vrot.slane %v752_v57, 7  ;;  %938 = vst [vmem:[#allocation2 + $0x54] sm:$0x1] %v937_v56  ;;  %v822_v41 = vrot.slane %v820_v59, 7  ;;  %v4575_v54 = vld [vmem:[%s983_s23] ss:$8 sps:$4 sm:$0xff] (!%p3921_p13)  }
 0x144   : > { %1029 = vmatmul.mubr.bf16.vlgmr.msra.gmra.mrb[0].mxu0 (!%p3921_p13), %v4575_v54 }
 0x145   : > { %v757_v13 = vor.u32 %v755_v44, %v754_v28  ;;  %v759_v43 = vrot.slane %v754_v28, 4  ;;  %v955_v53 = vld [vmem:[#allocation2 + $0x2c] sm:$0x1]  ;;  %v825_v40 = vor.u32 %v823_v55, %v822_v41  ;;  %v827_v58 = vrot.slane %v822_v41, 4 }
 0x146   : > { %v956_v25 = vsel %vm5095_vm4, 0, %v955_v53  ;;  %v967_v35 = vld [vmem:[#allocation2 + $0x5c] sm:$0x1] }
 0x147   : > { %v927_v47 = vld [vmem:[#allocation2 + $0x30] sm:$0x1]  ;;  %v758_v34 = vsel %vm5128_vm8, %v750_v27, %v757_v13  ;;  %v885_v26 = vsel %vm5088_vm2, %v759_v43, %v884_v32  ;;  %957 = vst [vmem:[#allocation2 + $0x2c] sm:$0x1] %v956_v25  ;;  %v968_v36 = vsel %vm5095_vm4, 0, %v967_v35  ;;  %v826_v16 = vsel %vm5128_vm8, %v818_v61, %v825_v40 }
 0x148   : > { %v928_v45 = vsel %vm5088_vm2, 0, %v927_v47  ;;  %v939_v29 = vld [vmem:[#allocation2 + $0x60] sm:$0x1]  ;;  %883 = vst.msk [vmem:[#allocation2 + $0x34] sm:$0xf] %vm853_vm5, %v758_v34  ;;  %v913_v24 = vsel %vm5088_vm2, %v827_v58, %v912_v63 }
 0x149   : > { %886 = vst [vmem:[#allocation2 + $0x38] sm:$0x1] %v885_v26  ;;  %969 = vst [vmem:[#allocation2 + $0x5c] sm:$0x1] %v968_v36  ;;  %v940_v46 = vsel %vm5088_vm2, 0, %v939_v29 }
 0x14a   : > { %929 = vst [vmem:[#allocation2 + $0x30] sm:$0x1] %v928_v45  ;;  %911 = vst.msk [vmem:[#allocation2 + $0x64] sm:$0xf] %vm853_vm5, %v826_v16  ;;  %v1065_v61 = vld [vmem:[#allocation2] sm:$0xf] (!%p3921_p13) }
 0x14b   : > { %914 = vst [vmem:[#allocation2 + $0x68] sm:$0x1] %v913_v24  ;;  %941 = vst [vmem:[#allocation2 + $0x60] sm:$0x1] %v940_v46  ;;  %v1069_v35 = vld [vmem:[#allocation2 + $0x8] sm:$0x1] (!%p3921_p13) }
 0x14e   : > { %979 = sbr.rel (%p3921_p13) target bundleno = 555 (0x22b), region = 52 }
 0x150   : > { %v958_v51 = vld [vmem:[#allocation2 + $0x38] sm:$0x1] }
 0x151   : > { %v959_v33 = vsel %vm5095_vm4, 0, %v958_v51 }
 0x152   : > { %v970_v50 = vld [vmem:[#allocation2 + $0x68] sm:$0x1]  ;;  %960 = vst [vmem:[#allocation2 + $0x38] sm:$0x1] %v959_v33 }
 0x153   : > { %v971_v42 = vsel %vm5095_vm4, 0, %v970_v50 }
 0x154   : > { %972 = vst [vmem:[#allocation2 + $0x68] sm:$0x1] %v971_v42 }
 0x217   : > { %v4242_v15 = vpop.f32.mrb[0].mxu0 }
 0x218   : > { %v4243_v57 = vpop.f32.mrb[1].mxu0 }
 0x219   : > { %v4244_v14 = vadd.f32 %v4243_v57, %v4242_v15  ;;  %v4245_v49 = vpop.f32.mrb[2].mxu0 }
 0x21a   : > { %v4246_v59 = vpop.f32.mrb[3].mxu0 }
 0x21b   : > { %v1031_v56 = vadd.f32 %v4244_v14, %v5108_v60  ;;  %v4247_v28 = vadd.f32 %v4246_v59, %v4245_v49 }
 0x21d   : > { %v1037_v44 = vmax.f32 %v1031_v56, 0.0  ;;  %v1034_v32 = vadd.f32 %v4247_v28, %v5108_v60 }
 0x21f   : > { %v4140_v41 = vpack.c.bf16 %v1037_v44, %v1037_v44  ;;  %v1038_v55 = vmax.f32 %v1034_v32, 0.0 }
 0x221   : > { %v1046_v27 = vshrl.u32 %v4140_v41, 16  ;;  %v4141_v13 = vpack.c.bf16 %v1038_v55, %v1038_v55  ;;  %v1049_v63 = vshll.u32 %v4140_v41, 16 }
 0x223   : > { %v1048_v43 = vrot.slane %v1046_v27, 7  ;;  %v1054_v53 = vshrl.u32 %v4141_v13, 16  ;;  %v1057_v25 = vshll.u32 %v4141_v13, 16 }
 0x225   : > { %v1051_v40 = vor.u32 %v1049_v63, %v1048_v43  ;;  %v1056_v58 = vrot.slane %v1054_v53, 7  ;;  %v1052_v47 = vrot.slane %v1048_v43, 4 }
 0x227   : > { %v1066_v34 = vsel %vm5116_vm7, %v1051_v40, %v1065_v61  ;;  %v1059_v26 = vor.u32 %v1057_v25, %v1056_v58  ;;  %v1061_v36 = vrot.slane %v1056_v58, 4 }
 0x228   : > { %1067 = vst [vmem:[#allocation2] sm:$0xf] %v1066_v34 }
 0x229   : > { %v1060_v45 = vsel %vm5128_vm8, %v1052_v47, %v1059_v26  ;;  %v1070_v29 = vsel %vm5088_vm2, %v1061_v36, %v1069_v35 }
 0x22a   : > { %1068 = vst.msk [vmem:[#allocation2 + $0x4] sm:$0xf] %vm853_vm5, %v1060_v45  ;;  %1071 = vst [vmem:[#allocation2 + $0x8] sm:$0x1] %v1070_v29 }
 0x22b PF: > { %p3929_p0 = scmp.ne.s32.totalorder %s4742_s27, 0 }
 0x22c   : > { %v4760_v51 = vmov (!%p3929_p0), 0  }
 0x22d   : > { %1075 = sbr.rel (%p3929_p0) target bundleno = 564 (0x234), region = 56  ;;  %1079 = vst.msk [vmem:[#allocation2 + $0x4] sm:$0xf] (!%p3929_p0), %vm853_vm5, %v4760_v51 }
 0x22f   : > { %v1076_v16 = vld [vmem:[#allocation2] sm:$0xf] (!%p3929_p0) }
 0x230   : > { %v1077_v46 = vsel (!%p3929_p0), %vm5116_vm7, 0, %v1076_v16 }
 0x231   : > { %v1080_v24 = vld [vmem:[#allocation2 + $0x8] sm:$0x1] (!%p3929_p0)  ;;  %1078 = vst [vmem:[#allocation2] sm:$0xf] (!%p3929_p0), %v1077_v46 }
 0x232   : > { %v1081_v33 = vsel (!%p3929_p0), %vm5088_vm2, 0, %v1080_v24 }
 0x233   : > { %1082 = vst [vmem:[#allocation2 + $0x8] sm:$0x1] (!%p3929_p0), %v1081_v33 }
 0x234 PF: > { %p3930_p1 = scmp.ge.s32.totalorder %s4742_s27, 1 }
 0x235   : > { %4248 = vmatprep.subr.bf16.mxu0 (!%p3930_p1), %v4887_v0  ;;  %v4580_v50 = vld [vmem:[%s4952_s16 + $0x84] ss:$8 sps:$4 sm:$0xff] (!%p3930_p1)   ;;  %v4578_v0 = vld [vmem:[%s4952_s16 + $0x80] ss:$8 sps:$4 sm:$0xff] (!%p3930_p1)   ;;  %v1177_v14 = vld [vmem:[#allocation2 + $0x74] sm:$0x1] (!%p3930_p1) }
 0x236   : > { %1086 = sbr.rel (%p3930_p1) target bundleno = 828 (0x33c), region = 60  ;;  %4249 = vmatpush3.bf16.msra.mxu0 (!%p3930_p1), %v4892_v1  ;;  %1135 = vmatprep.mubr.bf16.mxu0 (!%p3930_p1), %v4580_v50 }
 0x237   : > { %4250 = vmatprep.subr.bf16.mxu0 (!%p3930_p1), %v4899_v2 }
 0x23a   : > { %4251 = vmatpush3.bf16.msra.mxu0 (!%p3930_p1), %v4907_v3 }
 0x23b   : > { %4252 = vmatprep.subr.bf16.mxu0 (!%p3930_p1), %v4914_v4 }
 0x23e   : > { %4253 = vmatpush3.bf16.msra.mxu0 %v4922_v5 }
 0x23f   : > { %4254 = vmatprep.subr.bf16.mxu0 %v4929_v6 }
 0x242   : > { %4255 = vmatpush3.bf16.msra.mxu0 %v4942_v7 }
 0x243   : > { %4256 = vmatprep.subr.bf16.mxu0 %v4949_v8 }
 0x246   : > { %4257 = vmatpush3.bf16.msra.mxu0 %v4959_v9 }
 0x247   : > { %4258 = vmatprep.subr.bf16.mxu0 %v4972_v12 }
 0x24a   : > { %4259 = vmatpush3.bf16.msra.mxu0 %v4989_v17 }
 0x24b   : > { %4260 = vmatprep.subr.bf16.mxu0 %v4996_v18 }
 0x24e   : > { %4261 = vmatpush3.bf16.msra.mxu0 %v5003_v19 }
 0x24f   : > { %4262 = vmatprep.subr.bf16.mxu0 %v5010_v20 }
 0x252   : > { %4263 = vmatpush3.bf16.msra.mxu0 %v5017_v21  ;;  %v1173_v21 = vld [vmem:[#allocation2 + $0x6c] sm:$0xf] }
 0x255   : > { %1136 = vmatmul.mubr.bf16.vlgmr.msra.gmra.mrb[0].mxu0 %v4578_v0 }
 0x328   : > { %v4264_v1 = vpop.f32.mrb[0].mxu0 }
 0x329   : > { %v4265_v2 = vpop.f32.mrb[1].mxu0 }
 0x32a   : > { %v4266_v3 = vadd.f32 %v4265_v2, %v4264_v1  ;;  %v4267_v4 = vpop.f32.mrb[2].mxu0 }
 0x32b   : > { %v4268_v5 = vpop.f32.mrb[3].mxu0 }
 0x32c   : > { %v1138_v6 = vadd.f32 %v4266_v3, %v5108_v60  ;;  %v4269_v7 = vadd.f32 %v4268_v5, %v4267_v4 }
 0x32e   : > { %v1144_v8 = vmax.f32 %v1138_v6, 0.0  ;;  %v1141_v9 = vadd.f32 %v4269_v7, %v5108_v60 }
 0x330   : > { %v4143_v12 = vpack.c.bf16 %v1144_v8, %v1144_v8  ;;  %v1145_v17 = vmax.f32 %v1141_v9, 0.0 }
 0x332   : > { %v1153_v18 = vshrl.u32 %v4143_v12, 16  ;;  %v4144_v19 = vpack.c.bf16 %v1145_v17, %v1145_v17  ;;  %v1156_v42 = vshll.u32 %v4143_v12, 16 }
 0x334   : > { %v1155_v20 = vrot.slane %v1153_v18, 7  ;;  %v1161_v52 = vshrl.u32 %v4144_v19, 16  ;;  %v1164_v57 = vshll.u32 %v4144_v19, 16 }
 0x336   : > { %v1158_v54 = vor.u32 %v1156_v42, %v1155_v20  ;;  %v1163_v15 = vrot.slane %v1161_v52, 7  ;;  %v1159_v49 = vrot.slane %v1155_v20, 4 }
 0x338   : > { %v1174_v59 = vsel %vm5116_vm7, %v1158_v54, %v1173_v21  ;;  %v1166_v56 = vor.u32 %v1164_v57, %v1163_v15  ;;  %v1168_v28 = vrot.slane %v1163_v15, 4 }
 0x339   : > { %1175 = vst [vmem:[#allocation2 + $0x6c] sm:$0xf] %v1174_v59 }
 0x33a   : > { %v1167_v60 = vsel %vm5128_vm8, %v1159_v49, %v1166_v56  ;;  %v1178_v44 = vsel %vm5088_vm2, %v1168_v28, %v1177_v14 }
 0x33b   : > { %1176 = vst.msk [vmem:[#allocation2 + $0x70] sm:$0xf] %vm853_vm5, %v1167_v60  ;;  %1179 = vst [vmem:[#allocation2 + $0x74] sm:$0x1] %v1178_v44 }
 0x33c PF: > { %p3939_p2 = scmp.ne.s32.totalorder %s4742_s27, 1 }
 0x33d   : > { %v4761_v27 = vmov (!%p3939_p2), 0  }
 0x33e   : > { %1183 = sbr.rel (%p3939_p2) target bundleno = 837 (0x345), region = 64  ;;  %1188 = vst.msk [vmem:[#allocation2 + $0x70] sm:$0xf] (!%p3939_p2), %vm853_vm5, %v4761_v27 }
 0x340   : > { %v1185_v32 = vld [vmem:[#allocation2 + $0x6c] sm:$0xf] (!%p3939_p2) }
 0x341   : > { %v1186_v55 = vsel (!%p3939_p2), %vm5116_vm7, 0, %v1185_v32 }
 0x342   : > { %v1189_v41 = vld [vmem:[#allocation2 + $0x74] sm:$0x1] (!%p3939_p2)  ;;  %1187 = vst [vmem:[#allocation2 + $0x6c] sm:$0xf] (!%p3939_p2), %v1186_v55 }
 0x343   : > { %v1190_v62 = vsel (!%p3939_p2), %vm5088_vm2, 0, %v1189_v41 }
 0x344   : > { %1191 = vst [vmem:[#allocation2 + $0x74] sm:$0x1] (!%p3939_p2), %v1190_v62 }
 0x345 PF: > { %v4581_v13 = vld [vmem:[#allocation2 + $0xc] sm:$0xff]   ;;  %v4582_v43 = vld [vmem:[#allocation2 + $0x18] sm:$0xff]   ;;  %s4762_s22 = smov 64   ;;  %v1265_v63 = vld [vmem:[#allocation2] sm:$0xf]  ;;  %vm1589_vm12 = vcmask 1042432  }
 0x346   : > { %1744 = vrot.lane.b32.xlu0 %v4581_v13, %s4762_s22  ;;  %v1266_v53 = vld [vmem:[#allocation2 + $0x4] sm:$0xf]  ;;  %v1267_v61 = vld [vmem:[#allocation2 + $0x8] sm:$0x1]  ;;  %1746 = vrot.lane.b32.xlu1 %v4582_v43, %s4762_s22  ;;  %vm1289_vm9 = vsmask.f32 3328 }
 0x347   : > { %vm1290_vm10 = vsmask.f32 7440  ;;  %v1293_v37 = vshrl.u32 %v1265_v63, 16  ;;  %v1296_v40 = vshll.u32 %v1265_v63, 16  ;;  %v1302_v58 = vshll.u32 %v1266_v53, 16  ;;  %v4583_v55 = vld [vmem:[#allocation2 + $0x24] sm:$0xff]  }
 0x348   : > { %v1306_v48 = vshrl.u32 %v1266_v53, 16  ;;  %v1312_v25 = vshll.u32 %v1267_v61, 16  ;;  %v1268_v35 = vld [vmem:[#allocation2 + $0xc] sm:$0xf]  ;;  %v1269_v26 = vld [vmem:[#allocation2 + $0x10] sm:$0xf]  ;;  %vm5302_vm11 = vmor %vm1289_vm9, %vm1290_vm10 }
 0x349   : > { %v1295_v47 = vrot.slane %v1293_v37, 4  ;;  %v1298_v34 = vrot.slane %v1296_v40, 5  ;;  %v1270_v36 = vld [vmem:[#allocation2 + $0x14] sm:$0x1]  ;;  %v1304_v45 = vrot.slane %v1302_v58, 5  ;;  %v1317_v24 = vshrl.u32 %v1268_v35, 16 }
 0x34a   : > { %v1308_v29 = vrot.slane %v1306_v48, 4  ;;  %v1314_v16 = vrot.slane %v1312_v25, 5  ;;  %v1320_v51 = vshll.u32 %v1268_v35, 16  ;;  %v1326_v33 = vshll.u32 %v1269_v26, 16  ;;  %v1271_v4 = vld [vmem:[#allocation2 + $0x18] sm:$0xf] }
 0x34b   : > { %v1299_v46 = vor.u32 %v1298_v34, %v1295_v47  ;;  %v1330_v50 = vshrl.u32 %v1269_v26, 16  ;;  %v1319_v2 = vrot.slane %v1317_v24, 4  ;;  %v1336_v3 = vshll.u32 %v1270_v36, 16  ;;  %v1272_v5 = vld [vmem:[#allocation2 + $0x1c] sm:$0xf]  ;;  %v4584_v34 = vld [vmem:[#allocation2 + $0x30] sm:$0xff]  }
 0x34c   : > { %v1309_v1 = vor.u32 %v1308_v29, %v1304_v45  ;;  %v1322_v7 = vrot.slane %v1320_v51, 5  ;;  %v1328_v8 = vrot.slane %v1326_v33, 5  ;;  %v1273_v12 = vld [vmem:[#allocation2 + $0x20] sm:$0x1]  ;;  %v1341_v19 = vshrl.u32 %v1271_v4, 16  ;;  %s4161_s9 = sshll.u32 %s4742_s27, 5 }
 0x34d   : > { %v1300_v6 = vrot.slane %v1299_v46, 4  ;;  %v1332_v9 = vrot.slane %v1330_v50, 4  ;;  %v1338_v18 = vrot.slane %v1336_v3, 5  ;;  %v1344_v20 = vshll.u32 %v1271_v4, 16  ;;  %v1274_v15 = vld [vmem:[#allocation2 + $0x24] sm:$0xf] }
 0x34e   : > { %v1310_v17 = vrot.slane %v1309_v1, 4  ;;  %v1323_v52 = vor.u32 %v1322_v7, %v1319_v2  ;;  %v1350_v54 = vshll.u32 %v1272_v5, 16  ;;  %v1343_v14 = vrot.slane %v1341_v19, 4  ;;  %v1275_v56 = vld [vmem:[#allocation2 + $0x28] sm:$0xf]  ;;  %v4589_v50 = vld [vmem:[%s6038_s3 + $0x40] sm:$0xff]  }
 0x34f   : > { %v1305_v42 = vsel %vm5302_vm11, %v1300_v6, %v1304_v45  ;;  %v1333_v21 = vor.u32 %v1332_v9, %v1328_v8  ;;  %v1346_v49 = vrot.slane %v1344_v20, 5  ;;  %v1354_v59 = vshrl.u32 %v1272_v5, 16  ;;  %v1276_v41 = vld [vmem:[#allocation2 + $0x2c] sm:$0x1]  ;;  %v1277_v40 = vld [vmem:[#allocation2 + $0x30] sm:$0xf]  ;;  %4270 = vmatprep.subr.bf16.mxu0 %v4589_v50 }
 0x350   : > { %v1315_v57 = vsel %vm5302_vm11, %v1310_v17, %v1314_v16  ;;  %v1324_v60 = vrot.slane %v1323_v52, 4  ;;  %v1352_v32 = vrot.slane %v1350_v54, 5  ;;  %v1360_v13 = vshll.u32 %v1273_v12, 16  ;;  %v1278_v47 = vld [vmem:[#allocation2 + $0x34] sm:$0xf]  ;;  %v4590_v6 = vld [vmem:[%s6038_s3] sm:$0xff]  }
 0x351   : > { %v3948_v28 = vcombine.low %v1305_v42, %v1315_v57  ;;  %v1334_v44 = vrot.slane %v1333_v21, 4  ;;  %v1347_v27 = vor.u32 %v1346_v49, %v1343_v14  ;;  %v1356_v62 = vrot.slane %v1354_v59, 4  ;;  %v1279_v16 = vld [vmem:[#allocation2 + $0x38] sm:$0x1]  ;;  %v1280_v5 = vld [vmem:[#allocation2 + $0x3c] sm:$0xf]  ;;  %4271 = vmatpush3.bf16.msra.mxu0 %v4590_v6 }
 0x352   : > { %v1365_v43 = vshrl.u32 %v1274_v15, 16  ;;  %v1329_v63 = vsel %vm5302_vm11, %v1324_v60, %v1328_v8  ;;  %v1368_v61 = vshll.u32 %v1274_v15, 16  ;;  %v1374_v37 = vshll.u32 %v1275_v56, 16  ;;  %v4591_v17 = vld [vmem:[%s6038_s3 + $0x48] sm:$0xff]   ;;  %v4585_v42 = vld [vmem:[#allocation2 + $0x3c] sm:$0xff]   ;;  %v4587_v6 = vld [vmem:[#allocation2 + $0x54] sm:$0xff]  }
 0x353   : > { %1508 = vrot.lane.b32.xlu0 %v3948_v28, %s4762_s22  ;;  %v1339_v53 = vsel %vm5302_vm11, %v1334_v44, %v1338_v18  ;;  %v1348_v48 = vrot.slane %v1347_v27, 4  ;;  %v1357_v25 = vor.u32 %v1356_v62, %v1352_v32  ;;  %v1362_v35 = vrot.slane %v1360_v13, 5  ;;  %v1281_v21 = vld [vmem:[#allocation2 + $0x40] sm:$0xf]  ;;  %4272 = vmatprep.subr.bf16.mxu0 %v4591_v17  ;;  %v1282_v28 = vld [vmem:[#allocation2 + $0x44] sm:$0x1] }
 0x354   : > { %v3949_v58 = vcombine.low %v1329_v63, %v1339_v53  ;;  %v1367_v26 = vrot.slane %v1365_v43, 4  ;;  %v1370_v36 = vrot.slane %v1368_v61, 5  ;;  %v1376_v45 = vrot.slane %v1374_v37, 5  ;;  %v1283_v44 = vld [vmem:[#allocation2 + $0x48] sm:$0xf]  ;;  %v4593_v37 = vld [vmem:[%s6038_s3 + $0x50] sm:$0xff]  }
 0x355   : > { %v1378_v29 = vshrl.u32 %v1275_v56, 16  ;;  %v1353_v24 = vsel %vm5302_vm11, %v1348_v48, %v1352_v32  ;;  %v1358_v46 = vrot.slane %v1357_v25, 4  ;;  %v1384_v51 = vshll.u32 %v1276_v41, 16  ;;  %v1284_v62 = vld [vmem:[#allocation2 + $0x4c] sm:$0xf]  ;;  %v4595_v50 = vld [vmem:[%s6038_s3 + $0x58] sm:$0xff]  }
 0x356   : > { %1510 = vrot.lane.b32.xlu1 %v3949_v58, %s4762_s22  ;;  %v1389_v33 = vshrl.u32 %v1277_v40, 16  ;;  %v1371_v1 = vor.u32 %v1370_v36, %v1367_v26  ;;  %v1392_v3 = vshll.u32 %v1277_v40, 16  ;;  %v1398_v4 = vshll.u32 %v1278_v47, 16  ;;  %v4592_v13 = vld [vmem:[%s6038_s3 + $0x8] sm:$0xff]   ;;  %v5700_v0 = vld [vmem:[%s6038_s3 + $0x100] sm:$0xff]   ;;  %s4116_s10 = sshll.u32 %s4746_s28, 6 }
 0x357   : > { %1748 = vrot.lane.b32.xlu0 %v4583_v55, %s4762_s22  ;;  %v1380_v2 = vrot.slane %v1378_v29, 4  ;;  %v1363_v7 = vsel %vm5302_vm11, %v1358_v46, %v1362_v35  ;;  %v1386_v8 = vrot.slane %v1384_v51, 5  ;;  %v1402_v12 = vshrl.u32 %v1278_v47, 16  ;;  %4273 = vmatpush3.bf16.msra.mxu0 %v4592_v13  ;;  %v4594_v35 = vld [vmem:[%s6038_s3 + $0x10] sm:$0xff]   ;;  %v4598_v13 = vld [vmem:[%s6038_s3 + $0x20] sm:$0xff]   ;;  %s3774_s27 = sadd.s32 %s4161_s9, %s4116_s10  ;;  %s3777_s28 = sshll.u32 %s5227_s21, 4  ;;  %s5972_s28 = int_to_ptr.vmem [resolvable:$true] %s3777_s28 }
 0x358   : > { %v1391_v9 = vrot.slane %v1389_v33, 4  ;;  %v3950_v18 = vcombine.low %v1353_v24, %v1363_v7  ;;  %v1372_v19 = vrot.slane %v1371_v1, 4  ;;  %v1394_v52 = vrot.slane %v1392_v3, 5  ;;  %4274 = vmatprep.subr.bf16.mxu0 %v4593_v37  ;;  %v1286_v33 = vld [vmem:[#allocation2 + $0x54] sm:$0xf]  ;;  %s4117_s20 = sshll.u32 %s3774_s27, 6 }
 0x359   : > { %v1381_v20 = vor.u32 %v1380_v2, %v1376_v45  ;;  %v1400_v54 = vrot.slane %v1398_v4, 5  ;;  %v1404_v15 = vrot.slane %v1402_v12, 4  ;;  %v1408_v57 = vshll.u32 %v1279_v16, 16  ;;  %s5978_s23 = scalar_lea.hbm %s6042_s7, %s4117_s20  ;;  %s6093_s0 = sand.u32 1, %s4734_s25  }
 0x35a   : > { %v1413_v14 = vshrl.u32 %v1280_v5, 16  ;;  %1512 = vrot.lane.b32.xlu1 %v3950_v18, %s4762_s22  ;;  %v1377_v49 = vsel %vm5302_vm11, %v1372_v19, %v1376_v45  ;;  %v1395_v56 = vor.u32 %v1394_v52, %v1391_v9  ;;  %v1416_v60 = vshll.u32 %v1280_v5, 16  ;;  %v1285_v45 = vld [vmem:[#allocation2 + $0x50] sm:$0x1]  ;;  %v1287_v5 = vld [vmem:[#allocation2 + $0x58] sm:$0xf] }
 0x35b   : > { %1750 = vrot.lane.b32.xlu0 %v4584_v34, %s4762_s22  ;;  %v1382_v59 = vrot.slane %v1381_v20, 4  ;;  %v1405_v32 = vor.u32 %v1404_v15, %v1400_v54  ;;  %v1410_v41 = vrot.slane %v1408_v57, 5  ;;  %v1422_v27 = vshll.u32 %v1281_v21, 16  ;;  %v4586_v34 = vld [vmem:[#allocation2 + $0x48] sm:$0xff]   ;;  %4275 = vmatpush3.bf16.msra.mxu0 %v4594_v35  ;;  %v1288_v19 = vld [vmem:[#allocation2 + $0x5c] sm:$0x1] }
 0x35c   : > { %v1415_v55 = vrot.slane %v1413_v14, 4  ;;  %v1396_v63 = vrot.slane %v1395_v56, 4  ;;  %v1418_v53 = vrot.slane %v1416_v60, 5  ;;  %v1426_v61 = vshrl.u32 %v1281_v21, 16  ;;  %4276 = vmatprep.subr.bf16.mxu0 %v4595_v50  ;;  %v4596_v52 = vld [vmem:[%s6038_s3 + $0x18] sm:$0xff]   ;;  %v4600_v50 = vld [vmem:[%s6038_s3 + $0x28] sm:$0xff]  }
 0x35d   : > { %v1387_v43 = vsel %vm5302_vm11, %v1382_v59, %v1386_v8  ;;  %v1406_v58 = vrot.slane %v1405_v32, 4  ;;  %v1424_v48 = vrot.slane %v1422_v27, 5  ;;  %v1432_v25 = vshll.u32 %v1282_v28, 16  ;;  %v2265_v14 = vld [vmem:[#allocation2 + $0x18] sm:$0xf]  ;;  %v4588_v27 = vld [vmem:[#allocation2 + $0x60] sm:$0xff]  }
 0x35e   : > { %v3951_v40 = vcombine.low %v1377_v49, %v1387_v43  ;;  %v1401_v47 = vsel %vm5302_vm11, %v1396_v63, %v1400_v54  ;;  %v1419_v26 = vor.u32 %v1418_v53, %v1415_v55  ;;  %v1428_v36 = vrot.slane %v1426_v61, 4  ;;  %v4597_v49 = vld [vmem:[%s6038_s3 + $0x60] sm:$0xff]   ;;  %s4664_s13 = scalar_lea.vmem %s5972_s28, 2048  ;;  %s4764_s16 = smov [#allocation4]  }
 0x35f   : > { %1752 = vrot.lane.b32.xlu0 %v4585_v42, %s4762_s22  ;;  %v1437_v29 = vshrl.u32 %v1283_v44, 16  ;;  %v1411_v16 = vsel %vm5302_vm11, %v1406_v58, %v1410_v41  ;;  %v1434_v24 = vrot.slane %v1432_v25, 5  ;;  %v1440_v46 = vshll.u32 %v1283_v44, 16  ;;  %v2266_v44 = vld [vmem:[#allocation2 + $0x1c] sm:$0xf]  ;;  %4277 = vmatpush3.bf16.msra.mxu0 %v4596_v52  ;;  %p4665_p4 = scmp.ne.s32.totalorder %s5972_s28, %s4664_s13  ;;  %s4668_s9 = sshll.u32 %s4764_s16, 4  ;;  %s4669_s9 = int_to_ptr.vmem [resolvable:$false] %s4668_s9 }
 0x360   : > { %1514 = vrot.lane.b32.xlu1 %v3951_v40, %s4762_s22  ;;  %v1446_v51 = vshll.u32 %v1284_v62, 16  ;;  %v3952_v1 = vcombine.low %v1401_v47, %v1411_v16  ;;  %v1420_v2 = vrot.slane %v1419_v26, 4  ;;  %v1429_v3 = vor.u32 %v1428_v36, %v1424_v48  ;;  %v2267_v61 = vld [vmem:[#allocation2 + $0x20] sm:$0x1]  ;;  %4278 = vmatprep.subr.bf16.mxu0 %v4597_v49  ;;  %v4599_v40 = vld [vmem:[%s6038_s3 + $0x68] sm:$0xff]   ;;  %v4603_v49 = vld [vmem:[%s6038_s3 + $0x30] sm:$0xff]   ;;  %p4671_p7 = scmp.lt.s32.totalorder %s5972_s28, %s4669_s9 }
 0x361   : > { %v1439_v4 = vrot.slane %v1437_v29, 4  ;;  %v1442_v7 = vrot.slane %v1440_v46, 5  ;;  %v1450_v9 = vshrl.u32 %v1284_v62, 16  ;;  %v1456_v12 = vshll.u32 %v1285_v45, 16  ;;  %v2032_v47 = vld [vmem:[#allocation2 + $0xc] sm:$0xe]  ;;  %p4666_p5 = pnand %p4665_p4, %p4858_p3 }
 0x362   : > { %v1448_v8 = vrot.slane %v1446_v51, 5  ;;  %v1425_v17 = vsel %vm5302_vm11, %v1420_v2, %v1424_v48  ;;  %v1430_v18 = vrot.slane %v1429_v3, 4  ;;  %v1461_v20 = vshrl.u32 %v1286_v33, 16  ;;  %v2033_v29 = vld [vmem:[#allocation2 + $0x10] sm:$0xf]  ;;  %s4670_s10 = scalar_lea.vmem %s4669_s9, 4096 }
 0x363   : > { %1754 = vrot.lane.b32.xlu0 %v4586_v34, %s4762_s22  ;;  %v1464_v42 = vshll.u32 %v1286_v33, 16  ;;  %v1443_v21 = vor.u32 %v1442_v7, %v1439_v4  ;;  %v1452_v54 = vrot.slane %v1450_v9, 4  ;;  %v1458_v15 = vrot.slane %v1456_v12, 5  ;;  %v2034_v33 = vld [vmem:[#allocation2 + $0x14] sm:$0x1]  ;;  %4279 = vmatpush3.bf16.msra.mxu0 %v4598_v13  ;;  %p4667_p6 = pneg %p4666_p5  ;;  %p4672_p9 = scmp.lt.s32.totalorder %s4670_s10, %s4664_s13 }
 0x364   : > { %1516 = vrot.lane.b32.xlu1 %v3952_v1, %s4762_s22  ;;  %v1470_v57 = vshll.u32 %v1287_v5, 16  ;;  %v1435_v59 = vsel %vm5302_vm11, %v1430_v18, %v1434_v24  ;;  %v1463_v56 = vrot.slane %v1461_v20, 4  ;;  %v1474_v60 = vshrl.u32 %v1287_v5, 16  ;;  %v2268_v5 = vld [vmem:[#allocation2 + $0x24] sm:$0xf]  ;;  %4280 = vmatprep.subr.bf16.mxu0 %v4599_v40 }
 0x365   : > { %v1466_v28 = vrot.slane %v1464_v42, 5  ;;  %v3953_v32 = vcombine.low %v1425_v17, %v1435_v59  ;;  %v1444_v41 = vrot.slane %v1443_v21, 4  ;;  %v1453_v55 = vor.u32 %v1452_v54, %v1448_v8  ;;  %v2269_v12 = vld [vmem:[#allocation2 + $0x28] sm:$0xf]  ;;  %v2270_v52 = vld [vmem:[#allocation2 + $0x2c] sm:$0x1]  ;;  %p4673_p10 = por %p4672_p9, %p4671_p7 }
 0x366   : > { %v1472_v62 = vrot.slane %v1470_v57, 5  ;;  %v1476_v63 = vrot.slane %v1474_v60, 4  ;;  %v1480_v53 = vshll.u32 %v1288_v19, 16  ;;  %v2290_v37 = vshrl.u32 %v2265_v14, 16  ;;  %v2037_v13 = vld [vmem:[#allocation2 + $0x20] sm:$0x1] }
 0x367   : > { %1756 = vrot.lane.b32.xlu0 %v4587_v6, %s4762_s22  ;;  %v1467_v43 = vor.u32 %v1466_v28, %v1463_v56  ;;  %v1449_v58 = vsel %vm5302_vm11, %v1444_v41, %v1448_v8  ;;  %v1454_v48 = vrot.slane %v1453_v55, 4  ;;  %v2293_v25 = vshll.u32 %v2265_v14, 16  ;;  %v4601_v6 = vld [vmem:[%s6038_s3 + $0x70] sm:$0xff]   ;;  %v2035_v14 = vld [vmem:[#allocation2 + $0x18] sm:$0xe]  ;;  %4281 = vmatpush3.bf16.msra.mxu0 %v4600_v50  ;;  %p4674_p11 = pnand %p4673_p10, %p4667_p6 }
 0x368   : > { %1518 = vrot.lane.b32.xlu1 %v3953_v32, %s4762_s22  ;;  %v2299_v35 = vshll.u32 %v2266_v44, 16  ;;  %v1477_v26 = vor.u32 %v1476_v63, %v1472_v62  ;;  %v1482_v36 = vrot.slane %v1480_v53, 5  ;;  %v2292_v45 = vrot.slane %v2290_v37, 4  ;;  %4282 = vmatprep.subr.bf16.mxu0 %v4601_v6  ;;  %v4605_v32 = vld [vmem:[%s6038_s3 + $0x78] sm:$0xff]   ;;  %v2271_v37 = vld [vmem:[#allocation2 + $0x30] sm:$0xf] }
 0x369   : > { %v1468_v34 = vrot.slane %v1467_v43, 4  ;;  %v1459_v16 = vsel %vm5302_vm11, %v1454_v48, %v1458_v15  ;;  %v2295_v24 = vrot.slane %v2293_v25, 5  ;;  %v2303_v51 = vshrl.u32 %v2266_v44, 16  ;;  %v2036_v44 = vld [vmem:[#allocation2 + $0x1c] sm:$0xf] }
 0x36a   : > { %v2301_v46 = vrot.slane %v2299_v35, 5  ;;  %v3954_v1 = vcombine.low %v1449_v58, %v1459_v16  ;;  %v1478_v3 = vrot.slane %v1477_v26, 4  ;;  %v2309_v4 = vshll.u32 %v2267_v61, 16  ;;  %v2272_v35 = vld [vmem:[#allocation2 + $0x34] sm:$0xf] }
 0x36b   : > { %1758 = vrot.lane.b32.xlu0 %v4588_v27, %s4762_s22  ;;  %v1473_v2 = vsel %vm5302_vm11, %v1468_v34, %v1472_v62  ;;  %v2296_v7 = vor.u32 %v2295_v24, %v2292_v45  ;;  %v2305_v8 = vrot.slane %v2303_v51, 4  ;;  %vm1590_vm13 = vcmask 1046532   ;;  %4283 = vmatpush3.bf16.msra.mxu0 %v4603_v49  ;;  %v2273_v24 = vld [vmem:[#allocation2 + $0x38] sm:$0x1]  ;;  %v4610_v49 = vld [vmem:[%s6038_s3 + $0x80] sm:$0xff]  }
 0x36c   : > { %v3988_v9 = vrot.slane %v2032_v47, 9  ;;  %1520 = vrot.lane.b32.xlu1 %v3954_v1, %s4762_s22  ;;  %v1483_v17 = vsel %vm5302_vm11, %v1478_v3, %v1482_v36  ;;  %v2311_v18 = vrot.slane %v2309_v4, 5  ;;  %vm5391_vm14 = vmor %vm1589_vm12, %vm1590_vm13  ;;  %v2082_v20 = vrot.slane %v2033_v29, 5  ;;  %v4606_v47 = vld [vmem:[%s6038_s3 + $0x38] sm:$0xff]   ;;  %4284 = vmatprep.subr.bf16.mxu0 %v4605_v32  ;;  %v2038_v4 = vld [vmem:[#allocation2 + $0x24] sm:$0xe] }
 0x36d   : > { %v2085_v42 = vrot.slane %v2034_v33, 5  ;;  %v3955_v21 = vcombine.low %v1473_v2, %v1483_v17  ;;  %v2297_v54 = vrot.slane %v2296_v7, 4  ;;  %v2306_v15 = vor.u32 %v2305_v8, %v2301_v46  ;;  %v4608_v33 = vld [vmem:[%s6038_s3 + $0xc0] sm:$0xff]  }
 0x36e   : > { %v2314_v57 = vshrl.u32 %v2268_v5, 16  ;;  %v2083_v59 = vsel %vm5391_vm14, %v3988_v9, %v2082_v20  ;;  %v2084_v56 = vrot.slane %v2082_v20, 4  ;;  %v2317_v28 = vshll.u32 %v2268_v5, 16  ;;  %v2039_v9 = vld [vmem:[#allocation2 + $0x28] sm:$0xf]  ;;  %4450 = vmatprep.subr.bf16.mxu1 %v4608_v33 }
 0x36f   : > { %v2323_v60 = vshll.u32 %v2269_v12, 16  ;;  %v2302_v41 = vsel %vm5302_vm11, %v2297_v54, %v2301_v46  ;;  %v2307_v55 = vrot.slane %v2306_v15, 4  ;;  %v2327_v62 = vshrl.u32 %v2269_v12, 16  ;;  %4285 = vmatpush3.bf16.msra.mxu0 %v4606_v47  ;;  %4458 = vmatpush3.bf16.msra.mxu1 %v4610_v49  ;;  %v4614_v47 = vld [vmem:[%s6038_s3 + $0x88] sm:$0xff]  }
 0x370   : > { %v2316_v27 = vrot.slane %v2314_v57, 4  ;;  %1522 = vrot.lane.b32.xlu1 %v3955_v21, %s4762_s22  ;;  %v2086_v43 = vsel %vm5391_vm14, %v2084_v56, %v2085_v42  ;;  %v2319_v63 = vrot.slane %v2317_v28, 5  ;;  %v2333_v61 = vshll.u32 %v2270_v52, 16  ;;  %v2040_v42 = vld [vmem:[#allocation2 + $0x2c] sm:$0x1]  ;;  %4334 = vmatprep.subr.bf16.mxu0 %v4608_v33 }
 0x371   : > { %v2325_v53 = vrot.slane %v2323_v60, 5  ;;  %v2312_v40 = vsel %vm5302_vm11, %v2307_v55, %v2311_v18  ;;  %v3996_v58 = vcombine.low %v2083_v59, %v2086_v43  ;;  %v2329_v48 = vrot.slane %v2327_v62, 4  ;;  %v2274_v52 = vld [vmem:[#allocation2 + $0x3c] sm:$0xf]  ;;  %v2041_v62 = vld [vmem:[#allocation2 + $0x30] sm:$0xe] }
 0x372   : > { %v3989_v25 = vrot.slane %v2035_v14, 9  ;;  %v4012_v34 = vcombine.low %v2302_v41, %v2312_v40  ;;  %v2320_v26 = vor.u32 %v2319_v63, %v2316_v27  ;;  %v2335_v36 = vrot.slane %v2333_v61, 5  ;;  %v2275_v14 = vld [vmem:[#allocation2 + $0x40] sm:$0xf]  ;;  %v2278_v33 = vld [vmem:[#allocation2 + $0x4c] sm:$0xf] }
 0x373   : > { %v2089_v45 = vrot.slane %v2036_v44, 5  ;;  %v2330_v29 = vor.u32 %v2329_v48, %v2325_v53  ;;  %v2092_v16 = vrot.slane %v2037_v13, 5  ;;  %v2338_v46 = vshrl.u32 %v2271_v37, 16  ;;  %v2276_v44 = vld [vmem:[#allocation2 + $0x44] sm:$0x1]  ;;  %v4612_v13 = vld [vmem:[%s6038_s3 + $0xc8] sm:$0xff]  }
 0x374   : > { %v2341_v51 = vshll.u32 %v2271_v37, 16  ;;  %2505 = vrot.lane.b32.xlu0 %v4012_v34, %s4762_s22  ;;  %2160 = vrot.lane.b32.xlu1 %v3996_v58, %s4762_s22  ;;  %v2321_v50 = vrot.slane %v2320_v26, 4  ;;  %v2347_v3 = vshll.u32 %v2272_v35, 16  ;;  %v2351_v8 = vshrl.u32 %v2272_v35, 16  ;;  %v2042_v37 = vld [vmem:[#allocation2 + $0x34] sm:$0xf] }
 0x375   : > { %v2090_v1 = vsel %vm5391_vm14, %v3989_v25, %v2089_v45  ;;  %v2091_v2 = vrot.slane %v2089_v45, 4  ;;  %v2331_v5 = vrot.slane %v2330_v29, 4  ;;  %v2340_v6 = vrot.slane %v2338_v46, 4  ;;  %v2043_v35 = vld [vmem:[#allocation2 + $0x38] sm:$0x1]  ;;  %4451 = vmatprep.subr.bf16.mxu1 %v4612_v13 }
 0x376   : > { %v2343_v7 = vrot.slane %v2341_v51, 5  ;;  %v2326_v12 = vsel %vm5302_vm11, %v2321_v50, %v2325_v53  ;;  %v2349_v18 = vrot.slane %v2347_v3, 5  ;;  %v2357_v20 = vshll.u32 %v2273_v24, 16  ;;  %v2277_v29 = vld [vmem:[#allocation2 + $0x48] sm:$0xf]  ;;  %4459 = vmatpush3.bf16.msra.mxu1 %v4614_v47 }
 0x377   : > { %v2093_v17 = vsel %vm5391_vm14, %v2091_v2, %v2092_v16  ;;  %v2336_v21 = vsel %vm5302_vm11, %v2331_v5, %v2335_v36  ;;  %v2353_v57 = vrot.slane %v2351_v8, 4  ;;  %v3990_v28 = vrot.slane %v2038_v4, 9  ;;  %v2282_v13 = vld [vmem:[#allocation2 + $0x5c] sm:$0x1]  ;;  %v2048_v47 = vld [vmem:[#allocation2 + $0x4c] sm:$0xf] }
 0x378   : > { %v3997_v54 = vcombine.low %v2090_v1, %v2093_v17  ;;  %v2344_v15 = vor.u32 %v2343_v7, %v2340_v6  ;;  %v4013_v59 = vcombine.low %v2326_v12, %v2336_v21  ;;  %v2359_v56 = vrot.slane %v2357_v20, 5  ;;  %v2279_v6 = vld [vmem:[#allocation2 + $0x50] sm:$0x1] }
 0x379   : > { %v2096_v60 = vrot.slane %v2039_v9, 5  ;;  %v2354_v41 = vor.u32 %v2353_v57, %v2349_v18  ;;  %v2099_v55 = vrot.slane %v2040_v42, 5  ;;  %v2362_v27 = vshrl.u32 %v2274_v52, 16  ;;  %v4616_v9 = vld [vmem:[%s6038_s3 + $0xd0] sm:$0xff]   ;;  %v2044_v42 = vld [vmem:[#allocation2 + $0x3c] sm:$0xe] }
 0x37a   : > { %2162 = vrot.lane.b32.xlu1 %v3997_v54, %s4762_s22  ;;  %v2345_v32 = vrot.slane %v2344_v15, 4  ;;  %2507 = vrot.lane.b32.xlu0 %v4013_v59, %s4762_s22  ;;  %v2365_v53 = vshll.u32 %v2274_v52, 16  ;;  %v2371_v61 = vshll.u32 %v2275_v14, 16  ;;  %v2375_v25 = vshrl.u32 %v2275_v14, 16  ;;  %v4617_v52 = vld [vmem:[%s6038_s3 + $0x90] sm:$0xff]  }
 0x37b   : > { %v2097_v43 = vsel %vm5391_vm14, %v3990_v28, %v2096_v60  ;;  %v2098_v63 = vrot.slane %v2096_v60, 4  ;;  %v2355_v58 = vrot.slane %v2354_v41, 4  ;;  %v2364_v48 = vrot.slane %v2362_v27, 4  ;;  %v2045_v14 = vld [vmem:[#allocation2 + $0x40] sm:$0xf]  ;;  %4452 = vmatprep.subr.bf16.mxu1 %v4616_v9 }
 0x37c   : > { %v2350_v40 = vsel %vm5302_vm11, %v2345_v32, %v2349_v18  ;;  %v2367_v26 = vrot.slane %v2365_v53, 5  ;;  %v2373_v36 = vrot.slane %v2371_v61, 5  ;;  %v2381_v45 = vshll.u32 %v2276_v44, 16  ;;  %v2046_v60 = vld [vmem:[#allocation2 + $0x44] sm:$0x1]  ;;  %4460 = vmatpush3.bf16.msra.mxu1 %v4617_v52 }
 0x37d   : > { %v2100_v34 = vsel %vm5391_vm14, %v2098_v63, %v2099_v55  ;;  %v2360_v16 = vsel %vm5302_vm11, %v2355_v58, %v2359_v56  ;;  %v2377_v46 = vrot.slane %v2375_v25, 4  ;;  %v3991_v51 = vrot.slane %v2041_v62, 9  ;;  %v2280_v44 = vld [vmem:[#allocation2 + $0x54] sm:$0xf]  ;;  %v2281_v62 = vld [vmem:[#allocation2 + $0x58] sm:$0xf] }
 0x37e   : > { %v3998_v24 = vcombine.low %v2097_v43, %v2100_v34  ;;  %v4014_v50 = vcombine.low %v2350_v40, %v2360_v16  ;;  %v2368_v1 = vor.u32 %v2367_v26, %v2364_v48  ;;  %v2383_v2 = vrot.slane %v2381_v45, 5  ;;  %v4619_v40 = vld [vmem:[%s6038_s3 + $0xd8] sm:$0xff]   ;;  %v2049_v16 = vld [vmem:[#allocation2 + $0x50] sm:$0x1] }
 0x37f   : > { %v2103_v3 = vrot.slane %v2042_v37, 5  ;;  %v2378_v4 = vor.u32 %v2377_v46, %v2373_v36  ;;  %v2106_v5 = vrot.slane %v2043_v35, 5  ;;  %v2386_v7 = vshrl.u32 %v2277_v29, 16  ;;  %v2047_v37 = vld [vmem:[#allocation2 + $0x48] sm:$0xe]  ;;  %v4620_v34 = vld [vmem:[%s6038_s3 + $0x98] sm:$0xff]   ;;  %4453 = vmatprep.subr.bf16.mxu1 %v4619_v40 }
 0x380   : > { %2164 = vrot.lane.b32.xlu1 %v3998_v24, %s4762_s22  ;;  %v2389_v8 = vshll.u32 %v2277_v29, 16  ;;  %2509 = vrot.lane.b32.xlu0 %v4014_v50, %s4762_s22  ;;  %v2369_v12 = vrot.slane %v2368_v1, 4  ;;  %v2395_v20 = vshll.u32 %v2278_v33, 16  ;;  %v2399_v57 = vshrl.u32 %v2278_v33, 16  ;;  %v2283_v24 = vld [vmem:[#allocation2 + $0x60] sm:$0xf] }
 0x381   : > { %v2104_v17 = vsel %vm5391_vm14, %v3991_v51, %v2103_v3  ;;  %v2105_v18 = vrot.slane %v2103_v3, 4  ;;  %v2379_v21 = vrot.slane %v2378_v4, 4  ;;  %v2388_v54 = vrot.slane %v2386_v7, 4  ;;  %v2284_v1 = vld [vmem:[#allocation2 + $0x64] sm:$0xf]  ;;  %4461 = vmatpush3.bf16.msra.mxu1 %v4620_v34  ;;  %v5502_v34 = vld [vmem:[%s6038_s3 + $0xa8] sm:$0xff]  }
 0x382   : > { %v2391_v15 = vrot.slane %v2389_v8, 5  ;;  %v2374_v49 = vsel %vm5302_vm11, %v2369_v12, %v2373_v36  ;;  %v2397_v56 = vrot.slane %v2395_v20, 5  ;;  %v2405_v28 = vshll.u32 %v2279_v6, 16  ;;  %v4623_v7 = vld [vmem:[%s6038_s3 + $0xa0] sm:$0xff]  }
 0x383   : > { %v2107_v59 = vsel %vm5391_vm14, %v2105_v18, %v2106_v5  ;;  %v2384_v32 = vsel %vm5302_vm11, %v2379_v21, %v2383_v2  ;;  %v2401_v27 = vrot.slane %v2399_v57, 4  ;;  %v3992_v53 = vrot.slane %v2044_v42, 9  ;;  %v4622_v2 = vld [vmem:[%s6038_s3 + $0xe0] sm:$0xff]   ;;  %v2285_v18 = vld [vmem:[#allocation2 + $0x68] sm:$0x1] }
 0x384   : > { %v3999_v41 = vcombine.low %v2104_v17, %v2107_v59  ;;  %v2392_v55 = vor.u32 %v2391_v15, %v2388_v54  ;;  %v4015_v43 = vcombine.low %v2374_v49, %v2384_v32  ;;  %v2407_v63 = vrot.slane %v2405_v28, 5  ;;  %4454 = vmatprep.subr.bf16.mxu1 %v4622_v2  ;;  %v2050_v49 = vld [vmem:[#allocation2 + $0x54] sm:$0xe]  ;;  %v2051_v59 = vld [vmem:[#allocation2 + $0x58] sm:$0xf] }
 0x385   : > { %v2110_v61 = vrot.slane %v2045_v14, 5  ;;  %v2402_v48 = vor.u32 %v2401_v27, %v2397_v56  ;;  %v2113_v25 = vrot.slane %v2046_v60, 5  ;;  %v2410_v35 = vshrl.u32 %v2280_v44, 16  ;;  %4462 = vmatpush3.bf16.msra.mxu1 %v4623_v7  ;;  %v2052_v32 = vld [vmem:[#allocation2 + $0x5c] sm:$0x1]  ;;  %v5517_v7 = vld [vmem:[%s6038_s3 + $0xb0] sm:$0xff]  }
 0x386   : > { %2166 = vrot.lane.b32.xlu1 %v3999_v41, %s4762_s22  ;;  %v2393_v58 = vrot.slane %v2392_v55, 4  ;;  %2511 = vrot.lane.b32.xlu0 %v4015_v43, %s4762_s22  ;;  %v2413_v45 = vshll.u32 %v2280_v44, 16  ;;  %v2419_v29 = vshll.u32 %v2281_v62, 16  ;;  %v2423_v50 = vshrl.u32 %v2281_v62, 16  ;;  %v2286_v41 = vld [vmem:[#allocation2 + $0x6c] sm:$0xf] }
 0x387   : > { %v2111_v26 = vsel %vm5391_vm14, %v3992_v53, %v2110_v61  ;;  %v2112_v36 = vrot.slane %v2110_v61, 4  ;;  %v2403_v51 = vrot.slane %v2402_v48, 4  ;;  %v2412_v33 = vrot.slane %v2410_v35, 4  ;;  %v5490_v55 = vld [vmem:[%s6038_s3 + $0xe8] sm:$0xff]  }
 0x388   : > { %v2398_v46 = vsel %vm5302_vm11, %v2393_v58, %v2397_v56  ;;  %v2415_v4 = vrot.slane %v2413_v45, 5  ;;  %v2421_v5 = vrot.slane %v2419_v29, 5  ;;  %v2429_v6 = vshll.u32 %v2282_v13, 16  ;;  %4455 = vmatprep.subr.bf16.mxu1 %v5490_v55 }
 0x389   : > { %v2114_v3 = vsel %vm5391_vm14, %v2112_v36, %v2113_v25  ;;  %v2408_v8 = vsel %vm5302_vm11, %v2403_v51, %v2407_v63  ;;  %v2425_v12 = vrot.slane %v2423_v50, 4  ;;  %v3993_v17 = vrot.slane %v2047_v37, 9  ;;  %v2287_v63 = vld [vmem:[#allocation2 + $0x70] sm:$0xf]  ;;  %v2054_v50 = vld [vmem:[#allocation2 + $0x64] sm:$0xf]  ;;  %4463 = vmatpush3.bf16.msra.mxu1 %v5502_v34 }
 0x38a   : > { %v4000_v9 = vcombine.low %v2111_v26, %v2114_v3  ;;  %v4016_v20 = vcombine.low %v2398_v46, %v2408_v8  ;;  %v2416_v42 = vor.u32 %v2415_v4, %v2412_v33  ;;  %v2431_v52 = vrot.slane %v2429_v6, 5  ;;  %v2055_v6 = vld [vmem:[#allocation2 + $0x68] sm:$0x1] }
 0x38b   : > { %v2117_v21 = vrot.slane %v2048_v47, 5  ;;  %v2426_v54 = vor.u32 %v2425_v12, %v2421_v5  ;;  %v2120_v15 = vrot.slane %v2049_v16, 5  ;;  %v2434_v57 = vshrl.u32 %v2283_v24, 16  ;;  %v2288_v47 = vld [vmem:[#allocation2 + $0x74] sm:$0x1] }
 0x38c   : > { %2168 = vrot.lane.b32.xlu1 %v4000_v9, %s4762_s22  ;;  %v2437_v14 = vshll.u32 %v2283_v24, 16  ;;  %2513 = vrot.lane.b32.xlu0 %v4016_v20, %s4762_s22  ;;  %v2417_v56 = vrot.slane %v2416_v42, 4  ;;  %v2443_v44 = vshll.u32 %v2284_v1, 16  ;;  %v2447_v43 = vshrl.u32 %v2284_v1, 16  ;;  %v2053_v16 = vld [vmem:[#allocation2 + $0x60] sm:$0xe] }
 0x38d   : > { %v2118_v28 = vsel %vm5391_vm14, %v3993_v17, %v2117_v21  ;;  %v2119_v60 = vrot.slane %v2117_v21, 4  ;;  %v2427_v27 = vrot.slane %v2426_v54, 4  ;;  %v2436_v62 = vrot.slane %v2434_v57, 4  ;;  %v5509_v1 = vld [vmem:[%s6038_s3 + $0xf0] sm:$0xff]   ;;  %v4602_v54 = vld [vmem:[#allocation2] sm:$0xff]   ;;  %v4607_v57 = vld [vmem:[#allocation2 + $0x18] sm:$0xff]  }
 0x38e   : > { %v2439_v13 = vrot.slane %v2437_v14, 5  ;;  %v2422_v53 = vsel %vm5302_vm11, %v2417_v56, %v2421_v5  ;;  %v2445_v37 = vrot.slane %v2443_v44, 5  ;;  %v2453_v40 = vshll.u32 %v2285_v18, 16  ;;  %4456 = vmatprep.subr.bf16.mxu1 %v5509_v1  ;;  %v4630_v18 = vld [vmem:[%s6038_s3 + $0xf8] sm:$0xff]   ;;  %v4609_v14 = vld [vmem:[#allocation2 + $0x24] sm:$0xff]  }
 0x38f   : > { %v2121_v61 = vsel %vm5391_vm14, %v2119_v60, %v2120_v15  ;;  %v2432_v58 = vsel %vm5302_vm11, %v2427_v27, %v2431_v52  ;;  %v2449_v35 = vrot.slane %v2447_v43, 4  ;;  %v3994_v45 = vrot.slane %v2050_v49, 9  ;;  %v4604_v15 = vld [vmem:[#allocation2 + $0xc] sm:$0xff]   ;;  %v4621_v60 = vld [vmem:[#allocation2 + $0x18] sm:$0xff]   ;;  %v4624_v44 = vld [vmem:[#allocation2 + $0x24] sm:$0xff]   ;;  %4464 = vmatpush3.bf16.msra.mxu1 %v5517_v7 }
 0x390   : > { %v4001_v48 = vcombine.low %v2118_v28, %v2121_v61  ;;  %v2440_v25 = vor.u32 %v2439_v13, %v2436_v62  ;;  %v4017_v26 = vcombine.low %v2422_v53, %v2432_v58  ;;  %v2455_v36 = vrot.slane %v2453_v40, 5  ;;  %v4611_v49 = vld [vmem:[#allocation2 + $0x30] sm:$0xff]   ;;  %v4615_v56 = vld [vmem:[#allocation2 + $0x48] sm:$0xff]   ;;  %v1541_v43 = vld [vmem:[#allocation2] sm:$0xe]  ;;  %4457 = vmatprep.subr.bf16.mxu1 %v4630_v18 }
 0x391   : > { %v2124_v29 = vrot.slane %v2051_v59, 5  ;;  %v2450_v46 = vor.u32 %v2449_v35, %v2445_v37  ;;  %v2127_v51 = vrot.slane %v2052_v32, 5  ;;  %v2458_v33 = vshrl.u32 %v2286_v41, 16  ;;  %v4613_v59 = vld [vmem:[#allocation2 + $0x3c] sm:$0xff]   ;;  %v4618_v28 = vld [vmem:[#allocation2 + $0x54] sm:$0xff]  }
 0x392   : > { %2170 = vrot.lane.b32.xlu1 %v4001_v48, %s4762_s22  ;;  %v2441_v24 = vrot.slane %v2440_v25, 4  ;;  %2515 = vrot.lane.b32.xlu0 %v4017_v26, %s4762_s22  ;;  %v2461_v4 = vshll.u32 %v2286_v41, 16  ;;  %v2467_v5 = vshll.u32 %v2287_v63, 16  ;;  %v2471_v17 = vshrl.u32 %v2287_v63, 16  ;;  %v4631_v32 = vld [vmem:[%s6038_s3 + $0xb8] sm:$0xff]   ;;  %v4627_v58 = vld [vmem:[#allocation2 + $0x30] sm:$0xff]  }
 0x393   : > { %v2125_v2 = vsel %vm5391_vm14, %v3994_v45, %v2124_v29  ;;  %v2126_v3 = vrot.slane %v2124_v29, 4  ;;  %v2451_v9 = vrot.slane %v2450_v46, 4  ;;  %v2460_v12 = vrot.slane %v2458_v33, 4  ;;  %v1543_v40 = vld [vmem:[#allocation2 + $0x8] sm:$0x1]  ;;  %v4632_v26 = vld [vmem:[#allocation2 + $0x3c] sm:$0xff]   ;;  %4465 = vmatpush3.bf16.msra.mxu1 %v4631_v32 }
 0x394   : > { %v2446_v8 = vsel %vm5302_vm11, %v2441_v24, %v2445_v37  ;;  %v2463_v42 = vrot.slane %v2461_v4, 5  ;;  %v5527_v52 = vrot.slane %v2467_v5, 5  ;;  %v2477_v21 = vshll.u32 %v2288_v47, 16  ;;  %v1542_v37 = vld [vmem:[#allocation2 + $0x4] sm:$0xf]  ;;  %v4633_v24 = vld [vmem:[#allocation2 + $0x48] sm:$0xff]  }
 0x395   : > { %v2128_v20 = vsel %vm5391_vm14, %v2126_v3, %v2127_v51  ;;  %v2456_v41 = vsel %vm5302_vm11, %v2451_v9, %v2455_v36  ;;  %v2473_v62 = vrot.slane %v2471_v17, 4  ;;  %v3995_v13 = vrot.slane %v2053_v16, 9  ;;  %v1544_v33 = vld [vmem:[#allocation2 + $0xc] sm:$0xe]  ;;  %v4635_v9 = vld [vmem:[#allocation2 + $0x60] sm:$0xff]  }
 0x396   : > { %v4002_v27 = vcombine.low %v2125_v2, %v2128_v20  ;;  %v4018_v63 = vcombine.low %v2446_v8, %v2456_v41  ;;  %v2464_v53 = vor.u32 %v2463_v42, %v2460_v12  ;;  %v2131_v61 = vrot.slane %v2054_v50, 5  ;;  %v4634_v50 = vld [vmem:[#allocation2 + $0x54] sm:$0xff]  }
 0x397   : > { %v2474_v48 = vor.u32 %v2473_v62, %v5527_v52  ;;  %v2479_v25 = vrot.slane %v2477_v21, 5  ;;  %v2134_v35 = vrot.slane %v2055_v6, 5  ;;  %v3956_v47 = vrot.slane %v1541_v43, 9  ;;  %v1545_v6 = vld [vmem:[#allocation2 + $0x10] sm:$0xf] }
 0x398   : > { %2172 = vrot.lane.b32.xlu1 %v4002_v27, %s4762_s22  ;;  %2517 = vrot.lane.b32.xlu0 %v4018_v63, %s4762_s22  ;;  %v2465_v36 = vrot.slane %v2464_v53, 4  ;;  %v2132_v45 = vsel %vm5391_vm14, %v3995_v13, %v2131_v61  ;;  %v2133_v29 = vrot.slane %v2131_v61, 4  ;;  %v1594_v16 = vrot.slane %v1542_v37, 5  ;;  %v1546_v8 = vld [vmem:[#allocation2 + $0x14] sm:$0x1] }
 0x399   : > { %v2475_v46 = vrot.slane %v2474_v48, 4  ;;  %v1597_v51 = vrot.slane %v1543_v40, 5  ;;  %vm1256_vm15 = vcmask 523264   ;;  %v3957_v18 = vrot.slane %v1544_v33, 9  ;;  %v1550_v13 = vld [vmem:[#allocation2 + $0x24] sm:$0xe] }
 0x39a   : > { %v2470_v2 = vsel %vm5302_vm11, %v2465_v36, %v5527_v52  ;;  %v2135_v3 = vsel %vm5391_vm14, %v2133_v29, %v2134_v35  ;;  %v1595_v4 = vsel %vm5391_vm14, %v3956_v47, %v1594_v16  ;;  %v1596_v5 = vrot.slane %v1594_v16, 4  ;;  %1257 = vst.msk [vmem:[#allocation3] sm:$0xff] %vm1256_vm15, %v4602_v54  ;;  %1258 = vst.msk [vmem:[#allocation3 + $0x28] sm:$0xff] %vm1256_vm15, %v4604_v15  ;;  %v1551_v43 = vld [vmem:[#allocation2 + $0x28] sm:$0xf] }
 0x39b   : > { %1259 = vst.msk [vmem:[#allocation3 + $0x50] sm:$0xff] %vm1256_vm15, %v4607_v57  ;;  %1260 = vst.msk [vmem:[#allocation3 + $0x78] sm:$0xff] %vm1256_vm15, %v4609_v14  ;;  %v2480_v12 = vsel %vm5302_vm11, %v2475_v46, %v2479_v25  ;;  %v4003_v17 = vcombine.low %v2132_v45, %v2135_v3  ;;  %v1601_v20 = vrot.slane %v1545_v6, 5  ;;  %v1604_v21 = vrot.slane %v1546_v8, 5  ;;  %v4637_v14 = vld [vmem:[#allocation2 + $0x6c] sm:$0xff]  }
 0x39c   : > { %1261 = vst.msk [vmem:[#allocation3 + $0xa0] sm:$0xff] %vm1256_vm15, %v4611_v49  ;;  %1262 = vst.msk [vmem:[#allocation3 + $0xc8] sm:$0xff] %vm1256_vm15, %v4613_v59  ;;  %v4019_v42 = vcombine.low %v2470_v2, %v2480_v12  ;;  %v1598_v52 = vsel %vm5391_vm14, %v1596_v5, %v1597_v51  ;;  %v1547_v59 = vld [vmem:[#allocation2 + $0x18] sm:$0xe]  ;;  %v1552_v53 = vld [vmem:[#allocation2 + $0x2c] sm:$0x1] }
 0x39d   : > { %1263 = vst.msk [vmem:[#allocation3 + $0xf0] sm:$0xff] %vm1256_vm15, %v4615_v56  ;;  %1264 = vst.msk [vmem:[#allocation3 + $0x118] sm:$0xff] %vm1256_vm15, %v4618_v28  ;;  %2174 = vrot.lane.b32.xlu1 %v4003_v17, %s4762_s22  ;;  %v3964_v54 = vcombine.low %v1595_v4, %v1598_v52  ;;  %v1602_v15 = vsel %vm5391_vm14, %v3957_v18, %v1601_v20  ;;  %v1603_v57 = vrot.slane %v1601_v20, 4  ;;  %v1548_v56 = vld [vmem:[#allocation2 + $0x1c] sm:$0xf]  ;;  %v3959_v61 = vrot.slane %v1550_v13, 9 }
 0x39e   : > { %2257 = vst.msk [vmem:[#allocation3 + $0x18] sm:$0xff] %vm1256_vm15, %v4621_v60  ;;  %2258 = vst.msk [vmem:[#allocation3 + $0x40] sm:$0xff] %vm1256_vm15, %v4624_v44  ;;  %2519 = vrot.lane.b32.xlu0 %v4019_v42, %s4762_s22  ;;  %v1549_v60 = vld [vmem:[#allocation2 + $0x20] sm:$0x1]  ;;  %v3958_v44 = vrot.slane %v1547_v59, 9  ;;  %v1608_v32 = vrot.slane %v1548_v56, 5 }
 0x39f   : > { %2259 = vst.msk [vmem:[#allocation3 + $0x68] sm:$0xff] %vm1256_vm15, %v4627_v58  ;;  %2260 = vst.msk [vmem:[#allocation3 + $0x90] sm:$0xff] %vm1256_vm15, %v4632_v26  ;;  %v1605_v49 = vsel %vm5391_vm14, %v1603_v57, %v1604_v21  ;;  %v1611_v41 = vrot.slane %v1549_v60, 5  ;;  %v1615_v37 = vrot.slane %v1551_v43, 5  ;;  %v1618_v58 = vrot.slane %v1552_v53, 5  ;;  %s5983_s22 = scalar_lea.sflag [#allocation5], %s6093_s0 }
 0x3a0   : > { %2261 = vst.msk [vmem:[#allocation3 + $0xb8] sm:$0xff] %vm1256_vm15, %v4633_v24  ;;  %2262 = vst.msk [vmem:[#allocation3 + $0xe0] sm:$0xff] %vm1256_vm15, %v4634_v50  ;;  %v3965_v28 = vcombine.low %v1602_v15, %v1605_v49  ;;  %v1609_v27 = vsel %vm5391_vm14, %v3958_v44, %v1608_v32  ;;  %v1610_v62 = vrot.slane %v1608_v32, 4  ;;  %v1553_v35 = vld [vmem:[#allocation2 + $0x30] sm:$0xe]  ;;  %vm1532_vm0 = vcmask 1048064  }
 0x3a1   : > { %2263 = vst.msk [vmem:[#allocation3 + $0x108] sm:$0xff] %vm1256_vm15, %v4635_v9  ;;  %1680 = vst.msk [vmem:[#allocation3 + $0x8] sm:$0xff] %vm1256_vm15, %v3964_v54  ;;  %v1616_v48 = vsel %vm5391_vm14, %v3959_v61, %v1615_v37  ;;  %v1617_v25 = vrot.slane %v1615_v37, 4  ;;  %v1554_v47 = vld [vmem:[#allocation2 + $0x34] sm:$0xf]  ;;  %v3960_v36 = vrot.slane %v1553_v35, 9 }
 0x3a2   : > { %2264 = vst.msk [vmem:[#allocation3 + $0x130] sm:$0xff] %vm1256_vm15, %v4637_v14  ;;  %1681 = vst.msk [vmem:[#allocation3 + $0x30] sm:$0xff] %vm1256_vm15, %v3965_v28  ;;  %v1612_v63 = vsel %vm5391_vm14, %v1610_v62, %v1611_v41  ;;  %v1555_v26 = vld [vmem:[#allocation2 + $0x38] sm:$0x1]  ;;  %v1622_v29 = vrot.slane %v1554_v47, 5 }
 0x3a3   : > { %v3966_v40 = vcombine.low %v1609_v27, %v1612_v63  ;;  %v1619_v45 = vsel %vm5391_vm14, %v1617_v25, %v1618_v58  ;;  %v1625_v16 = vrot.slane %v1555_v26, 5  ;;  %v1556_v46 = vld [vmem:[#allocation2 + $0x3c] sm:$0xe]  ;;  %v1557_v51 = vld [vmem:[#allocation2 + $0x40] sm:$0xf] }
 0x3a4   : > { %v3967_v24 = vcombine.low %v1616_v48, %v1619_v45  ;;  %v1558_v33 = vld [vmem:[#allocation2 + $0x44] sm:$0x1]  ;;  %v1623_v50 = vsel %vm5391_vm14, %v3960_v36, %v1622_v29  ;;  %v1624_v2 = vrot.slane %v1622_v29, 4  ;;  %v3961_v3 = vrot.slane %v1556_v46, 9  ;;  %v1559_v17 = vld [vmem:[#allocation2 + $0x48] sm:$0xe] }
 0x3a5   : > { %1682 = vst.msk [vmem:[#allocation3 + $0x58] sm:$0xff] %vm1256_vm15, %v3966_v40  ;;  %v1629_v4 = vrot.slane %v1557_v51, 5  ;;  %v1632_v5 = vrot.slane %v1558_v33, 5  ;;  %v1560_v18 = vld [vmem:[#allocation2 + $0x4c] sm:$0xf]  ;;  %v3962_v52 = vrot.slane %v1559_v17, 9 }
 0x3a6   : > { %1683 = vst.msk [vmem:[#allocation3 + $0x80] sm:$0xff] %vm1256_vm15, %v3967_v24  ;;  %v1626_v6 = vsel %vm5391_vm14, %v1624_v2, %v1625_v16  ;;  %v1561_v42 = vld [vmem:[#allocation2 + $0x50] sm:$0x1]  ;;  %v1636_v21 = vrot.slane %v1560_v18, 5  ;;  %v1562_v49 = vld [vmem:[#allocation2 + $0x54] sm:$0xe] }
 0x3a7   : > { %v1630_v8 = vsel %vm5391_vm14, %v3961_v3, %v1629_v4  ;;  %v1631_v9 = vrot.slane %v1629_v4, 4  ;;  %v3968_v12 = vcombine.low %v1623_v50, %v1626_v6  ;;  %v1639_v15 = vrot.slane %v1561_v42, 5  ;;  %v1563_v59 = vld [vmem:[#allocation2 + $0x58] sm:$0xf]  ;;  %v1564_v28 = vld [vmem:[#allocation2 + $0x5c] sm:$0x1] }
 0x3a8   : > { %v1637_v57 = vsel %vm5391_vm14, %v3962_v52, %v1636_v21  ;;  %v1638_v14 = vrot.slane %v1636_v21, 4  ;;  %v3963_v60 = vrot.slane %v1562_v49, 9  ;;  %v1643_v44 = vrot.slane %v1563_v59, 5  ;;  %v1776_v43 = vld [vmem:[#allocation2 + $0xc] sm:$0xf] }
 0x3a9   : > { %v1633_v20 = vsel %vm5391_vm14, %v1631_v9, %v1632_v5  ;;  %1684 = vst.msk [vmem:[#allocation3 + $0xa8] sm:$0xff] %vm1256_vm15, %v3968_v12  ;;  %v1646_v41 = vrot.slane %v1564_v28, 5  ;;  %v1777_v63 = vld [vmem:[#allocation2 + $0x10] sm:$0xf]  ;;  %v1778_v53 = vld [vmem:[#allocation2 + $0x14] sm:$0x1] }
 0x3aa   : > { %v3969_v54 = vcombine.low %v1630_v8, %v1633_v20  ;;  %v1640_v56 = vsel %vm5391_vm14, %v1638_v14, %v1639_v15  ;;  %v1644_v27 = vsel %vm5391_vm14, %v3963_v60, %v1643_v44  ;;  %v1645_v62 = vrot.slane %v1643_v44, 4  ;;  %v1779_v46 = vld [vmem:[#allocation2 + $0x18] sm:$0xf]  ;;  %v1780_v51 = vld [vmem:[#allocation2 + $0x1c] sm:$0xf] }
 0x3ab   : > { %v3970_v32 = vcombine.low %v1637_v57, %v1640_v56  ;;  %v1801_v40 = vshrl.u32 %v1776_v43, 16  ;;  %v1804_v58 = vshll.u32 %v1776_v43, 16  ;;  %v1810_v48 = vshll.u32 %v1777_v63, 16  ;;  %v1781_v33 = vld [vmem:[#allocation2 + $0x20] sm:$0x1] }
 0x3ac   : > { %1685 = vst.msk [vmem:[#allocation3 + $0xd0] sm:$0xff] %vm1256_vm15, %v3969_v54  ;;  %v1647_v13 = vsel %vm5391_vm14, %v1645_v62, %v1646_v41  ;;  %v1814_v35 = vshrl.u32 %v1777_v63, 16  ;;  %v1820_v47 = vshll.u32 %v1778_v53, 16  ;;  %v1825_v2 = vshrl.u32 %v1779_v46, 16  ;;  %v1782_v49 = vld [vmem:[#allocation2 + $0x24] sm:$0xf] }
 0x3ad   : > { %1686 = vst.msk [vmem:[#allocation3 + $0xf8] sm:$0xff] %vm1256_vm15, %v3970_v32  ;;  %v3971_v37 = vcombine.low %v1644_v27, %v1647_v13  ;;  %v1803_v26 = vrot.slane %v1801_v40, 4  ;;  %v1806_v36 = vrot.slane %v1804_v58, 5  ;;  %v1812_v45 = vrot.slane %v1810_v48, 5  ;;  %v1783_v59 = vld [vmem:[#allocation2 + $0x28] sm:$0xf] }
 0x3ae   : > { %v1816_v29 = vrot.slane %v1814_v35, 4  ;;  %v1822_v16 = vrot.slane %v1820_v47, 5  ;;  %v1828_v3 = vshll.u32 %v1779_v46, 16  ;;  %v1834_v4 = vshll.u32 %v1780_v51, 16  ;;  %v1784_v56 = vld [vmem:[#allocation2 + $0x2c] sm:$0x1] }
 0x3af   : > { %1687 = vst.msk [vmem:[#allocation3 + $0x120] sm:$0xff] %vm1256_vm15, %v3971_v37  ;;  %v1807_v24 = vor.u32 %v1806_v36, %v1803_v26  ;;  %v1838_v6 = vshrl.u32 %v1780_v51, 16  ;;  %v1844_v8 = vshll.u32 %v1781_v33, 16  ;;  %v1827_v12 = vrot.slane %v1825_v2, 4  ;;  %v1785_v26 = vld [vmem:[#allocation2 + $0x30] sm:$0xf] }
 0x3b0   : > { %v1817_v50 = vor.u32 %v1816_v29, %v1812_v45  ;;  %v1830_v17 = vrot.slane %v1828_v3, 5  ;;  %v1836_v18 = vrot.slane %v1834_v4, 5  ;;  %v1849_v60 = vshrl.u32 %v1782_v49, 16  ;;  %v1786_v29 = vld [vmem:[#allocation2 + $0x34] sm:$0xf] }
 0x3b1   : > { %v1808_v5 = vrot.slane %v1807_v24, 4  ;;  %v1840_v52 = vrot.slane %v1838_v6, 4  ;;  %v1846_v15 = vrot.slane %v1844_v8, 5  ;;  %v1852_v44 = vshll.u32 %v1782_v49, 16 }
 0x3b2   : > { %v1818_v9 = vrot.slane %v1817_v50, 4  ;;  %v1831_v54 = vor.u32 %v1830_v17, %v1827_v12  ;;  %v1858_v32 = vshll.u32 %v1783_v59, 16  ;;  %v1862_v27 = vshrl.u32 %v1783_v59, 16 }
 0x3b3   : > { %v1813_v42 = vsel %vm5302_vm11, %v1808_v5, %v1812_v45  ;;  %v1841_v14 = vor.u32 %v1840_v52, %v1836_v18  ;;  %v1868_v62 = vshll.u32 %v1784_v56, 16  ;;  %v1851_v63 = vrot.slane %v1849_v60, 4  ;;  %v1788_v5 = vld [vmem:[#allocation2 + $0x3c] sm:$0xf]  ;;  %v4653_v60 = vld [vmem:[%s6038_s3 + $0x80] sm:$0xff]  }
 0x3b4   : > { %v1823_v21 = vsel %vm5302_vm11, %v1818_v9, %v1822_v16  ;;  %v1832_v28 = vrot.slane %v1831_v54, 4  ;;  %v1854_v53 = vrot.slane %v1852_v44, 5  ;;  %v1864_v40 = vrot.slane %v1862_v27, 4  ;;  %v1787_v16 = vld [vmem:[#allocation2 + $0x38] sm:$0x1] }
 0x3b5   : > { %v3980_v57 = vcombine.low %v1813_v42, %v1823_v21  ;;  %v1842_v41 = vrot.slane %v1841_v14, 4  ;;  %v1870_v58 = vrot.slane %v1868_v62, 5  ;;  %v1873_v24 = vshrl.u32 %v1785_v26, 16  ;;  %v1791_v27 = vld [vmem:[#allocation2 + $0x48] sm:$0xf] }
 0x3b6   : > { %v1837_v43 = vsel %vm5302_vm11, %v1832_v28, %v1836_v18  ;;  %v1876_v51 = vshll.u32 %v1785_v26, 16  ;;  %v1882_v33 = vshll.u32 %v1786_v29, 16  ;;  %v1886_v50 = vshrl.u32 %v1786_v29, 16  ;;  %v1789_v18 = vld [vmem:[#allocation2 + $0x40] sm:$0xf]  ;;  %v4654_v62 = vld [vmem:[%s6038_s3 + $0xc8] sm:$0xff]  }
 0x3b7   : > { %2024 = vst.msk [vmem:[#allocation3 + $0x10] sm:$0xff] %vm1256_vm15, %v3980_v57  ;;  %v1847_v37 = vsel %vm5302_vm11, %v1842_v41, %v1846_v15  ;;  %v1875_v3 = vrot.slane %v1873_v24, 4  ;;  %v1892_v4 = vshll.u32 %v1787_v16, 16  ;;  %v1790_v15 = vld [vmem:[#allocation2 + $0x44] sm:$0x1]  ;;  %v1897_v57 = vshrl.u32 %v1788_v5, 16 }
 0x3b8   : > { %v1745_v61 = vpop.permute.xlu0 %1744  ;;  %v1747_v25 = vpop.permute.xlu1 %1746  ;;  %v3981_v48 = vcombine.low %v1837_v43, %v1847_v37  ;;  %v1878_v9 = vrot.slane %v1876_v51, 5  ;;  %v1884_v12 = vrot.slane %v1882_v33, 5  ;;  %v1888_v17 = vrot.slane %v1886_v50, 4  ;;  %v4655_v29 = vld [vmem:[%s6038_s3 + $0x88] sm:$0xff]   ;;  %v1794_v50 = vld [vmem:[#allocation2 + $0x54] sm:$0xf] }
 0x3b9   : > { %1768 = vst.msk [vmem:[#allocation3 + $0x8] sm:$0xff] %vm1532_vm0, %v1745_v61  ;;  %1769 = vst.msk [vmem:[#allocation3 + $0x30] sm:$0xff] %vm1532_vm0, %v1747_v25  ;;  %v1860_v61 = vrot.slane %v1858_v32, 5  ;;  %v1855_v25 = vor.u32 %v1854_v53, %v1851_v63  ;;  %v1894_v54 = vrot.slane %v1892_v4, 5  ;;  %v1900_v14 = vshll.u32 %v1788_v5, 16 }
 0x3ba   : > { %2025 = vst.msk [vmem:[#allocation3 + $0x38] sm:$0xff] %vm1256_vm15, %v3981_v48  ;;  %v1879_v49 = vor.u32 %v1878_v9, %v1875_v3  ;;  %v1889_v59 = vor.u32 %v1888_v17, %v1884_v12  ;;  %v1906_v56 = vshll.u32 %v1789_v18, 16  ;;  %v1910_v28 = vshrl.u32 %v1789_v18, 16  ;;  %v1793_v48 = vld [vmem:[#allocation2 + $0x50] sm:$0x1] }
 0x3bb   : > { %v1865_v47 = vor.u32 %v1864_v40, %v1860_v61  ;;  %v1856_v45 = vrot.slane %v1855_v25, 4  ;;  %v1899_v44 = vrot.slane %v1897_v57, 4  ;;  %v1902_v32 = vrot.slane %v1900_v14, 5  ;;  %v4657_v57 = vld [vmem:[%s6038_s3 + $0x90] sm:$0xff]  }
 0x3bc   : > { %v1916_v41 = vshll.u32 %v1790_v15, 16  ;;  %v1890_v43 = vrot.slane %v1889_v59, 4  ;;  %v1908_v63 = vrot.slane %v1906_v56, 5  ;;  %v1912_v53 = vrot.slane %v1910_v28, 4  ;;  %v4658_v28 = vld [vmem:[%s6038_s3 + $0xd8] sm:$0xff]  }
 0x3bd   : > { %v1866_v46 = vrot.slane %v1865_v47, 4  ;;  %v1861_v2 = vsel %vm5302_vm11, %v1856_v45, %v1860_v61  ;;  %v1903_v37 = vor.u32 %v1902_v32, %v1899_v44  ;;  %v1921_v45 = vshrl.u32 %v1791_v27, 16 }
 0x3be   : > { %v1918_v40 = vrot.slane %v1916_v41, 5  ;;  %v1895_v26 = vsel %vm5302_vm11, %v1890_v43, %v1894_v54  ;;  %v1924_v51 = vshll.u32 %v1791_v27, 16  ;;  %v1945_v15 = vshrl.u32 %v1794_v50, 16 }
 0x3bf   : > { %v1871_v8 = vsel %vm5302_vm11, %v1866_v46, %v1870_v58  ;;  %v1792_v58 = vld [vmem:[#allocation2 + $0x4c] sm:$0xf]  ;;  %v1904_v46 = vrot.slane %v1903_v37, 4  ;;  %v1923_v4 = vrot.slane %v1921_v45, 4  ;;  %v1948_v59 = vshll.u32 %v1794_v50, 16  ;;  %v4660_v45 = vld [vmem:[%s6038_s3 + $0xe0] sm:$0xff]  }
 0x3c0   : > { %v2682_v20 = vld [vmem:[#allocation3 + $0x8] sm:$0xff]  ;;  %v2687_v6 = vld [vmem:[#allocation3 + $0x30] sm:$0xff]  ;;  %v3982_v21 = vcombine.low %v1861_v2, %v1871_v8  ;;  %v1930_v33 = vshll.u32 %v1792_v58, 16  ;;  %v4656_v2 = vld [vmem:[%s6038_s3 + $0xd0] sm:$0xff]   ;;  %v1934_v5 = vshrl.u32 %v1792_v58, 16  ;;  %v1926_v17 = vrot.slane %v1924_v51, 5 }
 0x3c1   : > { %3072 = vmatprep.mubr.bf16.mxu0 %v2682_v20  ;;  %v1795_v8 = vld [vmem:[#allocation2 + $0x58] sm:$0xf]  ;;  %v1947_v44 = vrot.slane %v1945_v15, 4  ;;  %v1950_v43 = vrot.slane %v1948_v59, 5  ;;  %v2538_v15 = vld [vmem:[#allocation2 + $0x1c] sm:$0xf] }
 0x3c2   : > { %2026 = vst.msk [vmem:[#allocation3 + $0x60] sm:$0xff] %vm1256_vm15, %v3982_v21  ;;  %v1932_v18 = vrot.slane %v1930_v33, 5  ;;  %v1936_v21 = vrot.slane %v1934_v5, 4  ;;  %v1954_v56 = vshll.u32 %v1795_v8, 16  ;;  %v1958_v32 = vshrl.u32 %v1795_v8, 16 }
 0x3c5   : > { %v1509_v13 = vpop.permute.xlu0 %1508 }
 0x3c6   : > { %1533 = vst.msk [vmem:[#allocation3] sm:$0xff] %vm1532_vm0, %v1509_v13  ;;  %v1880_v13 = vrot.slane %v1879_v49, 4  ;;  %v1927_v49 = vor.u32 %v1926_v17, %v1923_v4 }
 0x3c8   : > { %v1511_v35 = vpop.permute.xlu1 %1510  ;;  %v1885_v47 = vsel %vm5302_vm11, %v1880_v13, %v1884_v12  ;;  %v1909_v12 = vsel %vm5302_vm11, %v1904_v46, %v1908_v63  ;;  %v1928_v13 = vrot.slane %v1927_v49, 4 }
 0x3c9   : > { %1534 = vst.msk [vmem:[#allocation3 + $0x28] sm:$0xff] %vm1532_vm0, %v1511_v35  ;;  %v1749_v36 = vpop.permute.xlu0 %1748  ;;  %v3983_v24 = vcombine.low %v1885_v47, %v1895_v26  ;;  %v1797_v47 = vld [vmem:[#allocation2 + $0x60] sm:$0xf]  ;;  %v1798_v26 = vld [vmem:[#allocation2 + $0x64] sm:$0xf] }
 0x3ca   : > { %1770 = vst.msk [vmem:[#allocation3 + $0x58] sm:$0xff] %vm1532_vm0, %v1749_v36  ;;  %v1913_v36 = vor.u32 %v1912_v53, %v1908_v63  ;;  %v1956_v63 = vrot.slane %v1954_v56, 5  ;;  %v1972_v46 = vshll.u32 %v1797_v47, 16  ;;  %v2587_v56 = vrot.slane %v2538_v15, 5 }
 0x3cb   : > { %2027 = vst.msk [vmem:[#allocation3 + $0x88] sm:$0xff] %vm1256_vm15, %v3983_v24  ;;  %v1969_v24 = vshrl.u32 %v1797_v47, 16 }
 0x3cc   : > { %v1513_v20 = vpop.permute.xlu1 %1512  ;;  %v1914_v3 = vrot.slane %v1913_v36, 4  ;;  %v1799_v36 = vld [vmem:[#allocation2 + $0x68] sm:$0x1] }
 0x3cd   : > { %v1751_v42 = vpop.permute.xlu0 %1750  ;;  %v2681_v52 = vld [vmem:[#allocation3] sm:$0xff]  ;;  %1535 = vst.msk [vmem:[#allocation3 + $0x50] sm:$0xff] %vm1532_vm0, %v1513_v20  ;;  %v1971_v5 = vrot.slane %v1969_v24, 4  ;;  %v1988_v8 = vshll.u32 %v1799_v36, 16  ;;  %v2547_v24 = vld [vmem:[#allocation2 + $0x40] sm:$0xf] }
 0x3ce   : > { %1771 = vst.msk [vmem:[#allocation3 + $0x80] sm:$0xff] %vm1532_vm0, %v1751_v42  ;;  %3073 = vmatmul.mubr.bf16.vlgmr.msra.gmra.mrb[0].mxu0 %v2681_v52  ;;  %v1796_v20 = vld [vmem:[#allocation2 + $0x5c] sm:$0x1]  ;;  %v1919_v52 = vsel %vm5302_vm11, %v1914_v3, %v1918_v40  ;;  %v1960_v40 = vrot.slane %v1958_v32, 4  ;;  %v1982_v3 = vshrl.u32 %v1798_v26, 16 }
 0x3cf   : > { %4335 = vmatpush3.bf16.msra.mxu0 %v4653_v60  ;;  %3080 = vmatprep.mubr.bf16.mxu0 %v2687_v6  ;;  %v1940_v6 = vshll.u32 %v1793_v48, 16  ;;  %v3984_v14 = vcombine.low %v1909_v12, %v1919_v52  ;;  %v1937_v60 = vor.u32 %v1936_v21, %v1932_v18  ;;  %v1964_v41 = vshll.u32 %v1796_v20, 16  ;;  %v4659_v48 = vld [vmem:[%s6038_s3 + $0x98] sm:$0xff]   ;;  %v4661_v12 = vld [vmem:[%s6038_s3 + $0xa0] sm:$0xff]  }
 0x3d0   : > { %4336 = vmatprep.subr.bf16.mxu0 %v4654_v62  ;;  %v2686_v35 = vld [vmem:[#allocation3 + $0x28] sm:$0xff]  ;;  %v1984_v20 = vrot.slane %v1982_v3, 4  ;;  %v2546_v36 = vld [vmem:[#allocation2 + $0x3c] sm:$0xe] }
 0x3d1   : > { %v1753_v61 = vpop.permute.xlu0 %1752  ;;  %v2692_v16 = vld [vmem:[#allocation3 + $0x58] sm:$0xff]  ;;  %v1942_v54 = vrot.slane %v1940_v6, 5  ;;  %2028 = vst.msk [vmem:[#allocation3 + $0xb0] sm:$0xff] %vm1256_vm15, %v3984_v14  ;;  %v1938_v37 = vrot.slane %v1937_v60, 4  ;;  %v1966_v58 = vrot.slane %v1964_v41, 5  ;;  %v1974_v6 = vrot.slane %v1972_v46, 5 }
 0x3d2   : > { %v1515_v25 = vpop.permute.xlu1 %1514  ;;  %1772 = vst.msk [vmem:[#allocation3 + $0xa8] sm:$0xff] %vm1532_vm0, %v1753_v61  ;;  %v2540_v60 = vld [vmem:[#allocation2 + $0x24] sm:$0xe]  ;;  %v2541_v41 = vld [vmem:[#allocation2 + $0x28] sm:$0xf] }
 0x3d3   : > { %1536 = vst.msk [vmem:[#allocation3 + $0x78] sm:$0xff] %vm1532_vm0, %v1515_v25  ;;  %4337 = vmatpush3.bf16.msra.mxu0 %v4655_v29  ;;  %v1933_v25 = vsel %vm5302_vm11, %v1928_v13, %v1932_v18  ;;  %v1943_v29 = vsel %vm5302_vm11, %v1938_v37, %v1942_v54  ;;  %v1975_v21 = vor.u32 %v1974_v6, %v1971_v5  ;;  %v1990_v54 = vrot.slane %v1988_v8, 5  ;;  %v2548_v46 = vld [vmem:[#allocation2 + $0x44] sm:$0x1]  ;;  %v2549_v5 = vld [vmem:[#allocation2 + $0x48] sm:$0xe] }
 0x3d4   : > { %4338 = vmatprep.subr.bf16.mxu0 %v4656_v2  ;;  %v2691_v62 = vld [vmem:[#allocation3 + $0x50] sm:$0xff]  ;;  %v3985_v33 = vcombine.low %v1933_v25, %v1943_v29  ;;  %v1978_v2 = vshll.u32 %v1798_v26, 16  ;;  %v2608_v8 = vrot.slane %v2547_v24, 5 }
 0x3d5   : > { %v1755_v9 = vpop.permute.xlu0 %1754  ;;  %v2697_v61 = vld [vmem:[#allocation3 + $0x80] sm:$0xff]  ;;  %v1976_v32 = vrot.slane %v1975_v21, 4  ;;  %v2552_v21 = vld [vmem:[#allocation2 + $0x54] sm:$0xe] }
 0x3d6   : > { %v1517_v42 = vpop.permute.xlu1 %1516  ;;  %1773 = vst.msk [vmem:[#allocation3 + $0xd0] sm:$0xff] %vm1532_vm0, %v1755_v9  ;;  %3081 = vmatmul.mubr.bf16.gmra.mrb[4].mxu0 %v2686_v35  ;;  %v1951_v35 = vor.u32 %v1950_v43, %v1947_v44  ;;  %v1980_v18 = vrot.slane %v1978_v2, 5 }
 0x3d7   : > { %1537 = vst.msk [vmem:[#allocation3 + $0xa0] sm:$0xff] %vm1532_vm0, %v1517_v42  ;;  %3088 = vmatprep.mubr.bf16.mxu0 %v2692_v16  ;;  %4339 = vmatpush3.bf16.msra.mxu0 %v4657_v57  ;;  %v1961_v16 = vor.u32 %v1960_v40, %v1956_v63  ;;  %v2537_v42 = vld [vmem:[#allocation2 + $0x18] sm:$0xe]  ;;  %v2539_v57 = vld [vmem:[#allocation2 + $0x20] sm:$0x1]  ;;  %v2594_v40 = vrot.slane %v2541_v41, 5 }
 0x3d8   : > { %4340 = vmatprep.subr.bf16.mxu0 %v4658_v28  ;;  %v1952_v50 = vrot.slane %v1951_v35, 4  ;;  %2029 = vst.msk [vmem:[#allocation3 + $0xd8] sm:$0xff] %vm1256_vm15, %v3985_v33  ;;  %v4020_v14 = vrot.slane %v2537_v42, 9  ;;  %v1985_v59 = vor.u32 %v1984_v20, %v1980_v18  ;;  %v2590_v28 = vrot.slane %v2539_v57, 5 }
 0x3d9   : > { %v1757_v27 = vpop.permute.xlu0 %1756  ;;  %v1962_v4 = vrot.slane %v1961_v16, 4  ;;  %v2702_v44 = vld [vmem:[#allocation3 + $0xa8] sm:$0xff]  ;;  %v1981_v37 = vsel %vm5302_vm11, %v1976_v32, %v1980_v18  ;;  %v2596_v16 = vrot.slane %v2594_v40, 4  ;;  %v4024_v42 = vrot.slane %v2549_v5, 9 }
 0x3da   : > { %v1519_v53 = vpop.permute.xlu1 %1518  ;;  %1774 = vst.msk [vmem:[#allocation3 + $0xf8] sm:$0xff] %vm1532_vm0, %v1757_v27  ;;  %v1957_v17 = vsel %vm5302_vm11, %v1952_v50, %v1956_v63  ;;  %v2542_v27 = vld [vmem:[#allocation2 + $0x2c] sm:$0x1]  ;;  %v2696_v13 = vld [vmem:[#allocation3 + $0x78] sm:$0xff]  ;;  %v2588_v43 = vsel %vm5391_vm14, %v4020_v14, %v2587_v56  ;;  %v2589_v63 = vrot.slane %v2587_v56, 4  ;;  %v2610_v14 = vrot.slane %v2608_v8, 4 }
 0x3db   : > { %1538 = vst.msk [vmem:[#allocation3 + $0xc8] sm:$0xff] %vm1532_vm0, %v1519_v53  ;;  %4341 = vmatpush3.bf16.msra.mxu0 %v4659_v48  ;;  %v1967_v52 = vsel %vm5302_vm11, %v1962_v4, %v1966_v58  ;;  %v4021_v53 = vrot.slane %v2540_v60, 9  ;;  %v2597_v58 = vrot.slane %v2542_v27, 5  ;;  %v2544_v48 = vld [vmem:[#allocation2 + $0x34] sm:$0xf]  ;;  %v4023_v4 = vrot.slane %v2546_v36, 9 }
 0x3dc   : > { %4342 = vmatprep.subr.bf16.mxu0 %v4660_v45  ;;  %v3986_v49 = vcombine.low %v1957_v17, %v1967_v52  ;;  %v2591_v35 = vsel %vm5391_vm14, %v2589_v63, %v2590_v28  ;;  %v2601_v26 = vrot.slane %v2544_v48, 5  ;;  %v2551_v17 = vld [vmem:[#allocation2 + $0x50] sm:$0x1]  ;;  %v2555_v56 = vld [vmem:[#allocation2 + $0x60] sm:$0xe]  ;;  %v4663_v60 = vld [vmem:[%s6038_s3 + $0xb8] sm:$0xff]  }
 0x3dd   : > { %v1759_v51 = vpop.permute.xlu0 %1758  ;;  %v4028_v29 = vcombine.low %v2588_v43, %v2591_v35  ;;  %v2598_v6 = vsel %vm5391_vm14, %v2596_v16, %v2597_v58  ;;  %v2609_v57 = vsel %vm5391_vm14, %v4023_v4, %v2608_v8  ;;  %v4025_v41 = vrot.slane %v2552_v21, 9  ;;  %v2558_v35 = vld [vmem:[#allocation2 + $0x6c] sm:$0xe] }
 0x3de   : > { %1775 = vst.msk [vmem:[#allocation3 + $0x120] sm:$0xff] %vm1532_vm0, %v1759_v51  ;;  %3089 = vmatmul.mubr.bf16.gmra.mrb[8].mxu0 %v2691_v62  ;;  %v1521_v9 = vpop.permute.xlu1 %1520  ;;  %v2603_v2 = vrot.slane %v2601_v26, 4  ;;  %v2701_v28 = vld [vmem:[#allocation3 + $0xa0] sm:$0xff]  ;;  %v4027_v24 = vrot.slane %v2558_v35, 9 }
 0x3df   : > { %3096 = vmatprep.mubr.bf16.mxu0 %v2697_v61  ;;  %4343 = vmatpush3.bf16.msra.mxu0 %v4661_v12  ;;  %1539 = vst.msk [vmem:[#allocation3 + $0xf0] sm:$0xff] %vm1532_vm0, %v1521_v9  ;;  %v2543_v61 = vld [vmem:[#allocation2 + $0x30] sm:$0xe]  ;;  %v2611_v9 = vrot.slane %v2548_v46, 5  ;;  %v2550_v12 = vld [vmem:[#allocation2 + $0x4c] sm:$0xf] }
 0x3e0   : > { %4344 = vmatprep.subr.bf16.mxu0 %v5490_v55  ;;  %2030 = vst.msk [vmem:[#allocation3 + $0x100] sm:$0xff] %vm1256_vm15, %v3986_v49  ;;  %v1986_v55 = vrot.slane %v1985_v59, 4  ;;  %v4022_v47 = vrot.slane %v2543_v61, 9  ;;  %2673 = vst.msk [vmem:[#allocation3 + $0x20] sm:$0xff] %vm1256_vm15, %v4028_v29  ;;  %v2615_v52 = vrot.slane %v2550_v12, 5  ;;  %v2618_v49 = vrot.slane %v2551_v17, 5 }
 0x3e1   : > { %v2554_v59 = vld [vmem:[#allocation2 + $0x5c] sm:$0x1]  ;;  %v2612_v43 = vsel %vm5391_vm14, %v2610_v14, %v2611_v9  ;;  %v4026_v61 = vrot.slane %v2555_v56, 9  ;;  %v2712_v9 = vld [vmem:[#allocation3 + $0xf8] sm:$0xff] }
 0x3e2   : > { %v1523_v62 = vpop.permute.xlu1 %1522  ;;  %v1991_v25 = vsel %vm5302_vm11, %v1986_v55, %v1990_v54  ;;  %v2602_v50 = vsel %vm5391_vm14, %v4022_v47, %v2601_v26  ;;  %v2553_v54 = vld [vmem:[#allocation2 + $0x58] sm:$0xf]  ;;  %v2617_v32 = vrot.slane %v2615_v52, 4  ;;  %v2707_v55 = vld [vmem:[#allocation3 + $0xd0] sm:$0xff]  ;;  %v2625_v63 = vrot.slane %v2554_v59, 5 }
 0x3e3   : > { %4345 = vmatpush3.bf16.msra.mxu0 %v5502_v34  ;;  %1540 = vst.msk [vmem:[#allocation3 + $0x118] sm:$0xff] %vm1532_vm0, %v1523_v62  ;;  %v2545_v34 = vld [vmem:[#allocation2 + $0x38] sm:$0x1]  ;;  %v3987_v45 = vcombine.low %v1981_v37, %v1991_v25  ;;  %v2622_v27 = vrot.slane %v2553_v54, 5  ;;  %v2556_v62 = vld [vmem:[#allocation2 + $0x64] sm:$0xf]  ;;  %v4031_v58 = vcombine.low %v2609_v57, %v2612_v43 }
 0x3e4   : > { %4346 = vmatprep.subr.bf16.mxu0 %v5509_v1  ;;  %v2595_v1 = vsel %vm5391_vm14, %v4021_v53, %v2594_v40  ;;  %v2604_v3 = vrot.slane %v2545_v34, 5  ;;  %v2557_v53 = vld [vmem:[#allocation2 + $0x68] sm:$0x1]  ;;  %v2629_v37 = vrot.slane %v2556_v62, 5  ;;  %v2619_v48 = vsel %vm5391_vm14, %v2617_v32, %v2618_v49  ;;  %v2559_v47 = vld [vmem:[#allocation2 + $0x70] sm:$0xf] }
 0x3e5   : > { %2031 = vst.msk [vmem:[#allocation3 + $0x128] sm:$0xff] %vm1256_vm15, %v3987_v45  ;;  %v4029_v18 = vcombine.low %v2595_v1, %v2598_v6  ;;  %v2623_v34 = vsel %vm5391_vm14, %v4025_v41, %v2622_v27  ;;  %v2624_v25 = vrot.slane %v2622_v27, 4  ;;  %v2632_v29 = vrot.slane %v2557_v53, 5  ;;  %v2560_v1 = vld [vmem:[#allocation2 + $0x74] sm:$0x1]  ;;  %2676 = vst.msk [vmem:[#allocation3 + $0x98] sm:$0xff] %vm1256_vm15, %v4031_v58 }
 0x3e6   : > { %3097 = vmatmul.mubr.bf16.gmra.mrb[12].mxu0 %v2696_v13  ;;  %v2506_v51 = vpop.permute.xlu0 %2505  ;;  %v2161_v33 = vpop.permute.xlu1 %2160  ;;  %v2605_v20 = vsel %vm5391_vm14, %v2603_v2, %v2604_v3  ;;  %v2630_v36 = vsel %vm5391_vm14, %v4026_v61, %v2629_v37  ;;  %v2631_v45 = vrot.slane %v2629_v37, 4  ;;  %v2636_v46 = vrot.slane %v2559_v47, 5  ;;  %v2706_v6 = vld [vmem:[#allocation3 + $0xc8] sm:$0xff]  ;;  %v2717_v19 = vld [vmem:[#allocation3 + $0x120] sm:$0xff]  ;;  %v4638_v27 = vld [vmem:[%s6038_s3 + $0x108] sm:$0xff]  }
 0x3e7   : > { %3104 = vmatprep.mubr.bf16.mxu0 %v2702_v44  ;;  %4347 = vmatpush3.bf16.msra.mxu0 %v5517_v7  ;;  %2529 = vst.msk [vmem:[#allocation3 + $0x18] sm:$0xff] %vm1532_vm0, %v2506_v51  ;;  %2184 = vst.msk [vmem:[#allocation3 + $0x10] sm:$0xff] %vm1532_vm0, %v2161_v33  ;;  %v4662_v7 = vld [vmem:[%s6038_s3 + $0xf8] sm:$0xff]   ;;  %v4030_v15 = vcombine.low %v2602_v50, %v2605_v20  ;;  %v2616_v44 = vsel %vm5391_vm14, %v4024_v42, %v2615_v52  ;;  %v2639_v51 = vrot.slane %v2560_v1, 5  ;;  %v2711_v52 = vld [vmem:[#allocation3 + $0xf0] sm:$0xff] }
 0x3e8   : > { %4348 = vmatprep.subr.bf16.mxu0 %v4662_v7  ;;  %2674 = vst.msk [vmem:[#allocation3 + $0x48] sm:$0xff] %vm1256_vm15, %v4029_v18  ;;  %v4032_v26 = vcombine.low %v2616_v44, %v2619_v48  ;;  %v2626_v16 = vsel %vm5391_vm14, %v2624_v25, %v2625_v63  ;;  %v2633_v50 = vsel %vm5391_vm14, %v2631_v45, %v2632_v29  ;;  %v2638_v4 = vrot.slane %v2636_v46, 4  ;;  %v4639_v43 = vld [vmem:[%s6038_s3 + $0x110] sm:$0xff]   ;;  %v4641_v1 = vld [vmem:[%s6040_s5] ss:$8 sps:$4 sm:$0xff]  }
 0x3e9   : > { %2675 = vst.msk [vmem:[#allocation3 + $0x70] sm:$0xff] %vm1256_vm15, %v4030_v15  ;;  %v4033_v33 = vcombine.low %v2623_v34, %v2626_v16  ;;  %v4034_v2 = vcombine.low %v2630_v36, %v2633_v50  ;;  %v2637_v3 = vsel %vm5391_vm14, %v4027_v24, %v2636_v46  ;;  %v4643_v16 = vld [vmem:[%s6040_s5 + $0x4] ss:$8 sps:$4 sm:$0xff]   ;;  %v4644_v24 = vld [vmem:[%s6040_s5 + $0x10] ss:$8 sps:$4 sm:$0xff]  }
 0x3ea   : > { %2677 = vst.msk [vmem:[#allocation3 + $0xc0] sm:$0xff] %vm1256_vm15, %v4032_v26  ;;  %v2640_v8 = vsel %vm5391_vm14, %v2638_v4, %v2639_v51  ;;  %v2716_v14 = vld [vmem:[#allocation3 + $0x118] sm:$0xff]  ;;  %3439 = vmatprep.subr.bf16.mxu1 %v4643_v16  ;;  %v4647_v51 = vld [vmem:[%s6040_s5 + $0x20] ss:$8 sps:$4 sm:$0xff]  }
 0x3eb   : > { %4349 = vmatpush3.bf16.msra.mxu0 %v4663_v60  ;;  %2678 = vst.msk [vmem:[#allocation3 + $0xe8] sm:$0xff] %vm1256_vm15, %v4033_v33  ;;  %2679 = vst.msk [vmem:[#allocation3 + $0x110] sm:$0xff] %vm1256_vm15, %v4034_v2  ;;  %v4035_v12 = vcombine.low %v2637_v3, %v2640_v8  ;;  %v4646_v46 = vld [vmem:[%s6040_s5 + $0x14] ss:$8 sps:$4 sm:$0xff]   ;;  %v4649_v33 = vld [vmem:[%s6040_s5 + $0x24] ss:$8 sps:$4 sm:$0xff]  }
 0x3ec   : > { %v2163_v13 = vpop.permute.xlu1 %2162  ;;  %4410 = vmatprep.subr.bf16.mxu0 %v5700_v0  ;;  %v2508_v40 = vpop.permute.xlu0 %2507  ;;  %v2700_v47 = vld [vmem:[#allocation3 + $0x98] sm:$0xff]  ;;  %v4763_v3 = vmov 0  }
 0x3ed   : > { %2185 = vst.msk [vmem:[#allocation3 + $0x38] sm:$0xff] %vm1532_vm0, %v2163_v13  ;;  %2530 = vst.msk [vmem:[#allocation3 + $0x40] sm:$0xff] %vm1532_vm0, %v2508_v40  ;;  %v2685_v40 = vld [vmem:[#allocation3 + $0x20] sm:$0xff] }
 0x3ee   : > { %3105 = vmatmul.mubr.bf16.gmra.mrb[16].mxu0 %v2701_v28  ;;  %2680 = vst.msk [vmem:[#allocation3 + $0x138] sm:$0xff] %vm1256_vm15, %v4035_v12  ;;  %v2684_v59 = vld [vmem:[#allocation3 + $0x18] sm:$0xff]  ;;  %v2683_v41 = vld [vmem:[#allocation3 + $0x10] sm:$0xff] }
 0x3ef   : > { %3112 = vmatprep.mubr.bf16.mxu0 %v2707_v55  ;;  %v2690_v34 = vld [vmem:[#allocation3 + $0x48] sm:$0xff]  ;;  %v4650_v50 = vld [vmem:[%s6040_s5 + $0x30] ss:$8 sps:$4 sm:$0xff]   ;;  %v4652_v2 = vld [vmem:[%s6040_s5 + $0x34] ss:$8 sps:$4 sm:$0xff]  }
 0x3f0   : > { %v2695_v25 = vld [vmem:[#allocation3 + $0x70] sm:$0xff] }
 0x3f1   : > { %v2705_v26 = vld [vmem:[#allocation3 + $0xc0] sm:$0xff] }
 0x3f2   : > { %v2165_v5 = vpop.permute.xlu1 %2164  ;;  %v2510_v7 = vpop.permute.xlu0 %2509  ;;  %v2710_v36 = vld [vmem:[#allocation3 + $0xe8] sm:$0xff]  ;;  %v2715_v45 = vld [vmem:[#allocation3 + $0x110] sm:$0xff] }
 0x3f3   : > { %2186 = vst.msk [vmem:[#allocation3 + $0x60] sm:$0xff] %vm1532_vm0, %v2165_v5  ;;  %2531 = vst.msk [vmem:[#allocation3 + $0x68] sm:$0xff] %vm1532_vm0, %v2510_v7 }
 0x3f4   : > { %v2689_v62 = vld [vmem:[#allocation3 + $0x40] sm:$0xff]  ;;  %v2688_v37 = vld [vmem:[#allocation3 + $0x38] sm:$0xff] }
 0x3f5   : > { %v2720_v29 = vld [vmem:[#allocation3 + $0x138] sm:$0xff] }
 0x3f6   : > { %3113 = vmatmul.mubr.bf16.gmra.mrb[20].mxu0 %v2706_v6 }
 0x3f7   : > { %3120 = vmatprep.mubr.bf16.mxu0 %v2712_v9 }
 0x3f8   : > { %v2167_v17 = vpop.permute.xlu1 %2166  ;;  %v2512_v18 = vpop.permute.xlu0 %2511 }
 0x3f9   : > { %2187 = vst.msk [vmem:[#allocation3 + $0x88] sm:$0xff] %vm1532_vm0, %v2167_v17  ;;  %2532 = vst.msk [vmem:[#allocation3 + $0x90] sm:$0xff] %vm1532_vm0, %v2512_v18 }
 0x3fa   : > { %v2693_v20 = vld [vmem:[#allocation3 + $0x60] sm:$0xff]  ;;  %v2694_v42 = vld [vmem:[#allocation3 + $0x68] sm:$0xff] }
 0x3fb   : > { %3185 = vmatprep.mubr.bf16.mxu1 %v2694_v42 }
 0x3fc   : > { %3186 = vmatmul.mubr.bf16.vlgmr.msra.gmra.mrb[0].mxu1 %v2693_v20 }
 0x3fd   : > { %3440 = vmatpush1.bf16.msra.mxu1 %v4641_v1 }
 0x3fe   : > { %v2169_v21 = vpop.permute.xlu1 %2168  ;;  %3121 = vmatmul.mubr.bf16.gmra.mrb[24].mxu0 %v2711_v52  ;;  %v2514_v54 = vpop.permute.xlu0 %2513  ;;  %3441 = vmatprep.subr.bf16.mxu1 %v4646_v46 }
 0x3ff   : > { %2188 = vst.msk [vmem:[#allocation3 + $0xb0] sm:$0xff] %vm1532_vm0, %v2169_v21  ;;  %3128 = vmatprep.mubr.bf16.mxu0 %v2717_v19  ;;  %2533 = vst.msk [vmem:[#allocation3 + $0xb8] sm:$0xff] %vm1532_vm0, %v2514_v54 }
 0x400   : > { %v2699_v15 = vld [vmem:[#allocation3 + $0x90] sm:$0xff]  ;;  %v2698_v57 = vld [vmem:[#allocation3 + $0x88] sm:$0xff] }
 0x401   : > { %3193 = vmatprep.mubr.bf16.mxu1 %v2699_v15  ;;  %3442 = vmatpush1.bf16.msra.mxu1 %v4644_v24 }
 0x402   : > { %3443 = vmatprep.subr.bf16.mxu1 %v4649_v33 }
 0x404   : > { %v2171_v49 = vpop.permute.xlu1 %2170  ;;  %3194 = vmatmul.mubr.bf16.gmra.mrb[4].mxu1 %v2698_v57  ;;  %v2516_v56 = vpop.permute.xlu0 %2515 }
 0x405   : > { %2189 = vst.msk [vmem:[#allocation3 + $0xd8] sm:$0xff] %vm1532_vm0, %v2171_v49  ;;  %2534 = vst.msk [vmem:[#allocation3 + $0xe0] sm:$0xff] %vm1532_vm0, %v2516_v56  ;;  %3444 = vmatpush1.bf16.msra.mxu1 %v4647_v51 }
 0x406   : > { %3129 = vmatmul.mubr.bf16.gmra.mrb[28].mxu0 %v2716_v14  ;;  %v2704_v28 = vld [vmem:[#allocation3 + $0xb8] sm:$0xff]  ;;  %v2703_v60 = vld [vmem:[#allocation3 + $0xb0] sm:$0xff]  ;;  %3445 = vmatprep.subr.bf16.mxu1 %v4652_v2 }
 0x407   : > { %3169 = vmatprep.mubr.bf16.mxu0 %v2684_v59  ;;  %3201 = vmatprep.mubr.bf16.mxu1 %v2704_v28 }
 0x409   : > { %3446 = vmatpush1.bf16.msra.mxu1 %v4650_v50 }
 0x40a   : > { %v2173_v44 = vpop.permute.xlu1 %2172  ;;  %v2518_v32 = vpop.permute.xlu0 %2517 }
 0x40b   : > { %2190 = vst.msk [vmem:[#allocation3 + $0x100] sm:$0xff] %vm1532_vm0, %v2173_v44  ;;  %2535 = vst.msk [vmem:[#allocation3 + $0x108] sm:$0xff] %vm1532_vm0, %v2518_v32 }
 0x40c   : > { %3202 = vmatmul.mubr.bf16.gmra.mrb[8].mxu1 %v2703_v60  ;;  %v2709_v13 = vld [vmem:[#allocation3 + $0xe0] sm:$0xff]  ;;  %v2708_v53 = vld [vmem:[#allocation3 + $0xd8] sm:$0xff] }
 0x40d   : > { %3209 = vmatprep.mubr.bf16.mxu1 %v2709_v13 }
 0x40e   : > { %3170 = vmatmul.mubr.bf16.vlgmr.msra.gmra.mrb[32].mxu0 %v2683_v41 }
 0x40f   : > { %4411 = vmatpush3.bf16.msra.mxu0 %v5700_v0  ;;  %3177 = vmatprep.mubr.bf16.mxu0 %v2689_v62  ;;  %v2175_v55 = vpop.permute.xlu1 %2174  ;;  %v4640_v0 = vld [vmem:[%s6038_s3 + $0x118] sm:$0xff]  }
 0x410   : > { %4412 = vmatprep.subr.bf16.mxu0 %v4638_v27  ;;  %v2520_v63 = vpop.permute.xlu0 %2519  ;;  %2191 = vst.msk [vmem:[#allocation3 + $0x128] sm:$0xff] %vm1532_vm0, %v2175_v55 }
 0x411   : > { %2536 = vst.msk [vmem:[#allocation3 + $0x130] sm:$0xff] %vm1532_vm0, %v2520_v63 }
 0x412   : > { %v2714_v61 = vld [vmem:[#allocation3 + $0x108] sm:$0xff]  ;;  %v2713_v58 = vld [vmem:[#allocation3 + $0x100] sm:$0xff] }
 0x413   : > { %4413 = vmatpush3.bf16.msra.mxu0 %v4638_v27 }
 0x414   : > { %4414 = vmatprep.subr.bf16.mxu0 %v4639_v43  ;;  %3210 = vmatmul.mubr.bf16.gmra.mrb[12].mxu1 %v2708_v53 }
 0x415   : > { %3217 = vmatprep.mubr.bf16.mxu1 %v2714_v61 }
 0x416   : > { %3178 = vmatmul.mubr.bf16.gmra.mrb[36].mxu0 %v2688_v37 }
 0x417   : > { %4415 = vmatpush3.bf16.msra.mxu0 %v4639_v43  ;;  %4418 = vmatprep.mubr.msk.bf16.mxu0 %vm1256_vm15, %v2685_v40  ;;  %v2718_v35 = vld [vmem:[#allocation3 + $0x128] sm:$0xff] }
 0x418   : > { %4416 = vmatprep.subr.bf16.mxu0 %v4640_v0  ;;  %v2719_v48 = vld [vmem:[#allocation3 + $0x130] sm:$0xff] }
 0x41b   : > { %4417 = vmatpush3.bf16.msra.mxu0 %v4640_v0 }
 0x41c   : > { %3218 = vmatmul.mubr.bf16.gmra.mrb[16].mxu1 %v2713_v58  ;;  %v5816_v58 = vld [vmem:[%s6039_s4] ss:$0 sm:$0xff] }
 0x41d   : > { %3225 = vmatprep.mubr.bf16.mxu1 %v2719_v48 }
 0x41e   : > { %4419 = vmatmul.mubr.msk.bf16.vlgmr.msra.gmra.mrb[40].mxu0 %vm1256_vm15, %v2690_v34 }
 0x41f   : > { %4422 = vmatprep.mubr.msk.bf16.mxu0 %vm1256_vm15, %v2695_v25 }
 0x424   : > { %3226 = vmatmul.mubr.bf16.gmra.mrb[20].mxu1 %v2718_v35 }
 0x425   : > { %3471 = vmatprep.mubr.bf16.mxu1 %v4763_v3 }
 0x426   : > { %4423 = vmatmul.mubr.msk.bf16.gmra.mrb[44].mxu0 %vm1256_vm15, %v2700_v47 }
 0x427   : > { %4426 = vmatprep.mubr.msk.bf16.mxu0 %vm1256_vm15, %v2705_v26 }
 0x42e   : > { %4427 = vmatmul.mubr.msk.bf16.gmra.mrb[48].mxu0 %vm1256_vm15, %v2710_v36 }
 0x42f   : > { %4430 = vmatprep.mubr.msk.bf16.mxu0 %vm1256_vm15, %v2715_v45 }
 0x436   : > { %4431 = vmatmul.mubr.msk.bf16.gmra.mrb[52].mxu0 %vm1256_vm15, %v2720_v29 }
 0x4a1   : > { %v4286_v4 = vpop.f32.mrb[0].mxu0 }
 0x4a2   : > { %v4287_v5 = vpop.f32.mrb[1].mxu0 }
 0x4a3   : > { %v5803_v7 = vadd.f32 %v4287_v5, %v4286_v4  ;;  %v4289_v6 = vpop.f32.mrb[2].mxu0 }
 0x4a4   : > { %v4290_v8 = vpop.f32.mrb[3].mxu0 }
 0x4a5   : > { %v5805_v9 = vadd.f32 %v4290_v8, %v4289_v6 }
 0x4a9   : > { %v4292_v12 = vpop.f32.mrb[4].mxu0 }
 0x4aa   : > { %v4293_v17 = vpop.f32.mrb[5].mxu0 }
 0x4ab   : > { %v5807_v18 = vadd.f32 %v4293_v17, %v4292_v12  ;;  %v4295_v20 = vpop.f32.mrb[6].mxu0 }
 0x4ac   : > { %v4296_v42 = vpop.f32.mrb[7].mxu0 }
 0x4ad   : > { %v5809_v52 = vadd.f32 %v4296_v42, %v4295_v20 }
 0x4b1   : > { %v4298_v19 = vpop.f32.mrb[8].mxu0 }
 0x4b2   : > { %v4299_v21 = vpop.f32.mrb[9].mxu0 }
 0x4b3   : > { %v4300_v54 = vadd.f32 %v4299_v21, %v4298_v19  ;;  %v4301_v15 = vpop.f32.mrb[10].mxu0 }
 0x4b4   : > { %v4302_v57 = vpop.f32.mrb[11].mxu0 }
 0x4b5   : > { %v4303_v14 = vadd.f32 %v4302_v57, %v4301_v15  ;;  %v3091_v25 = vadd.f32 %v4300_v54, %v5816_v58 }
 0x4b7   : > { %v3094_v1 = vadd.f32 %v4303_v14, %v5816_v58 }
 0x4b9   : > { %v4304_v49 = vpop.f32.mrb[12].mxu0 }
 0x4ba   : > { %v4305_v59 = vpop.f32.mrb[13].mxu0 }
 0x4bb   : > { %v4306_v56 = vadd.f32 %v4305_v59, %v4304_v49  ;;  %v4307_v28 = vpop.f32.mrb[14].mxu0 }
 0x4bc   : > { %v4308_v60 = vpop.f32.mrb[15].mxu0 }
 0x4bd   : > { %v4309_v44 = vadd.f32 %v4308_v60, %v4307_v28  ;;  %v3099_v5 = vadd.f32 %v4306_v56, %v5816_v58 }
 0x4bf   : > { %v3102_v19 = vadd.f32 %v4309_v44, %v5816_v58 }
 0x4c1   : > { %v4310_v32 = vpop.f32.mrb[16].mxu0 }
 0x4c2   : > { %v4311_v41 = vpop.f32.mrb[17].mxu0 }
 0x4c3   : > { %v4312_v27 = vadd.f32 %v4311_v41, %v4310_v32  ;;  %v4313_v62 = vpop.f32.mrb[18].mxu0 }
 0x4c4   : > { %v4314_v13 = vpop.f32.mrb[19].mxu0 }
 0x4c5   : > { %v4315_v55 = vadd.f32 %v4314_v13, %v4313_v62  ;;  %v3107_v28 = vadd.f32 %v4312_v27, %v5816_v58  ;;  %v3075_v62 = vadd.f32 %v5803_v7, %v5816_v58 }
 0x4c9   : > { %v4316_v43 = vpop.f32.mrb[20].mxu0 }
 0x4ca   : > { %v4317_v63 = vpop.f32.mrb[21].mxu0 }
 0x4cb   : > { %v4318_v53 = vadd.f32 %v4317_v63, %v4316_v43  ;;  %v4319_v61 = vpop.f32.mrb[22].mxu0  ;;  %v3110_v63 = vadd.f32 %v4315_v55, %v5816_v58 }
 0x4cc   : > { %v4320_v37 = vpop.f32.mrb[23].mxu0 }
 0x4cd   : > { %v5811_v0 = vadd.f32 %v4320_v37, %v4319_v61 }
 0x4cf   : > { %v4362_v40 = vpop.f32.mrb[0].mxu1 }
 0x4d0   : > { %v4363_v48 = vpop.f32.mrb[1].mxu1 }
 0x4d1   : > { %v4322_v34 = vpop.f32.mrb[24].mxu0  ;;  %v4364_v35 = vadd.f32 %v4363_v48, %v4362_v40  ;;  %v4365_v47 = vpop.f32.mrb[2].mxu1  ;;  %v3078_v48 = vadd.f32 %v5805_v9, %v5816_v58  ;;  %v3118_v9 = vadd.f32 %v5811_v0, %v5816_v58 }
 0x4d2   : > { %v4323_v26 = vpop.f32.mrb[25].mxu0  ;;  %v4366_v36 = vpop.f32.mrb[3].mxu1 }
 0x4d3   : > { %v5819_v45 = vadd.f32 %v4323_v26, %v4322_v34  ;;  %v4325_v29 = vpop.f32.mrb[26].mxu0  ;;  %v4367_v16 = vadd.f32 %v4366_v36, %v4365_v47  ;;  %v5822_v46 = vadd.f32 %v4364_v35, %v3091_v25  ;;  %v3115_v36 = vadd.f32 %v4318_v53, %v5816_v58 }
 0x4d4   : > { %v4326_v24 = vpop.f32.mrb[27].mxu0 }
 0x4d5   : > { %v5824_v51 = vadd.f32 %v4326_v24, %v4325_v29  ;;  %v5826_v33 = vadd.f32 %v4367_v16, %v3094_v1  ;;  %v3083_v16 = vadd.f32 %v5807_v18, %v5816_v58  ;;  %v3123_v18 = vadd.f32 %v5819_v45, %v5816_v58 }
 0x4d7   : > { %v4368_v50 = vpop.f32.mrb[4].mxu1 }
 0x4d8   : > { %v4369_v2 = vpop.f32.mrb[5].mxu1 }
 0x4d9   : > { %v4328_v4 = vpop.f32.mrb[28].mxu0  ;;  %v4370_v6 = vadd.f32 %v4369_v2, %v4368_v50  ;;  %v4371_v8 = vpop.f32.mrb[6].mxu1 }
 0x4da   : > { %v4329_v12 = vpop.f32.mrb[29].mxu0  ;;  %v4372_v17 = vpop.f32.mrb[7].mxu1 }
 0x4db   : > { %v5829_v20 = vadd.f32 %v4329_v12, %v4328_v4  ;;  %v4331_v42 = vpop.f32.mrb[30].mxu0  ;;  %v4373_v21 = vadd.f32 %v4372_v17, %v4371_v8  ;;  %v5832_v15 = vadd.f32 %v4370_v6, %v3099_v5  ;;  %v3086_v8 = vadd.f32 %v5809_v52, %v5816_v58 }
 0x4dc   : > { %v4332_v54 = vpop.f32.mrb[31].mxu0  ;;  %v3126_v52 = vadd.f32 %v5824_v51, %v5816_v58 }
 0x4dd   : > { %v5834_v57 = vadd.f32 %v4332_v54, %v4331_v42  ;;  %v5836_v14 = vadd.f32 %v4373_v21, %v3102_v19 }
 0x4df   : > { %v4374_v49 = vpop.f32.mrb[8].mxu1 }
 0x4e0   : > { %v4375_v59 = vpop.f32.mrb[9].mxu1 }
 0x4e1   : > { %v4350_v56 = vpop.f32.mrb[32].mxu0  ;;  %v4376_v60 = vadd.f32 %v4375_v59, %v4374_v49  ;;  %v4377_v32 = vpop.f32.mrb[10].mxu1 }
 0x4e2   : > { %v4351_v41 = vpop.f32.mrb[33].mxu0  ;;  %v4378_v44 = vpop.f32.mrb[11].mxu1 }
 0x4e3   : > { %v4352_v13 = vadd.f32 %v4351_v41, %v4350_v56  ;;  %v4353_v43 = vpop.f32.mrb[34].mxu0  ;;  %v4379_v61 = vadd.f32 %v4378_v44, %v4377_v32  ;;  %v5842_v40 = vadd.f32 %v4376_v60, %v3107_v28 }
 0x4e4   : > { %v4354_v37 = vpop.f32.mrb[35].mxu0 }
 0x4e5   : > { %v4355_v34 = vadd.f32 %v4354_v37, %v4353_v43  ;;  %v3172_v27 = vadd.f32 %v4352_v13, %v3075_v62  ;;  %v5846_v25 = vadd.f32 %v4379_v61, %v3110_v63 }
 0x4e7   : > { %v3175_v35 = vadd.f32 %v4355_v34, %v3078_v48  ;;  %v4380_v47 = vpop.f32.mrb[12].mxu1 }
 0x4e8   : > { %v4381_v26 = vpop.f32.mrb[13].mxu1 }
 0x4e9   : > { %v4356_v7 = vpop.f32.mrb[36].mxu0  ;;  %v4382_v29 = vadd.f32 %v4381_v26, %v4380_v47  ;;  %v4383_v1 = vpop.f32.mrb[14].mxu1 }
 0x4ea   : > { %v4357_v55 = vpop.f32.mrb[37].mxu0  ;;  %v4384_v24 = vpop.f32.mrb[15].mxu1 }
 0x4eb   : > { %v4358_v50 = vadd.f32 %v4357_v55, %v4356_v7  ;;  %v4359_v2 = vpop.f32.mrb[38].mxu0  ;;  %v4385_v4 = vadd.f32 %v4384_v24, %v4383_v1  ;;  %v3212_v6 = vadd.f32 %v4382_v29, %v3115_v36 }
 0x4ec   : > { %v4360_v5 = vpop.f32.mrb[39].mxu0 }
 0x4ed   : > { %v4361_v12 = vadd.f32 %v4360_v5, %v4359_v2  ;;  %v3180_v53 = vadd.f32 %v4358_v50, %v3083_v16  ;;  %v3215_v17 = vadd.f32 %v4385_v4, %v3118_v9  ;;  %v3134_v50 = vadd.f32 %v5834_v57, %v5816_v58 }
 0x4ef   : > { %v3183_v42 = vadd.f32 %v4361_v12, %v3086_v8  ;;  %v4386_v19 = vpop.f32.mrb[16].mxu1 }
 0x4f0   : > { %v4387_v21 = vpop.f32.mrb[17].mxu1 }
 0x4f1   : > { %v4420_v54 = vpop.f32.mrb[40].mxu0  ;;  %v4388_v49 = vadd.f32 %v4387_v21, %v4386_v19  ;;  %v4389_v59 = vpop.f32.mrb[18].mxu1 }
 0x4f2   : > { %v3277_v56 = vadd.f32 %v4420_v54, %v3180_v53  ;;  %v3268_v0 = vpop.f32.mrb[41].mxu0  ;;  %v4390_v28 = vpop.f32.mrb[19].mxu1 }
 0x4f3   : > { %v3269_v60 = vadd.f32 %v3268_v0, %v3172_v27  ;;  %v4421_v32 = vpop.f32.mrb[42].mxu0  ;;  %v4391_v41 = vadd.f32 %v4390_v28, %v4389_v59  ;;  %v3220_v13 = vadd.f32 %v4388_v49, %v3123_v18  ;;  %v3131_v27 = vadd.f32 %v5829_v20, %v5816_v58 }
 0x4f4   : > { %v3280_v62 = vadd.f32 %v4421_v32, %v3183_v42  ;;  %v3271_v44 = vpop.f32.mrb[43].mxu0  ;;  %v3333_v63 = vmax.f32 %v3277_v56, 0.0 }
 0x4f5   : > { %v3272_v43 = vadd.f32 %v3271_v44, %v3175_v35  ;;  %v3223_v37 = vadd.f32 %v4391_v41, %v3126_v52  ;;  %v3331_v48 = vmax.f32 %v3269_v60, 0.0 }
 0x4f6   : > { %v3334_v61 = vmax.f32 %v3280_v62, 0.0 }
 0x4f7   : > { %v3332_v45 = vmax.f32 %v3272_v43, 0.0  ;;  %v4392_v34 = vpop.f32.mrb[20].mxu1 }
 0x4f8   : > { %v3348_v47 = vpack.c.bf16 %v3334_v61, %v3333_v63  ;;  %v4393_v26 = vpop.f32.mrb[21].mxu1 }
 0x4f9   : > { %v3347_v7 = vpack.c.bf16 %v3332_v45, %v3331_v48  ;;  %v4424_v36 = vpop.f32.mrb[44].mxu0  ;;  %v4394_v29 = vadd.f32 %v4393_v26, %v4392_v34  ;;  %v4395_v51 = vpop.f32.mrb[22].mxu1  ;;  %v3363_v26 = vld [vmem:[%s6041_s6] sm:$0x3] }
 0x4fa   : > { %v3293_v1 = vadd.f32 %v4424_v36, %v5832_v15  ;;  %v3284_v55 = vpop.f32.mrb[45].mxu0  ;;  %v4396_v16 = vpop.f32.mrb[23].mxu1 }
 0x4fb   : > { %v3285_v35 = vadd.f32 %v3284_v55, %v5822_v46  ;;  %v4425_v24 = vpop.f32.mrb[46].mxu0  ;;  %4089 = vmatmul.mubr.msk.bf16.vlgmr.msra.gmra.mrb[24].mxu1 %vm1256_vm15, %v3347_v7  ;;  %v4397_v2 = vadd.f32 %v4396_v16, %v4395_v51  ;;  %v3228_v20 = vadd.f32 %v4394_v29, %v3131_v27  ;;  %v3552_v29 = vunpack.c.l.bf16 %v4962_v10 }
 0x4fc   : > { %v3296_v9 = vadd.f32 %v4425_v24, %v5836_v14  ;;  %v3287_v4 = vpop.f32.mrb[47].mxu0  ;;  %3481 = vmatprep.mubr.bf16.mxu1 %v4763_v3  ;;  %v3337_v15 = vmax.f32 %v3293_v1, 0.0  ;;  %v3553_v1 = vunpack.c.h.bf16 %v4962_v10  ;;  %v3554_v16 = vunpack.c.l.bf16 %v4965_v11 }
 0x4fd   : > { %v3288_v5 = vadd.f32 %v3287_v4, %v5826_v33  ;;  %v3231_v12 = vadd.f32 %v4397_v2, %v3134_v50  ;;  %v3335_v53 = vmax.f32 %v3285_v35, 0.0  ;;  %v3555_v50 = vunpack.c.h.bf16 %v4965_v11 }
 0x4fe   : > { %v3338_v8 = vmax.f32 %v3296_v9, 0.0  ;;  %v3557_v11 = vunpack.c.h.bf16 %v5020_v22 }
 0x4ff   : > { %v3336_v46 = vmax.f32 %v3288_v5, 0.0 }
 0x500   : > { %v3350_v42 = vpack.c.bf16 %v3338_v8, %v3337_v15 }
 0x501   : > { %v3349_v19 = vpack.c.bf16 %v3336_v46, %v3335_v53  ;;  %v4428_v21 = vpop.f32.mrb[48].mxu0  ;;  %v3556_v46 = vunpack.c.l.bf16 %v5020_v22 }
 0x502   : > { %v3309_v54 = vadd.f32 %v4428_v21, %v3212_v6  ;;  %v3300_v18 = vpop.f32.mrb[49].mxu0 }
 0x503   : > { %v3301_v58 = vadd.f32 %v3300_v18, %v5842_v40  ;;  %v4429_v57 = vpop.f32.mrb[50].mxu0  ;;  %4090 = vmatmul.mubr.msk.bf16.gmra.mrb[28].mxu1 %vm1256_vm15, %v3348_v47 }
 0x504   : > { %v3312_v14 = vadd.f32 %v4429_v57, %v3215_v17  ;;  %v3303_v49 = vpop.f32.mrb[51].mxu0  ;;  %3491 = vmatprep.mubr.bf16.mxu1 %v4763_v3  ;;  %v3341_v59 = vmax.f32 %v3309_v54, 0.0 }
 0x505   : > { %v3304_v33 = vadd.f32 %v3303_v49, %v5846_v25  ;;  %v3339_v0 = vmax.f32 %v3301_v58, 0.0  ;;  %v3558_v58 = vunpack.c.l.bf16 %v5025_v23 }
 0x506   : > { %v3342_v56 = vmax.f32 %v3312_v14, 0.0 }
 0x507   : > { %v3340_v28 = vmax.f32 %v3304_v33, 0.0  ;;  %v3559_v33 = vunpack.c.h.bf16 %v5025_v23 }
 0x508   : > { %v3352_v60 = vpack.c.bf16 %v3342_v56, %v3341_v59 }
 0x509   : > { %v3351_v32 = vpack.c.bf16 %v3340_v28, %v3339_v0  ;;  %v4432_v52 = vpop.f32.mrb[52].mxu0 }
 0x50a   : > { %v3325_v6 = vadd.f32 %v4432_v52, %v3228_v20  ;;  %v3316_v41 = vpop.f32.mrb[53].mxu0 }
 0x50b   : > { %v3317_v62 = vadd.f32 %v3316_v41, %v3220_v13  ;;  %v4433_v40 = vpop.f32.mrb[54].mxu0  ;;  %4091 = vmatmul.mubr.msk.bf16.gmra.mrb[32].mxu1 %vm1256_vm15, %v3349_v19  ;;  %v3365_v13 = vlaneseq }
 0x50c   : > { %v3328_v44 = vadd.f32 %v4433_v40, %v3231_v12  ;;  %v3319_v17 = vpop.f32.mrb[55].mxu0  ;;  %3501 = vmatprep.mubr.bf16.mxu1 %v4763_v3  ;;  %v3345_v63 = vmax.f32 %v3325_v6, 0.0 }
 0x50d   : > { %v3320_v43 = vadd.f32 %v3319_v17, %v3223_v37  ;;  %v3343_v61 = vmax.f32 %v3317_v62, 0.0  ;;  %v3366_v37 = vshrl.u32 %v3365_v13, 7  ;;  %v3560_v62 = vunpack.c.l.bf16 %v5044_v30 }
 0x50e   : > { %v3346_v25 = vmax.f32 %v3328_v44, 0.0  ;;  %v3561_v17 = vunpack.c.h.bf16 %v5044_v30 }
 0x50f   : > { %v3344_v48 = vmax.f32 %v3320_v43, 0.0  ;;  %v3367_v47 = vsub.s32 0, %v3366_v37  ;;  %v3371_v7 = vsub.s32 1, %v3366_v37 }
 0x510   : > { %v3354_v45 = vpack.c.bf16 %v3346_v25, %v3345_v63  ;;  %v3562_v25 = vunpack.c.l.bf16 %v5047_v31 }
 0x511   : > { %v3353_v34 = vpack.c.bf16 %v3344_v48, %v3343_v61  ;;  %v5887_v36 = vrot.slane %v3363_v26, %v3367_v47  ;;  %v5889_v27 = vrot.slane %v3363_v26, %v3371_v7 }
 0x513   : > { %4092 = vmatmul.mubr.msk.bf16.gmra.mrb[36].mxu1 %vm1256_vm15, %v3350_v42 }
 0x514   : > { %3511 = vmatprep.mubr.bf16.mxu1 %v4763_v3 }
 0x51b   : > { %4093 = vmatmul.mubr.msk.bf16.gmra.mrb[40].mxu1 %vm1256_vm15, %v3351_v32 }
 0x51c   : > { %3521 = vmatprep.mubr.bf16.mxu1 %v4763_v3 }
 0x523   : > { %4094 = vmatmul.mubr.msk.bf16.gmra.mrb[44].mxu1 %vm1256_vm15, %v3352_v60 }
 0x524   : > { %3531 = vmatprep.mubr.bf16.mxu1 %v4763_v3 }
 0x52b   : > { %4095 = vmatmul.mubr.msk.bf16.gmra.mrb[48].mxu1 %vm1256_vm15, %v3353_v34  ;;  %v3563_v34 = vunpack.c.h.bf16 %v5047_v31 }
 0x52c   : > { %3541 = vmatprep.mubr.bf16.mxu1 %v4763_v3 }
 0x533   : > { %4096 = vmatmul.mubr.msk.bf16.gmra.mrb[52].mxu1 %vm1256_vm15, %v3354_v45 }
 0x5ce   : > { %v3473_v51 = vpop.f32.mrb[24].mxu1 }
 0x5cf   : > { %v3474_v3 = vadd.f32 %v3473_v51, %v5887_v36  ;;  %v3475_v55 = vpop.f32.mrb[25].mxu1 }
 0x5d0   : > { %v3476_v35 = vadd.f32 %v3475_v55, %v5889_v27  ;;  %v3477_v24 = vpop.f32.mrb[26].mxu1  ;;  %v3564_v55 = vunpack.c.l.bf16 %v5064_v38 }
 0x5d1   : > { %v3584_v2 = vadd.f32 %v3552_v29, %v3474_v3  ;;  %v3478_v9 = vadd.f32 %v3477_v24, %v5887_v36  ;;  %v3479_v4 = vpop.f32.mrb[27].mxu1  ;;  %v3565_v24 = vunpack.c.h.bf16 %v5064_v38 }
 0x5d2   : > { %v3585_v20 = vadd.f32 %v3553_v1, %v3476_v35  ;;  %v3480_v5 = vadd.f32 %v3479_v4, %v5889_v27 }
 0x5d3   : > { %v3616_v15 = vmax.f32 %v3584_v2, 0.0  ;;  %v3586_v10 = vadd.f32 %v3554_v16, %v3478_v9  ;;  %v3566_v9 = vunpack.c.l.bf16 %v5067_v39 }
 0x5d4   : > { %v3617_v8 = vmax.f32 %v3585_v20, 0.0  ;;  %v3587_v12 = vadd.f32 %v3555_v50, %v3480_v5 }
 0x5d5   : > { %v3618_v53 = vmax.f32 %v3586_v10, 0.0 }
 0x5d6   : > { %v4145_v42 = vpack.c.bf16 %v3617_v8, %v3616_v15  ;;  %v3619_v19 = vmax.f32 %v3587_v12, 0.0  ;;  %v3483_v21 = vpop.f32.mrb[28].mxu1  ;;  %v3567_v15 = vunpack.c.h.bf16 %v5067_v39 }
 0x5d7   : > { %v3484_v54 = vadd.f32 %v3483_v21, %v5887_v36  ;;  %v3485_v18 = vpop.f32.mrb[29].mxu1 }
 0x5d8   : > { %3744 = vst [vmem:[%s5227_s21] sm:$0xff] %v4145_v42  ;;  %v4146_v57 = vpack.c.bf16 %v3619_v19, %v3618_v53  ;;  %v3486_v14 = vadd.f32 %v3485_v18, %v5889_v27  ;;  %v3487_v49 = vpop.f32.mrb[30].mxu1 }
 0x5d9   : > { %v3588_v59 = vadd.f32 %v3556_v46, %v3484_v54  ;;  %v3488_v56 = vadd.f32 %v3487_v49, %v5887_v36  ;;  %v3489_v0 = vpop.f32.mrb[31].mxu1  ;;  %v6085_v54 = vld [vmem:[#allocation7_spill] sm:$0xff] }
 0x5da   : > { %3745 = vst [vmem:[%s5227_s21 + $0x8] sm:$0xff] %v4146_v57  ;;  %v3589_v28 = vadd.f32 %v3557_v11, %v3486_v14  ;;  %v3490_v22 = vadd.f32 %v3489_v0, %v5889_v27  ;;  %v3568_v18 = vunpack.c.l.bf16 %v6085_v54  ;;  %v3569_v14 = vunpack.c.h.bf16 %v6085_v54 }
 0x5db   : > { %v3620_v60 = vmax.f32 %v3588_v59, 0.0  ;;  %v3590_v32 = vadd.f32 %v3558_v58, %v3488_v56  ;;  %v6086_v59 = vld [vmem:[#allocation8_spill] sm:$0xff] }
 0x5dc   : > { %v3621_v52 = vmax.f32 %v3589_v28, 0.0  ;;  %v3591_v6 = vadd.f32 %v3559_v33, %v3490_v22  ;;  %v3570_v56 = vunpack.c.l.bf16 %v6086_v59 }
 0x5dd   : > { %v3622_v41 = vmax.f32 %v3590_v32, 0.0 }
 0x5de   : > { %v4147_v40 = vpack.c.bf16 %v3621_v52, %v3620_v60  ;;  %v3623_v44 = vmax.f32 %v3591_v6, 0.0  ;;  %v3493_v23 = vpop.f32.mrb[32].mxu1  ;;  %v3571_v60 = vunpack.c.h.bf16 %v6086_v59 }
 0x5df   : > { %v3494_v43 = vadd.f32 %v3493_v23, %v5887_v36  ;;  %v3495_v63 = vpop.f32.mrb[33].mxu1 }
 0x5e0   : > { %3746 = vst [vmem:[%s5227_s21 + $0x10] sm:$0xff] %v4147_v40  ;;  %v4148_v61 = vpack.c.bf16 %v3623_v44, %v3622_v41  ;;  %v3496_v48 = vadd.f32 %v3495_v63, %v5889_v27  ;;  %v3497_v45 = vpop.f32.mrb[34].mxu1  ;;  %v6087_v63 = vld [vmem:[#allocation9_spill] sm:$0xff] }
 0x5e1   : > { %v3592_v13 = vadd.f32 %v3560_v62, %v3494_v43  ;;  %v3498_v37 = vadd.f32 %v3497_v45, %v5887_v36  ;;  %v3499_v47 = vpop.f32.mrb[35].mxu1 }
 0x5e2   : > { %3747 = vst [vmem:[%s5227_s21 + $0x18] sm:$0xff] %v4148_v61  ;;  %v3593_v26 = vadd.f32 %v3561_v17, %v3496_v48  ;;  %v3500_v30 = vadd.f32 %v3499_v47, %v5889_v27  ;;  %v6088_v47 = vld [vmem:[#allocation10_spill] sm:$0xff] }
 0x5e3   : > { %v3624_v7 = vmax.f32 %v3592_v13, 0.0  ;;  %v3594_v29 = vadd.f32 %v3562_v25, %v3498_v37  ;;  %v3572_v25 = vunpack.c.l.bf16 %v6087_v63 }
 0x5e4   : > { %v3625_v51 = vmax.f32 %v3593_v26, 0.0  ;;  %v3595_v1 = vadd.f32 %v3563_v34, %v3500_v30  ;;  %v3573_v34 = vunpack.c.h.bf16 %v6087_v63  ;;  %v3574_v26 = vunpack.c.l.bf16 %v6088_v47 }
 0x5e5   : > { %v3626_v3 = vmax.f32 %v3594_v29, 0.0 }
 0x5e6   : > { %v4149_v16 = vpack.c.bf16 %v3625_v51, %v3624_v7  ;;  %v3627_v35 = vmax.f32 %v3595_v1, 0.0  ;;  %v3503_v31 = vpop.f32.mrb[36].mxu1  ;;  %v3575_v51 = vunpack.c.h.bf16 %v6088_v47 }
 0x5e7   : > { %v3504_v50 = vadd.f32 %v3503_v31, %v5887_v36  ;;  %v3505_v2 = vpop.f32.mrb[37].mxu1 }
 0x5e8   : > { %3748 = vst [vmem:[%s5227_s21 + $0x20] sm:$0xff] %v4149_v16  ;;  %v4150_v4 = vpack.c.bf16 %v3627_v35, %v3626_v3  ;;  %v3506_v20 = vadd.f32 %v3505_v2, %v5889_v27  ;;  %v3507_v5 = vpop.f32.mrb[38].mxu1 }
 0x5e9   : > { %v3596_v10 = vadd.f32 %v3564_v55, %v3504_v50  ;;  %v3508_v8 = vadd.f32 %v3507_v5, %v5887_v36  ;;  %v3509_v12 = vpop.f32.mrb[39].mxu1 }
 0x5ea   : > { %3749 = vst [vmem:[%s5227_s21 + $0x28] sm:$0xff] %v4150_v4  ;;  %v3597_v53 = vadd.f32 %v3565_v24, %v3506_v20  ;;  %v3510_v38 = vadd.f32 %v3509_v12, %v5889_v27  ;;  %v6089_v4 = vld [vmem:[#allocation11_spill] sm:$0xff] }
 0x5eb   : > { %v3628_v46 = vmax.f32 %v3596_v10, 0.0  ;;  %v3598_v42 = vadd.f32 %v3566_v9, %v3508_v8  ;;  %v3576_v20 = vunpack.c.l.bf16 %v6089_v4  ;;  %v3577_v8 = vunpack.c.h.bf16 %v6089_v4 }
 0x5ec   : > { %v3629_v19 = vmax.f32 %v3597_v53, 0.0  ;;  %v3599_v21 = vadd.f32 %v3567_v15, %v3510_v38  ;;  %v6090_v38 = vld [vmem:[#allocation12_spill] sm:$0xff] }
 0x5ed   : > { %v3630_v11 = vmax.f32 %v3598_v42, 0.0 }
 0x5ee   : > { %v4151_v58 = vpack.c.bf16 %v3629_v19, %v3628_v46  ;;  %v3631_v57 = vmax.f32 %v3599_v21, 0.0  ;;  %v3513_v39 = vpop.f32.mrb[40].mxu1  ;;  %v3578_v46 = vunpack.c.l.bf16 %v6090_v38 }
 0x5ef   : > { %v3514_v49 = vadd.f32 %v3513_v39, %v5887_v36  ;;  %v3515_v33 = vpop.f32.mrb[41].mxu1 }
 0x5f0   : > { %3750 = vst [vmem:[%s5227_s21 + $0x30] sm:$0xff] %v4151_v58  ;;  %v4152_v0 = vpack.c.bf16 %v3631_v57, %v3630_v11  ;;  %v3516_v28 = vadd.f32 %v3515_v33, %v5889_v27  ;;  %v3517_v22 = vpop.f32.mrb[42].mxu1  ;;  %v3579_v11 = vunpack.c.h.bf16 %v6090_v38 }
 0x5f1   : > { %v3600_v32 = vadd.f32 %v3568_v18, %v3514_v49  ;;  %v3518_v52 = vadd.f32 %v3517_v22, %v5887_v36  ;;  %v3519_v6 = vpop.f32.mrb[43].mxu1 }
 0x5f2   : > { %3751 = vst [vmem:[%s5227_s21 + $0x38] sm:$0xff] %v4152_v0  ;;  %v3601_v41 = vadd.f32 %v3569_v14, %v3516_v28  ;;  %v3520_v62 = vadd.f32 %v3519_v6, %v5889_v27  ;;  %v6091_v0 = vld [vmem:[#allocation13_spill] sm:$0xff] }
 0x5f3   : > { %v3632_v40 = vmax.f32 %v3600_v32, 0.0  ;;  %v3602_v44 = vadd.f32 %v3570_v56, %v3518_v52  ;;  %v3580_v28 = vunpack.c.l.bf16 %v6091_v0  ;;  %v3581_v52 = vunpack.c.h.bf16 %v6091_v0 }
 0x5f4   : > { %v3633_v23 = vmax.f32 %v3601_v41, 0.0  ;;  %v3603_v17 = vadd.f32 %v3571_v60, %v3520_v62  ;;  %v6092_v62 = vld [vmem:[#allocation14_spill] sm:$0xff] }
 0x5f5   : > { %v3634_v43 = vmax.f32 %v3602_v44, 0.0 }
 0x5f6   : > { %v4153_v61 = vpack.c.bf16 %v3633_v23, %v3632_v40  ;;  %v3635_v48 = vmax.f32 %v3603_v17, 0.0  ;;  %v3523_v45 = vpop.f32.mrb[44].mxu1  ;;  %v3582_v40 = vunpack.c.l.bf16 %v6092_v62 }
 0x5f7   : > { %v3524_v13 = vadd.f32 %v3523_v45, %v5887_v36  ;;  %v3525_v37 = vpop.f32.mrb[45].mxu1 }
 0x5f8   : > { %3752 = vst [vmem:[%s5227_s21 + $0x40] sm:$0xff] %v4153_v61  ;;  %v4154_v30 = vpack.c.bf16 %v3635_v48, %v3634_v43  ;;  %v3526_v7 = vadd.f32 %v3525_v37, %v5889_v27  ;;  %v3527_v29 = vpop.f32.mrb[46].mxu1  ;;  %v3583_v43 = vunpack.c.h.bf16 %v6092_v62 }
 0x5f9   : > { %v3604_v1 = vadd.f32 %v3572_v25, %v3524_v13  ;;  %v3528_v3 = vadd.f32 %v3527_v29, %v5887_v36  ;;  %v3529_v55 = vpop.f32.mrb[47].mxu1 }
 0x5fa   : > { %3753 = vst [vmem:[%s5227_s21 + $0x48] sm:$0xff] %v4154_v30  ;;  %v3605_v16 = vadd.f32 %v3573_v34, %v3526_v7  ;;  %v3530_v35 = vadd.f32 %v3529_v55, %v5889_v27 }
 0x5fb   : > { %v3636_v31 = vmax.f32 %v3604_v1, 0.0  ;;  %v3606_v24 = vadd.f32 %v3574_v26, %v3528_v3 }
 0x5fc   : > { %v3637_v50 = vmax.f32 %v3605_v16, 0.0  ;;  %v3607_v2 = vadd.f32 %v3575_v51, %v3530_v35 }
 0x5fd   : > { %v3638_v9 = vmax.f32 %v3606_v24, 0.0 }
 0x5fe   : > { %v4155_v5 = vpack.c.bf16 %v3637_v50, %v3636_v31  ;;  %v3639_v15 = vmax.f32 %v3607_v2, 0.0  ;;  %v3533_v10 = vpop.f32.mrb[48].mxu1 }
 0x5ff   : > { %v3534_v12 = vadd.f32 %v3533_v10, %v5887_v36  ;;  %v3535_v53 = vpop.f32.mrb[49].mxu1 }
 0x600   : > { %3754 = vst [vmem:[%s5227_s21 + $0x50] sm:$0xff] %v4155_v5  ;;  %v4156_v42 = vpack.c.bf16 %v3639_v15, %v3638_v9  ;;  %v3536_v19 = vadd.f32 %v3535_v53, %v5889_v27  ;;  %v3537_v21 = vpop.f32.mrb[50].mxu1 }
 0x601   : > { %v3608_v54 = vadd.f32 %v3576_v20, %v3534_v12  ;;  %v3538_v18 = vadd.f32 %v3537_v21, %v5887_v36  ;;  %v3539_v58 = vpop.f32.mrb[51].mxu1 }
 0x602   : > { %3755 = vst [vmem:[%s5227_s21 + $0x58] sm:$0xff] %v4156_v42  ;;  %v3609_v57 = vadd.f32 %v3577_v8, %v3536_v19  ;;  %v3540_v39 = vadd.f32 %v3539_v58, %v5889_v27 }
 0x603   : > { %v3640_v14 = vmax.f32 %v3608_v54, 0.0  ;;  %v3610_v49 = vadd.f32 %v3578_v46, %v3538_v18 }
 0x604   : > { %v3641_v33 = vmax.f32 %v3609_v57, 0.0  ;;  %v3611_v59 = vadd.f32 %v3579_v11, %v3540_v39 }
 0x605   : > { %v3642_v56 = vmax.f32 %v3610_v49, 0.0 }
 0x606   : > { %v4157_v22 = vpack.c.bf16 %v3641_v33, %v3640_v14  ;;  %v3643_v60 = vmax.f32 %v3611_v59, 0.0  ;;  %v3543_v32 = vpop.f32.mrb[52].mxu1 }
 0x607   : > { %v3544_v6 = vadd.f32 %v3543_v32, %v5887_v36  ;;  %v3545_v41 = vpop.f32.mrb[53].mxu1 }
 0x608   : > { %3756 = vst [vmem:[%s5227_s21 + $0x60] sm:$0xff] %v4157_v22  ;;  %v4158_v44 = vpack.c.bf16 %v3643_v60, %v3642_v56  ;;  %v3546_v23 = vadd.f32 %v3545_v41, %v5889_v27  ;;  %v3547_v17 = vpop.f32.mrb[54].mxu1 }
 0x609   : > { %v3612_v63 = vadd.f32 %v3580_v28, %v3544_v6  ;;  %v3548_v25 = vadd.f32 %v3547_v17, %v5887_v36  ;;  %v3549_v61 = vpop.f32.mrb[55].mxu1 }
 0x60a   : > { %3757 = vst [vmem:[%s5227_s21 + $0x68] sm:$0xff] %v4158_v44  ;;  %v3613_v48 = vadd.f32 %v3581_v52, %v3546_v23  ;;  %v3550_v45 = vadd.f32 %v3549_v61, %v5889_v27 }
 0x60b   : > { %v3644_v34 = vmax.f32 %v3612_v63, 0.0  ;;  %v3614_v13 = vadd.f32 %v3582_v40, %v3548_v25 }
 0x60c   : > { %v3645_v37 = vmax.f32 %v3613_v48, 0.0  ;;  %v3615_v47 = vadd.f32 %v3583_v43, %v3550_v45 }
 0x60d   : > { %v3646_v26 = vmax.f32 %v3614_v13, 0.0 }
 0x60e   : > { %v4159_v30 = vpack.c.bf16 %v3645_v37, %v3644_v34  ;;  %v3647_v7 = vmax.f32 %v3615_v47, 0.0 }
 0x610   : > { %3758 = vst [vmem:[%s5227_s21 + $0x70] sm:$0xff] %v4159_v30  ;;  %v4160_v36 = vpack.c.bf16 %v3647_v7, %v3646_v26 }
 0x612   : > { %3759 = vst [vmem:[%s5227_s21 + $0x78] sm:$0xff] %v4160_v36 }
 0x613   : > { %4677 = shalt.err (!%p4674_p11)
}
 0x614   : > { %s4678_s21 = scalar_lea.hbm %s5978_s23, 2048  ;;  %s4682_s17 = scalar_lea.hbm %s6042_s7, 8192 }
 0x615   : > { %p4679_p12 = scmp.ne.s32.totalorder %s5978_s23, %s4678_s21  ;;  %p4683_p1 = scmp.lt.u32.totalorder %s5978_s23, %s6042_s7 }
 0x616   : > { %p4684_p2 = scmp.lt.u32.totalorder %s4682_s17, %s4678_s21  ;;  %p4686_p5 = scmp.lt.u32.totalorder %s4678_s21, %s5978_s23 }
 0x617   : > { %p4680_p13 = pnand %p4679_p12, %p4858_p3 }
 0x618   : > { %p4685_p4 = por %p4684_p2, %p4683_p1 }
 0x619   : > { %p4681_p0 = pneg %p4680_p13 }
 0x61a   : > { %p4687_p6 = por %p4686_p5, %p4685_p4 }
 0x61c   : > { %p4688_p7 = pnand %p4687_p6, %p4681_p0 }
 0x61e   : > { %4691 = shalt.err (!%p4688_p7)
}
 0x61f   : > { %s4765_s13 = smov 128   ;;  %s4766_s16 = smov 8  }
 0x620   : > { %4466 = dma.vmem_to_hbm [thread:$0]  (%p4858_p3), %s5972_s28, 2048, %s5978_s23, %s5983_s22, %s4765_s13, %s4765_s13, %s4766_s16  }
 0x621 PF: > { %p4472_p9 = scmp.ge.s32.totalorder %s4758_s8, 2  ;;  %s3792_s9 = sand.u32 1, %s4730_s24  }
 0x622   : > { %s3793_s10 = scalar_lea.sflag [#allocation5], %s3792_s9 }
 0x623   : > { %p4469_p10 = pnand %p4472_p9, %p4867_p8 }
 0x625   : > { %4725 = dma.done.wait (!%p4469_p10), %s3793_s10, 2048  }
 0x626   : > { %4727 = vsyncadd (!%p4469_p10), %s3793_s10, 4294965248  ;;  %s20_s8 = sadd.s32 1, %s4758_s8   ;;  %s6094_s24 = smov %s4734_s25 }
 0x627   : > { %p17_p11 = scmp.ge.s32.totalorder %s20_s8, 6   ;;  %s6095_s25 = smov %s4738_s26 }
 0x628   : > { %s6096_s26 = smov %s4876_s19  ;;  %s6097_s27 = smov %s4750_s29 }
 0x629   : > { %s6098_s28 = smov %s4754_s30  ;;  %s6099_s29 = smov %s6102_s11 }
 0x62a   : > { %s6100_s30 = smov %s6106_s12  ;;  %19 = sbr.rel (!%p17_p11) target bundleno = 7 (0x7), region = 106 }
 0x631   :  { %3798 = vsyncpa [#allocation5], 1 }
 0x632   :  { %3800 = vsyncpa [#allocation5 + $0x1], 1 }

</bundles_post_ra>
